<compile_context>
chip_gen: v5e
topology: v5e:2x2
jax: 0.10.0
libtpu: 0.0.40
codegen_flags: <defaults>
</compile_context>

<pallas_src>
import jax
import jax.numpy as jnp
from jax import lax
from jax.experimental import pallas as pl
from jax.experimental.pallas import tpu as pltpu


# Packed-weight row layout (rows 0..7 are the "header", matmul weights 8-aligned).
_ROW_WIH0 = 0   # (1, 4H) layer-0 ih weight (input_size == 1)
_ROW_B0 = 1     # (1, 4H) b_ih_l0 + b_hh_l0
_ROW_B1 = 2     # (1, 4H) b_ih_l1 + b_hh_l1
_ROW_FCW = 3    # (1, 4H) fc weight in lanes [0:H], zero-padded
_ROW_FCB = 4    # fc bias at [4, 0]
_HEAD_ROWS = 8  # pad header to a full sublane tile so weight slices stay aligned


def lstm_fc_kernel(x_ref, w_ref, out_ref):
    """Whole 2-layer LSTM recurrence + final Linear, executed in VMEM."""
    B, T = x_ref.shape
    G = w_ref.shape[1]          # 4H
    H = G // 4

    # Zero-cost, 8-aligned ref views of the packed weight buffer.
    whh0 = w_ref.at[pl.ds(_HEAD_ROWS, H), :]            # (H, 4H)
    wih1 = w_ref.at[pl.ds(_HEAD_ROWS + H, H), :]        # (H, 4H)
    whh1 = w_ref.at[pl.ds(_HEAD_ROWS + 2 * H, H), :]    # (H, 4H)

    wih0 = w_ref[pl.ds(_ROW_WIH0, 1), :]                # (1, 4H)
    b0 = w_ref[pl.ds(_ROW_B0, 1), :]                    # (1, 4H)
    b1 = w_ref[pl.ds(_ROW_B1, 1), :]                    # (1, 4H)
    fcw = w_ref[pl.ds(_ROW_FCW, 1), :][:, 0:H]          # (1, H)
    fcb = w_ref[pl.ds(_ROW_FCB, 1), :][:, 0:1]          # (1, 1)

    x = x_ref[...].astype(jnp.float32)                  # (B, T)

    # Layer-0 input projection for ALL timesteps at once (input_size == 1 =>
    # rank-1 broadcast multiply); per-step use is a static sublane slice.
    xin_all = x[:, :, None] * wih0.reshape(1, 1, G) + b0.reshape(1, 1, G)  # (B,T,4H)

    # Hoisted broadcast (JAX does not CSE broadcast_in_dim across the unroll).
    b1b = jnp.broadcast_to(b1, (B, G))

    def gates_to_hc(g, c_prev):
        # Gate lanes pre-reordered to (i, f, o, g): sigmoid over both full
        # 128-lane vregs, tanh over the (128-aligned) second vreg only.
        sig = jax.nn.sigmoid(g)
        tnh = jnp.tanh(g[:, 2 * H:4 * H])
        i = sig[:, 0:H]
        f = sig[:, H:2 * H]
        o = sig[:, 2 * H:3 * H]
        gt = tnh[:, H:2 * H]
        c = f * c_prev + i * gt
        h = o * jnp.tanh(c)
        return h, c

    zeros = jnp.zeros((B, H), jnp.float32)

    # t = 0: zero initial state => both hh matmuls vanish.
    h1, c1 = gates_to_hc(xin_all[:, 0, :], zeros)
    g1 = jnp.dot(h1, wih1[...], preferred_element_type=jnp.float32) + b1b
    h2, c2 = gates_to_hc(g1, zeros)

    # Remaining steps, fully unrolled (T small & static) so the scheduler can
    # overlap pre1 (depends only on h2_{t-1}) with layer-0 of step t.
    for t in range(1, T):
        pre1 = jnp.dot(h2, whh1[...], preferred_element_type=jnp.float32) + b1b
        g0 = xin_all[:, t, :] + jnp.dot(h1, whh0[...],
                                        preferred_element_type=jnp.float32)
        h1, c1 = gates_to_hc(g0, c1)
        g1 = jnp.dot(h1, wih1[...], preferred_element_type=jnp.float32) + pre1
        h2, c2 = gates_to_hc(g1, c2)

    # fc(out[:, -1, :]): N=1 output -> VPU multiply + lane reduction (no MXU).
    fc = jnp.sum(h2 * fcw, axis=-1, keepdims=True) + fcb
    out_ref[...] = fc.astype(out_ref.dtype)


def _reorder_gates(a, H, axis):
    """PyTorch gate order (i, f, g, o) -> (i, f, o, g) along `axis`."""
    i_f = lax.slice_in_dim(a, 0, 2 * H, axis=axis)
    g = lax.slice_in_dim(a, 2 * H, 3 * H, axis=axis)
    o = lax.slice_in_dim(a, 3 * H, 4 * H, axis=axis)
    return jnp.concatenate([i_f, o, g], axis=axis)


def prepare_params(params):
    """One-time (model-load) weight fusion: transpose, bias-sum, gate reorder,
    and packing of every operand into a single f32 VMEM buffer."""
    H = params["weight_hh_l0"].shape[1]
    I = params["weight_ih_l0"].shape[1]
    assert I == 1, "kernel specializes on input_size == 1"
    G = 4 * H
    f32 = lambda a: jnp.asarray(a, jnp.float32)

    wih0 = _reorder_gates(f32(params["weight_ih_l0"]).T, H, 1)          # (1, 4H)
    whh0 = _reorder_gates(f32(params["weight_hh_l0"]).T, H, 1)          # (H, 4H)
    b0 = _reorder_gates(
        f32(params["bias_ih_l0"] + params["bias_hh_l0"]), H, 0)         # (4H,)
    wih1 = _reorder_gates(f32(params["weight_ih_l1"]).T, H, 1)          # (H, 4H)
    whh1 = _reorder_gates(f32(params["weight_hh_l1"]).T, H, 1)          # (H, 4H)
    b1 = _reorder_gates(
        f32(params["bias_ih_l1"] + params["bias_hh_l1"]), H, 0)         # (4H,)
    fcw = f32(params["fc_weight"])                                      # (1, H)
    fcb = f32(params["fc_bias"]).reshape(())                            # scalar

    head = jnp.zeros((_HEAD_ROWS, G), jnp.float32)
    head = head.at[_ROW_WIH0].set(wih0[0])
    head = head.at[_ROW_B0].set(b0)
    head = head.at[_ROW_B1].set(b1)
    head = head.at[_ROW_FCW, 0:H].set(fcw[0])
    head = head.at[_ROW_FCB, 0].set(fcb)

    wpack = jnp.concatenate([head, whh0, wih1, whh1], axis=0)           # (8+3H, 4H)
    return {"wpack": wpack}


def lstm_model_forward(x, prep):
    """x: (B, T, I) float32, batch_first — same convention as the PyTorch module."""
    B, T, I = x.shape
    assert I == 1, "kernel specializes on input_size == 1"
    x2d = x.reshape(B, T).astype(jnp.float32)   # drop trailing size-1 dim, no transpose

    vmem = pl.BlockSpec(memory_space=pltpu.MemorySpace.VMEM)
    # Gridless: total resident footprint is < 0.5 MiB, so no tiling/pipelining.
    return pl.pallas_call(
        lstm_fc_kernel,
        out_shape=jax.ShapeDtypeStruct((B, 1), jnp.float32),
        in_specs=[vmem, vmem],
        out_specs=vmem,
    )(x2d, prep["wpack"])


def lstm_model_ref(x, params):
    """Pure-JAX reference matching torch.nn.LSTM(batch_first=True) + Linear."""
    B, T, I = x.shape
    H = params["weight_hh_l0"].shape[1]

    def cell(x_t, h, c, wih, whh, bih, bhh):
        g = x_t @ wih.T + h @ whh.T + bih + bhh
        i = jax.nn.sigmoid(g[:, 0 * H:1 * H])
        f = jax.nn.sigmoid(g[:, 1 * H:2 * H])
        gg = jnp.tanh(g[:, 2 * H:3 * H])
        o = jax.nn.sigmoid(g[:, 3 * H:4 * H])
        c = f * c + i * gg
        h = o * jnp.tanh(c)
        return h, c

    h1 = c1 = h2 = c2 = jnp.zeros((B, H), jnp.float32)
    for t in range(T):
        h1, c1 = cell(x[:, t, :], h1, c1,
                      params["weight_ih_l0"], params["weight_hh_l0"],
                      params["bias_ih_l0"], params["bias_hh_l0"])
        h2, c2 = cell(h1, h2, c2,
                      params["weight_ih_l1"], params["weight_hh_l1"],
                      params["bias_ih_l1"], params["bias_hh_l1"])
    return h2 @ params["fc_weight"].T + params["fc_bias"]


def init_params(key, input_size=1, hidden=64):
    """Deterministic init with PyTorch's shapes (uniform(-1/sqrt(H), 1/sqrt(H)))."""
    k = 1.0 / jnp.sqrt(jnp.float32(hidden))
    names_shapes = [
        ("weight_ih_l0", (4 * hidden, input_size)),
        ("weight_hh_l0", (4 * hidden, hidden)),
        ("bias_ih_l0", (4 * hidden,)),
        ("bias_hh_l0", (4 * hidden,)),
        ("weight_ih_l1", (4 * hidden, hidden)),
        ("weight_hh_l1", (4 * hidden, hidden)),
        ("bias_ih_l1", (4 * hidden,)),
        ("bias_hh_l1", (4 * hidden,)),
        ("fc_weight", (1, hidden)),
        ("fc_bias", (1,)),
    ]
    keys = jax.random.split(key, len(names_shapes))
    return {
        name: jax.random.uniform(kk, shape, jnp.float32, -k, k)
        for kk, (name, shape) in zip(keys, names_shapes)
    }


if __name__ == "__main__":
    key = jax.random.PRNGKey(0)
    k_x, k_p = jax.random.split(key)

    B, T, I, H = 2, 8, 1, 64        # module defaults: input_size=1, hidden=64
    x = jax.random.normal(k_x, (B, T, I), jnp.float32)
    params = init_params(k_p, input_size=I, hidden=H)

    prep = jax.tree_util.tree_map(jax.block_until_ready, prepare_params(params))

    out = jax.block_until_ready(lstm_model_forward(x, prep))
    ref = jax.block_until_ready(lstm_model_ref(x, params))

    assert out.shape == (B, 1), out.shape
    assert jnp.allclose(out, ref, rtol=1e-4, atol=1e-5), (out, ref)
    print("KERNEL_OK")
</pallas_src>

<mosaic_0001>
module attributes {stable_mosaic.version = 11 : i64} {
  func.func @lstm_fc_kernel(%arg0: memref<2x8xf32, #tpu.memory_space<vmem>>, %arg1: memref<200x256xf32, #tpu.memory_space<vmem>>, %arg2: memref<2x1xf32, #tpu.memory_space<vmem>>) attributes {dimension_semantics = [], scalar_prefetch = 0 : i64, scratch_operands = 0 : i64, tpu.core_type = #tpu.core_type<tc>} {
    %c0 = arith.constant 0 : index
    %c0_0 = arith.constant 0 : index
    %0 = vector.load %arg1[%c0, %c0_0] : memref<200x256xf32, #tpu.memory_space<vmem>>, vector<1x256xf32>
    %c1 = arith.constant 1 : index
    %c0_1 = arith.constant 0 : index
    %1 = vector.load %arg1[%c1, %c0_1] : memref<200x256xf32, #tpu.memory_space<vmem>>, vector<1x256xf32>
    %c2 = arith.constant 2 : index
    %c0_2 = arith.constant 0 : index
    %2 = vector.load %arg1[%c2, %c0_2] : memref<200x256xf32, #tpu.memory_space<vmem>>, vector<1x256xf32>
    %c3 = arith.constant 3 : index
    %c0_3 = arith.constant 0 : index
    %3 = vector.load %arg1[%c3, %c0_3] : memref<200x256xf32, #tpu.memory_space<vmem>>, vector<1x256xf32>
    %4 = vector.extract_strided_slice %3 {offsets = [0, 0], sizes = [1, 64], strides = [1, 1]} : vector<1x256xf32> to vector<1x64xf32>
    %c4 = arith.constant 4 : index
    %c0_4 = arith.constant 0 : index
    %5 = vector.load %arg1[%c4, %c0_4] : memref<200x256xf32, #tpu.memory_space<vmem>>, vector<1x256xf32>
    %6 = vector.extract_strided_slice %5 {offsets = [0, 0], sizes = [1, 1], strides = [1, 1]} : vector<1x256xf32> to vector<1x1xf32>
    %c0_5 = arith.constant 0 : index
    %c0_6 = arith.constant 0 : index
    %7 = vector.load %arg0[%c0_5, %c0_6] : memref<2x8xf32, #tpu.memory_space<vmem>>, vector<2x8xf32>
    %8 = vector.shape_cast %7 : vector<2x8xf32> to vector<2x8x1xf32>
    %9 = vector.shape_cast %0 : vector<1x256xf32> to vector<1x1x256xf32>
    %10 = vector.broadcast %8 : vector<2x8x1xf32> to vector<2x8x256xf32>
    %11 = vector.broadcast %9 : vector<1x1x256xf32> to vector<2x8x256xf32>
    %12 = arith.mulf %10, %11 : vector<2x8x256xf32>
    %13 = vector.shape_cast %1 : vector<1x256xf32> to vector<1x1x256xf32>
    %14 = vector.broadcast %13 : vector<1x1x256xf32> to vector<2x8x256xf32>
    %15 = arith.addf %12, %14 : vector<2x8x256xf32>
    %16 = vector.shape_cast %2 : vector<1x256xf32> to vector<1x256xf32>
    %17 = vector.broadcast %16 : vector<1x256xf32> to vector<2x256xf32>
    %cst = arith.constant 0.000000e+00 : f32
    %18 = vector.broadcast %cst : f32 to vector<2x64xf32>
    %19 = vector.extract_strided_slice %15 {offsets = [0, 0, 0], sizes = [2, 1, 256], strides = [1, 1, 1]} : vector<2x8x256xf32> to vector<2x1x256xf32>
    %20 = vector.shape_cast %19 : vector<2x1x256xf32> to vector<2x256xf32>
    %21 = arith.negf %20 : vector<2x256xf32>
    %22 = math.exp %21 : vector<2x256xf32>
    %cst_7 = arith.constant 1.000000e+00 : f32
    %23 = vector.broadcast %cst_7 : f32 to vector<2x256xf32>
    %24 = arith.addf %23, %22 : vector<2x256xf32>
    %25 = arith.divf %23, %24 : vector<2x256xf32>
    %26 = vector.extract_strided_slice %20 {offsets = [0, 128], sizes = [2, 128], strides = [1, 1]} : vector<2x256xf32> to vector<2x128xf32>
    %27 = math.tanh %26 : vector<2x128xf32>
    %28 = vector.extract_strided_slice %25 {offsets = [0, 0], sizes = [2, 64], strides = [1, 1]} : vector<2x256xf32> to vector<2x64xf32>
    %29 = vector.extract_strided_slice %25 {offsets = [0, 64], sizes = [2, 64], strides = [1, 1]} : vector<2x256xf32> to vector<2x64xf32>
    %30 = vector.extract_strided_slice %25 {offsets = [0, 128], sizes = [2, 64], strides = [1, 1]} : vector<2x256xf32> to vector<2x64xf32>
    %31 = vector.extract_strided_slice %27 {offsets = [0, 64], sizes = [2, 64], strides = [1, 1]} : vector<2x128xf32> to vector<2x64xf32>
    %32 = arith.mulf %29, %18 : vector<2x64xf32>
    %33 = arith.mulf %28, %31 : vector<2x64xf32>
    %34 = arith.addf %32, %33 : vector<2x64xf32>
    %35 = math.tanh %34 : vector<2x64xf32>
    %36 = arith.mulf %30, %35 : vector<2x64xf32>
    %c72 = arith.constant 72 : index
    %c0_8 = arith.constant 0 : index
    %37 = vector.load %arg1[%c72, %c0_8] : memref<200x256xf32, #tpu.memory_space<vmem>>, vector<64x256xf32>
    %cst_9 = arith.constant dense<0.000000e+00> : vector<2x256xf32>
    %38 = tpu.matmul %36, %37, %cst_9 {dimension_numbers = #tpu.dot_dimension_numbers<[1], [0], [0], [1], [0, 0, 1, 1], [], []>} : vector<2x64xf32>, vector<64x256xf32>, vector<2x256xf32> -> vector<2x256xf32>
    %39 = arith.addf %38, %17 : vector<2x256xf32>
    %40 = arith.negf %39 : vector<2x256xf32>
    %41 = math.exp %40 : vector<2x256xf32>
    %cst_10 = arith.constant 1.000000e+00 : f32
    %42 = vector.broadcast %cst_10 : f32 to vector<2x256xf32>
    %43 = arith.addf %42, %41 : vector<2x256xf32>
    %44 = arith.divf %42, %43 : vector<2x256xf32>
    %45 = vector.extract_strided_slice %39 {offsets = [0, 128], sizes = [2, 128], strides = [1, 1]} : vector<2x256xf32> to vector<2x128xf32>
    %46 = math.tanh %45 : vector<2x128xf32>
    %47 = vector.extract_strided_slice %44 {offsets = [0, 0], sizes = [2, 64], strides = [1, 1]} : vector<2x256xf32> to vector<2x64xf32>
    %48 = vector.extract_strided_slice %44 {offsets = [0, 64], sizes = [2, 64], strides = [1, 1]} : vector<2x256xf32> to vector<2x64xf32>
    %49 = vector.extract_strided_slice %44 {offsets = [0, 128], sizes = [2, 64], strides = [1, 1]} : vector<2x256xf32> to vector<2x64xf32>
    %50 = vector.extract_strided_slice %46 {offsets = [0, 64], sizes = [2, 64], strides = [1, 1]} : vector<2x128xf32> to vector<2x64xf32>
    %51 = arith.mulf %48, %18 : vector<2x64xf32>
    %52 = arith.mulf %47, %50 : vector<2x64xf32>
    %53 = arith.addf %51, %52 : vector<2x64xf32>
    %54 = math.tanh %53 : vector<2x64xf32>
    %55 = arith.mulf %49, %54 : vector<2x64xf32>
    %c136 = arith.constant 136 : index
    %c0_11 = arith.constant 0 : index
    %56 = vector.load %arg1[%c136, %c0_11] : memref<200x256xf32, #tpu.memory_space<vmem>>, vector<64x256xf32>
    %cst_12 = arith.constant dense<0.000000e+00> : vector<2x256xf32>
    %57 = tpu.matmul %55, %56, %cst_12 {dimension_numbers = #tpu.dot_dimension_numbers<[1], [0], [0], [1], [0, 0, 1, 1], [], []>} : vector<2x64xf32>, vector<64x256xf32>, vector<2x256xf32> -> vector<2x256xf32>
    %58 = arith.addf %57, %17 : vector<2x256xf32>
    %59 = vector.extract_strided_slice %15 {offsets = [0, 1, 0], sizes = [2, 1, 256], strides = [1, 1, 1]} : vector<2x8x256xf32> to vector<2x1x256xf32>
    %60 = vector.shape_cast %59 : vector<2x1x256xf32> to vector<2x256xf32>
    %c8 = arith.constant 8 : index
    %c0_13 = arith.constant 0 : index
    %61 = vector.load %arg1[%c8, %c0_13] : memref<200x256xf32, #tpu.memory_space<vmem>>, vector<64x256xf32>
    %cst_14 = arith.constant dense<0.000000e+00> : vector<2x256xf32>
    %62 = tpu.matmul %36, %61, %cst_14 {dimension_numbers = #tpu.dot_dimension_numbers<[1], [0], [0], [1], [0, 0, 1, 1], [], []>} : vector<2x64xf32>, vector<64x256xf32>, vector<2x256xf32> -> vector<2x256xf32>
    %63 = arith.addf %60, %62 : vector<2x256xf32>
    %64 = arith.negf %63 : vector<2x256xf32>
    %65 = math.exp %64 : vector<2x256xf32>
    %cst_15 = arith.constant 1.000000e+00 : f32
    %66 = vector.broadcast %cst_15 : f32 to vector<2x256xf32>
    %67 = arith.addf %66, %65 : vector<2x256xf32>
    %68 = arith.divf %66, %67 : vector<2x256xf32>
    %69 = vector.extract_strided_slice %63 {offsets = [0, 128], sizes = [2, 128], strides = [1, 1]} : vector<2x256xf32> to vector<2x128xf32>
    %70 = math.tanh %69 : vector<2x128xf32>
    %71 = vector.extract_strided_slice %68 {offsets = [0, 0], sizes = [2, 64], strides = [1, 1]} : vector<2x256xf32> to vector<2x64xf32>
    %72 = vector.extract_strided_slice %68 {offsets = [0, 64], sizes = [2, 64], strides = [1, 1]} : vector<2x256xf32> to vector<2x64xf32>
    %73 = vector.extract_strided_slice %68 {offsets = [0, 128], sizes = [2, 64], strides = [1, 1]} : vector<2x256xf32> to vector<2x64xf32>
    %74 = vector.extract_strided_slice %70 {offsets = [0, 64], sizes = [2, 64], strides = [1, 1]} : vector<2x128xf32> to vector<2x64xf32>
    %75 = arith.mulf %72, %34 : vector<2x64xf32>
    %76 = arith.mulf %71, %74 : vector<2x64xf32>
    %77 = arith.addf %75, %76 : vector<2x64xf32>
    %78 = math.tanh %77 : vector<2x64xf32>
    %79 = arith.mulf %73, %78 : vector<2x64xf32>
    %c72_16 = arith.constant 72 : index
    %c0_17 = arith.constant 0 : index
    %80 = vector.load %arg1[%c72_16, %c0_17] : memref<200x256xf32, #tpu.memory_space<vmem>>, vector<64x256xf32>
    %cst_18 = arith.constant dense<0.000000e+00> : vector<2x256xf32>
    %81 = tpu.matmul %79, %80, %cst_18 {dimension_numbers = #tpu.dot_dimension_numbers<[1], [0], [0], [1], [0, 0, 1, 1], [], []>} : vector<2x64xf32>, vector<64x256xf32>, vector<2x256xf32> -> vector<2x256xf32>
    %82 = arith.addf %81, %58 : vector<2x256xf32>
    %83 = arith.negf %82 : vector<2x256xf32>
    %84 = math.exp %83 : vector<2x256xf32>
    %cst_19 = arith.constant 1.000000e+00 : f32
    %85 = vector.broadcast %cst_19 : f32 to vector<2x256xf32>
    %86 = arith.addf %85, %84 : vector<2x256xf32>
    %87 = arith.divf %85, %86 : vector<2x256xf32>
    %88 = vector.extract_strided_slice %82 {offsets = [0, 128], sizes = [2, 128], strides = [1, 1]} : vector<2x256xf32> to vector<2x128xf32>
    %89 = math.tanh %88 : vector<2x128xf32>
    %90 = vector.extract_strided_slice %87 {offsets = [0, 0], sizes = [2, 64], strides = [1, 1]} : vector<2x256xf32> to vector<2x64xf32>
    %91 = vector.extract_strided_slice %87 {offsets = [0, 64], sizes = [2, 64], strides = [1, 1]} : vector<2x256xf32> to vector<2x64xf32>
    %92 = vector.extract_strided_slice %87 {offsets = [0, 128], sizes = [2, 64], strides = [1, 1]} : vector<2x256xf32> to vector<2x64xf32>
    %93 = vector.extract_strided_slice %89 {offsets = [0, 64], sizes = [2, 64], strides = [1, 1]} : vector<2x128xf32> to vector<2x64xf32>
    %94 = arith.mulf %91, %53 : vector<2x64xf32>
    %95 = arith.mulf %90, %93 : vector<2x64xf32>
    %96 = arith.addf %94, %95 : vector<2x64xf32>
    %97 = math.tanh %96 : vector<2x64xf32>
    %98 = arith.mulf %92, %97 : vector<2x64xf32>
    %c136_20 = arith.constant 136 : index
    %c0_21 = arith.constant 0 : index
    %99 = vector.load %arg1[%c136_20, %c0_21] : memref<200x256xf32, #tpu.memory_space<vmem>>, vector<64x256xf32>
    %cst_22 = arith.constant dense<0.000000e+00> : vector<2x256xf32>
    %100 = tpu.matmul %98, %99, %cst_22 {dimension_numbers = #tpu.dot_dimension_numbers<[1], [0], [0], [1], [0, 0, 1, 1], [], []>} : vector<2x64xf32>, vector<64x256xf32>, vector<2x256xf32> -> vector<2x256xf32>
    %101 = arith.addf %100, %17 : vector<2x256xf32>
    %102 = vector.extract_strided_slice %15 {offsets = [0, 2, 0], sizes = [2, 1, 256], strides = [1, 1, 1]} : vector<2x8x256xf32> to vector<2x1x256xf32>
    %103 = vector.shape_cast %102 : vector<2x1x256xf32> to vector<2x256xf32>
    %c8_23 = arith.constant 8 : index
    %c0_24 = arith.constant 0 : index
    %104 = vector.load %arg1[%c8_23, %c0_24] : memref<200x256xf32, #tpu.memory_space<vmem>>, vector<64x256xf32>
    %cst_25 = arith.constant dense<0.000000e+00> : vector<2x256xf32>
    %105 = tpu.matmul %79, %104, %cst_25 {dimension_numbers = #tpu.dot_dimension_numbers<[1], [0], [0], [1], [0, 0, 1, 1], [], []>} : vector<2x64xf32>, vector<64x256xf32>, vector<2x256xf32> -> vector<2x256xf32>
    %106 = arith.addf %103, %105 : vector<2x256xf32>
    %107 = arith.negf %106 : vector<2x256xf32>
    %108 = math.exp %107 : vector<2x256xf32>
    %cst_26 = arith.constant 1.000000e+00 : f32
    %109 = vector.broadcast %cst_26 : f32 to vector<2x256xf32>
    %110 = arith.addf %109, %108 : vector<2x256xf32>
    %111 = arith.divf %109, %110 : vector<2x256xf32>
    %112 = vector.extract_strided_slice %106 {offsets = [0, 128], sizes = [2, 128], strides = [1, 1]} : vector<2x256xf32> to vector<2x128xf32>
    %113 = math.tanh %112 : vector<2x128xf32>
    %114 = vector.extract_strided_slice %111 {offsets = [0, 0], sizes = [2, 64], strides = [1, 1]} : vector<2x256xf32> to vector<2x64xf32>
    %115 = vector.extract_strided_slice %111 {offsets = [0, 64], sizes = [2, 64], strides = [1, 1]} : vector<2x256xf32> to vector<2x64xf32>
    %116 = vector.extract_strided_slice %111 {offsets = [0, 128], sizes = [2, 64], strides = [1, 1]} : vector<2x256xf32> to vector<2x64xf32>
    %117 = vector.extract_strided_slice %113 {offsets = [0, 64], sizes = [2, 64], strides = [1, 1]} : vector<2x128xf32> to vector<2x64xf32>
    %118 = arith.mulf %115, %77 : vector<2x64xf32>
    %119 = arith.mulf %114, %117 : vector<2x64xf32>
    %120 = arith.addf %118, %119 : vector<2x64xf32>
    %121 = math.tanh %120 : vector<2x64xf32>
    %122 = arith.mulf %116, %121 : vector<2x64xf32>
    %c72_27 = arith.constant 72 : index
    %c0_28 = arith.constant 0 : index
    %123 = vector.load %arg1[%c72_27, %c0_28] : memref<200x256xf32, #tpu.memory_space<vmem>>, vector<64x256xf32>
    %cst_29 = arith.constant dense<0.000000e+00> : vector<2x256xf32>
    %124 = tpu.matmul %122, %123, %cst_29 {dimension_numbers = #tpu.dot_dimension_numbers<[1], [0], [0], [1], [0, 0, 1, 1], [], []>} : vector<2x64xf32>, vector<64x256xf32>, vector<2x256xf32> -> vector<2x256xf32>
    %125 = arith.addf %124, %101 : vector<2x256xf32>
    %126 = arith.negf %125 : vector<2x256xf32>
    %127 = math.exp %126 : vector<2x256xf32>
    %cst_30 = arith.constant 1.000000e+00 : f32
    %128 = vector.broadcast %cst_30 : f32 to vector<2x256xf32>
    %129 = arith.addf %128, %127 : vector<2x256xf32>
    %130 = arith.divf %128, %129 : vector<2x256xf32>
    %131 = vector.extract_strided_slice %125 {offsets = [0, 128], sizes = [2, 128], strides = [1, 1]} : vector<2x256xf32> to vector<2x128xf32>
    %132 = math.tanh %131 : vector<2x128xf32>
    %133 = vector.extract_strided_slice %130 {offsets = [0, 0], sizes = [2, 64], strides = [1, 1]} : vector<2x256xf32> to vector<2x64xf32>
    %134 = vector.extract_strided_slice %130 {offsets = [0, 64], sizes = [2, 64], strides = [1, 1]} : vector<2x256xf32> to vector<2x64xf32>
    %135 = vector.extract_strided_slice %130 {offsets = [0, 128], sizes = [2, 64], strides = [1, 1]} : vector<2x256xf32> to vector<2x64xf32>
    %136 = vector.extract_strided_slice %132 {offsets = [0, 64], sizes = [2, 64], strides = [1, 1]} : vector<2x128xf32> to vector<2x64xf32>
    %137 = arith.mulf %134, %96 : vector<2x64xf32>
    %138 = arith.mulf %133, %136 : vector<2x64xf32>
    %139 = arith.addf %137, %138 : vector<2x64xf32>
    %140 = math.tanh %139 : vector<2x64xf32>
    %141 = arith.mulf %135, %140 : vector<2x64xf32>
    %c136_31 = arith.constant 136 : index
    %c0_32 = arith.constant 0 : index
    %142 = vector.load %arg1[%c136_31, %c0_32] : memref<200x256xf32, #tpu.memory_space<vmem>>, vector<64x256xf32>
    %cst_33 = arith.constant dense<0.000000e+00> : vector<2x256xf32>
    %143 = tpu.matmul %141, %142, %cst_33 {dimension_numbers = #tpu.dot_dimension_numbers<[1], [0], [0], [1], [0, 0, 1, 1], [], []>} : vector<2x64xf32>, vector<64x256xf32>, vector<2x256xf32> -> vector<2x256xf32>
    %144 = arith.addf %143, %17 : vector<2x256xf32>
    %145 = vector.extract_strided_slice %15 {offsets = [0, 3, 0], sizes = [2, 1, 256], strides = [1, 1, 1]} : vector<2x8x256xf32> to vector<2x1x256xf32>
    %146 = vector.shape_cast %145 : vector<2x1x256xf32> to vector<2x256xf32>
    %c8_34 = arith.constant 8 : index
    %c0_35 = arith.constant 0 : index
    %147 = vector.load %arg1[%c8_34, %c0_35] : memref<200x256xf32, #tpu.memory_space<vmem>>, vector<64x256xf32>
    %cst_36 = arith.constant dense<0.000000e+00> : vector<2x256xf32>
    %148 = tpu.matmul %122, %147, %cst_36 {dimension_numbers = #tpu.dot_dimension_numbers<[1], [0], [0], [1], [0, 0, 1, 1], [], []>} : vector<2x64xf32>, vector<64x256xf32>, vector<2x256xf32> -> vector<2x256xf32>
    %149 = arith.addf %146, %148 : vector<2x256xf32>
    %150 = arith.negf %149 : vector<2x256xf32>
    %151 = math.exp %150 : vector<2x256xf32>
    %cst_37 = arith.constant 1.000000e+00 : f32
    %152 = vector.broadcast %cst_37 : f32 to vector<2x256xf32>
    %153 = arith.addf %152, %151 : vector<2x256xf32>
    %154 = arith.divf %152, %153 : vector<2x256xf32>
    %155 = vector.extract_strided_slice %149 {offsets = [0, 128], sizes = [2, 128], strides = [1, 1]} : vector<2x256xf32> to vector<2x128xf32>
    %156 = math.tanh %155 : vector<2x128xf32>
    %157 = vector.extract_strided_slice %154 {offsets = [0, 0], sizes = [2, 64], strides = [1, 1]} : vector<2x256xf32> to vector<2x64xf32>
    %158 = vector.extract_strided_slice %154 {offsets = [0, 64], sizes = [2, 64], strides = [1, 1]} : vector<2x256xf32> to vector<2x64xf32>
    %159 = vector.extract_strided_slice %154 {offsets = [0, 128], sizes = [2, 64], strides = [1, 1]} : vector<2x256xf32> to vector<2x64xf32>
    %160 = vector.extract_strided_slice %156 {offsets = [0, 64], sizes = [2, 64], strides = [1, 1]} : vector<2x128xf32> to vector<2x64xf32>
    %161 = arith.mulf %158, %120 : vector<2x64xf32>
    %162 = arith.mulf %157, %160 : vector<2x64xf32>
    %163 = arith.addf %161, %162 : vector<2x64xf32>
    %164 = math.tanh %163 : vector<2x64xf32>
    %165 = arith.mulf %159, %164 : vector<2x64xf32>
    %c72_38 = arith.constant 72 : index
    %c0_39 = arith.constant 0 : index
    %166 = vector.load %arg1[%c72_38, %c0_39] : memref<200x256xf32, #tpu.memory_space<vmem>>, vector<64x256xf32>
    %cst_40 = arith.constant dense<0.000000e+00> : vector<2x256xf32>
    %167 = tpu.matmul %165, %166, %cst_40 {dimension_numbers = #tpu.dot_dimension_numbers<[1], [0], [0], [1], [0, 0, 1, 1], [], []>} : vector<2x64xf32>, vector<64x256xf32>, vector<2x256xf32> -> vector<2x256xf32>
    %168 = arith.addf %167, %144 : vector<2x256xf32>
    %169 = arith.negf %168 : vector<2x256xf32>
    %170 = math.exp %169 : vector<2x256xf32>
    %cst_41 = arith.constant 1.000000e+00 : f32
    %171 = vector.broadcast %cst_41 : f32 to vector<2x256xf32>
    %172 = arith.addf %171, %170 : vector<2x256xf32>
    %173 = arith.divf %171, %172 : vector<2x256xf32>
    %174 = vector.extract_strided_slice %168 {offsets = [0, 128], sizes = [2, 128], strides = [1, 1]} : vector<2x256xf32> to vector<2x128xf32>
    %175 = math.tanh %174 : vector<2x128xf32>
    %176 = vector.extract_strided_slice %173 {offsets = [0, 0], sizes = [2, 64], strides = [1, 1]} : vector<2x256xf32> to vector<2x64xf32>
    %177 = vector.extract_strided_slice %173 {offsets = [0, 64], sizes = [2, 64], strides = [1, 1]} : vector<2x256xf32> to vector<2x64xf32>
    %178 = vector.extract_strided_slice %173 {offsets = [0, 128], sizes = [2, 64], strides = [1, 1]} : vector<2x256xf32> to vector<2x64xf32>
    %179 = vector.extract_strided_slice %175 {offsets = [0, 64], sizes = [2, 64], strides = [1, 1]} : vector<2x128xf32> to vector<2x64xf32>
    %180 = arith.mulf %177, %139 : vector<2x64xf32>
    %181 = arith.mulf %176, %179 : vector<2x64xf32>
    %182 = arith.addf %180, %181 : vector<2x64xf32>
    %183 = math.tanh %182 : vector<2x64xf32>
    %184 = arith.mulf %178, %183 : vector<2x64xf32>
    %c136_42 = arith.constant 136 : index
    %c0_43 = arith.constant 0 : index
    %185 = vector.load %arg1[%c136_42, %c0_43] : memref<200x256xf32, #tpu.memory_space<vmem>>, vector<64x256xf32>
    %cst_44 = arith.constant dense<0.000000e+00> : vector<2x256xf32>
    %186 = tpu.matmul %184, %185, %cst_44 {dimension_numbers = #tpu.dot_dimension_numbers<[1], [0], [0], [1], [0, 0, 1, 1], [], []>} : vector<2x64xf32>, vector<64x256xf32>, vector<2x256xf32> -> vector<2x256xf32>
    %187 = arith.addf %186, %17 : vector<2x256xf32>
    %188 = vector.extract_strided_slice %15 {offsets = [0, 4, 0], sizes = [2, 1, 256], strides = [1, 1, 1]} : vector<2x8x256xf32> to vector<2x1x256xf32>
    %189 = vector.shape_cast %188 : vector<2x1x256xf32> to vector<2x256xf32>
    %c8_45 = arith.constant 8 : index
    %c0_46 = arith.constant 0 : index
    %190 = vector.load %arg1[%c8_45, %c0_46] : memref<200x256xf32, #tpu.memory_space<vmem>>, vector<64x256xf32>
    %cst_47 = arith.constant dense<0.000000e+00> : vector<2x256xf32>
    %191 = tpu.matmul %165, %190, %cst_47 {dimension_numbers = #tpu.dot_dimension_numbers<[1], [0], [0], [1], [0, 0, 1, 1], [], []>} : vector<2x64xf32>, vector<64x256xf32>, vector<2x256xf32> -> vector<2x256xf32>
    %192 = arith.addf %189, %191 : vector<2x256xf32>
    %193 = arith.negf %192 : vector<2x256xf32>
    %194 = math.exp %193 : vector<2x256xf32>
    %cst_48 = arith.constant 1.000000e+00 : f32
    %195 = vector.broadcast %cst_48 : f32 to vector<2x256xf32>
    %196 = arith.addf %195, %194 : vector<2x256xf32>
    %197 = arith.divf %195, %196 : vector<2x256xf32>
    %198 = vector.extract_strided_slice %192 {offsets = [0, 128], sizes = [2, 128], strides = [1, 1]} : vector<2x256xf32> to vector<2x128xf32>
    %199 = math.tanh %198 : vector<2x128xf32>
    %200 = vector.extract_strided_slice %197 {offsets = [0, 0], sizes = [2, 64], strides = [1, 1]} : vector<2x256xf32> to vector<2x64xf32>
    %201 = vector.extract_strided_slice %197 {offsets = [0, 64], sizes = [2, 64], strides = [1, 1]} : vector<2x256xf32> to vector<2x64xf32>
    %202 = vector.extract_strided_slice %197 {offsets = [0, 128], sizes = [2, 64], strides = [1, 1]} : vector<2x256xf32> to vector<2x64xf32>
    %203 = vector.extract_strided_slice %199 {offsets = [0, 64], sizes = [2, 64], strides = [1, 1]} : vector<2x128xf32> to vector<2x64xf32>
    %204 = arith.mulf %201, %163 : vector<2x64xf32>
    %205 = arith.mulf %200, %203 : vector<2x64xf32>
    %206 = arith.addf %204, %205 : vector<2x64xf32>
    %207 = math.tanh %206 : vector<2x64xf32>
    %208 = arith.mulf %202, %207 : vector<2x64xf32>
    %c72_49 = arith.constant 72 : index
    %c0_50 = arith.constant 0 : index
    %209 = vector.load %arg1[%c72_49, %c0_50] : memref<200x256xf32, #tpu.memory_space<vmem>>, vector<64x256xf32>
    %cst_51 = arith.constant dense<0.000000e+00> : vector<2x256xf32>
    %210 = tpu.matmul %208, %209, %cst_51 {dimension_numbers = #tpu.dot_dimension_numbers<[1], [0], [0], [1], [0, 0, 1, 1], [], []>} : vector<2x64xf32>, vector<64x256xf32>, vector<2x256xf32> -> vector<2x256xf32>
    %211 = arith.addf %210, %187 : vector<2x256xf32>
    %212 = arith.negf %211 : vector<2x256xf32>
    %213 = math.exp %212 : vector<2x256xf32>
    %cst_52 = arith.constant 1.000000e+00 : f32
    %214 = vector.broadcast %cst_52 : f32 to vector<2x256xf32>
    %215 = arith.addf %214, %213 : vector<2x256xf32>
    %216 = arith.divf %214, %215 : vector<2x256xf32>
    %217 = vector.extract_strided_slice %211 {offsets = [0, 128], sizes = [2, 128], strides = [1, 1]} : vector<2x256xf32> to vector<2x128xf32>
    %218 = math.tanh %217 : vector<2x128xf32>
    %219 = vector.extract_strided_slice %216 {offsets = [0, 0], sizes = [2, 64], strides = [1, 1]} : vector<2x256xf32> to vector<2x64xf32>
    %220 = vector.extract_strided_slice %216 {offsets = [0, 64], sizes = [2, 64], strides = [1, 1]} : vector<2x256xf32> to vector<2x64xf32>
    %221 = vector.extract_strided_slice %216 {offsets = [0, 128], sizes = [2, 64], strides = [1, 1]} : vector<2x256xf32> to vector<2x64xf32>
    %222 = vector.extract_strided_slice %218 {offsets = [0, 64], sizes = [2, 64], strides = [1, 1]} : vector<2x128xf32> to vector<2x64xf32>
    %223 = arith.mulf %220, %182 : vector<2x64xf32>
    %224 = arith.mulf %219, %222 : vector<2x64xf32>
    %225 = arith.addf %223, %224 : vector<2x64xf32>
    %226 = math.tanh %225 : vector<2x64xf32>
    %227 = arith.mulf %221, %226 : vector<2x64xf32>
    %c136_53 = arith.constant 136 : index
    %c0_54 = arith.constant 0 : index
    %228 = vector.load %arg1[%c136_53, %c0_54] : memref<200x256xf32, #tpu.memory_space<vmem>>, vector<64x256xf32>
    %cst_55 = arith.constant dense<0.000000e+00> : vector<2x256xf32>
    %229 = tpu.matmul %227, %228, %cst_55 {dimension_numbers = #tpu.dot_dimension_numbers<[1], [0], [0], [1], [0, 0, 1, 1], [], []>} : vector<2x64xf32>, vector<64x256xf32>, vector<2x256xf32> -> vector<2x256xf32>
    %230 = arith.addf %229, %17 : vector<2x256xf32>
    %231 = vector.extract_strided_slice %15 {offsets = [0, 5, 0], sizes = [2, 1, 256], strides = [1, 1, 1]} : vector<2x8x256xf32> to vector<2x1x256xf32>
    %232 = vector.shape_cast %231 : vector<2x1x256xf32> to vector<2x256xf32>
    %c8_56 = arith.constant 8 : index
    %c0_57 = arith.constant 0 : index
    %233 = vector.load %arg1[%c8_56, %c0_57] : memref<200x256xf32, #tpu.memory_space<vmem>>, vector<64x256xf32>
    %cst_58 = arith.constant dense<0.000000e+00> : vector<2x256xf32>
    %234 = tpu.matmul %208, %233, %cst_58 {dimension_numbers = #tpu.dot_dimension_numbers<[1], [0], [0], [1], [0, 0, 1, 1], [], []>} : vector<2x64xf32>, vector<64x256xf32>, vector<2x256xf32> -> vector<2x256xf32>
    %235 = arith.addf %232, %234 : vector<2x256xf32>
    %236 = arith.negf %235 : vector<2x256xf32>
    %237 = math.exp %236 : vector<2x256xf32>
    %cst_59 = arith.constant 1.000000e+00 : f32
    %238 = vector.broadcast %cst_59 : f32 to vector<2x256xf32>
    %239 = arith.addf %238, %237 : vector<2x256xf32>
    %240 = arith.divf %238, %239 : vector<2x256xf32>
    %241 = vector.extract_strided_slice %235 {offsets = [0, 128], sizes = [2, 128], strides = [1, 1]} : vector<2x256xf32> to vector<2x128xf32>
    %242 = math.tanh %241 : vector<2x128xf32>
    %243 = vector.extract_strided_slice %240 {offsets = [0, 0], sizes = [2, 64], strides = [1, 1]} : vector<2x256xf32> to vector<2x64xf32>
    %244 = vector.extract_strided_slice %240 {offsets = [0, 64], sizes = [2, 64], strides = [1, 1]} : vector<2x256xf32> to vector<2x64xf32>
    %245 = vector.extract_strided_slice %240 {offsets = [0, 128], sizes = [2, 64], strides = [1, 1]} : vector<2x256xf32> to vector<2x64xf32>
    %246 = vector.extract_strided_slice %242 {offsets = [0, 64], sizes = [2, 64], strides = [1, 1]} : vector<2x128xf32> to vector<2x64xf32>
    %247 = arith.mulf %244, %206 : vector<2x64xf32>
    %248 = arith.mulf %243, %246 : vector<2x64xf32>
    %249 = arith.addf %247, %248 : vector<2x64xf32>
    %250 = math.tanh %249 : vector<2x64xf32>
    %251 = arith.mulf %245, %250 : vector<2x64xf32>
    %c72_60 = arith.constant 72 : index
    %c0_61 = arith.constant 0 : index
    %252 = vector.load %arg1[%c72_60, %c0_61] : memref<200x256xf32, #tpu.memory_space<vmem>>, vector<64x256xf32>
    %cst_62 = arith.constant dense<0.000000e+00> : vector<2x256xf32>
    %253 = tpu.matmul %251, %252, %cst_62 {dimension_numbers = #tpu.dot_dimension_numbers<[1], [0], [0], [1], [0, 0, 1, 1], [], []>} : vector<2x64xf32>, vector<64x256xf32>, vector<2x256xf32> -> vector<2x256xf32>
    %254 = arith.addf %253, %230 : vector<2x256xf32>
    %255 = arith.negf %254 : vector<2x256xf32>
    %256 = math.exp %255 : vector<2x256xf32>
    %cst_63 = arith.constant 1.000000e+00 : f32
    %257 = vector.broadcast %cst_63 : f32 to vector<2x256xf32>
    %258 = arith.addf %257, %256 : vector<2x256xf32>
    %259 = arith.divf %257, %258 : vector<2x256xf32>
    %260 = vector.extract_strided_slice %254 {offsets = [0, 128], sizes = [2, 128], strides = [1, 1]} : vector<2x256xf32> to vector<2x128xf32>
    %261 = math.tanh %260 : vector<2x128xf32>
    %262 = vector.extract_strided_slice %259 {offsets = [0, 0], sizes = [2, 64], strides = [1, 1]} : vector<2x256xf32> to vector<2x64xf32>
    %263 = vector.extract_strided_slice %259 {offsets = [0, 64], sizes = [2, 64], strides = [1, 1]} : vector<2x256xf32> to vector<2x64xf32>
    %264 = vector.extract_strided_slice %259 {offsets = [0, 128], sizes = [2, 64], strides = [1, 1]} : vector<2x256xf32> to vector<2x64xf32>
    %265 = vector.extract_strided_slice %261 {offsets = [0, 64], sizes = [2, 64], strides = [1, 1]} : vector<2x128xf32> to vector<2x64xf32>
    %266 = arith.mulf %263, %225 : vector<2x64xf32>
    %267 = arith.mulf %262, %265 : vector<2x64xf32>
    %268 = arith.addf %266, %267 : vector<2x64xf32>
    %269 = math.tanh %268 : vector<2x64xf32>
    %270 = arith.mulf %264, %269 : vector<2x64xf32>
    %c136_64 = arith.constant 136 : index
    %c0_65 = arith.constant 0 : index
    %271 = vector.load %arg1[%c136_64, %c0_65] : memref<200x256xf32, #tpu.memory_space<vmem>>, vector<64x256xf32>
    %cst_66 = arith.constant dense<0.000000e+00> : vector<2x256xf32>
    %272 = tpu.matmul %270, %271, %cst_66 {dimension_numbers = #tpu.dot_dimension_numbers<[1], [0], [0], [1], [0, 0, 1, 1], [], []>} : vector<2x64xf32>, vector<64x256xf32>, vector<2x256xf32> -> vector<2x256xf32>
    %273 = arith.addf %272, %17 : vector<2x256xf32>
    %274 = vector.extract_strided_slice %15 {offsets = [0, 6, 0], sizes = [2, 1, 256], strides = [1, 1, 1]} : vector<2x8x256xf32> to vector<2x1x256xf32>
    %275 = vector.shape_cast %274 : vector<2x1x256xf32> to vector<2x256xf32>
    %c8_67 = arith.constant 8 : index
    %c0_68 = arith.constant 0 : index
    %276 = vector.load %arg1[%c8_67, %c0_68] : memref<200x256xf32, #tpu.memory_space<vmem>>, vector<64x256xf32>
    %cst_69 = arith.constant dense<0.000000e+00> : vector<2x256xf32>
    %277 = tpu.matmul %251, %276, %cst_69 {dimension_numbers = #tpu.dot_dimension_numbers<[1], [0], [0], [1], [0, 0, 1, 1], [], []>} : vector<2x64xf32>, vector<64x256xf32>, vector<2x256xf32> -> vector<2x256xf32>
    %278 = arith.addf %275, %277 : vector<2x256xf32>
    %279 = arith.negf %278 : vector<2x256xf32>
    %280 = math.exp %279 : vector<2x256xf32>
    %cst_70 = arith.constant 1.000000e+00 : f32
    %281 = vector.broadcast %cst_70 : f32 to vector<2x256xf32>
    %282 = arith.addf %281, %280 : vector<2x256xf32>
    %283 = arith.divf %281, %282 : vector<2x256xf32>
    %284 = vector.extract_strided_slice %278 {offsets = [0, 128], sizes = [2, 128], strides = [1, 1]} : vector<2x256xf32> to vector<2x128xf32>
    %285 = math.tanh %284 : vector<2x128xf32>
    %286 = vector.extract_strided_slice %283 {offsets = [0, 0], sizes = [2, 64], strides = [1, 1]} : vector<2x256xf32> to vector<2x64xf32>
    %287 = vector.extract_strided_slice %283 {offsets = [0, 64], sizes = [2, 64], strides = [1, 1]} : vector<2x256xf32> to vector<2x64xf32>
    %288 = vector.extract_strided_slice %283 {offsets = [0, 128], sizes = [2, 64], strides = [1, 1]} : vector<2x256xf32> to vector<2x64xf32>
    %289 = vector.extract_strided_slice %285 {offsets = [0, 64], sizes = [2, 64], strides = [1, 1]} : vector<2x128xf32> to vector<2x64xf32>
    %290 = arith.mulf %287, %249 : vector<2x64xf32>
    %291 = arith.mulf %286, %289 : vector<2x64xf32>
    %292 = arith.addf %290, %291 : vector<2x64xf32>
    %293 = math.tanh %292 : vector<2x64xf32>
    %294 = arith.mulf %288, %293 : vector<2x64xf32>
    %c72_71 = arith.constant 72 : index
    %c0_72 = arith.constant 0 : index
    %295 = vector.load %arg1[%c72_71, %c0_72] : memref<200x256xf32, #tpu.memory_space<vmem>>, vector<64x256xf32>
    %cst_73 = arith.constant dense<0.000000e+00> : vector<2x256xf32>
    %296 = tpu.matmul %294, %295, %cst_73 {dimension_numbers = #tpu.dot_dimension_numbers<[1], [0], [0], [1], [0, 0, 1, 1], [], []>} : vector<2x64xf32>, vector<64x256xf32>, vector<2x256xf32> -> vector<2x256xf32>
    %297 = arith.addf %296, %273 : vector<2x256xf32>
    %298 = arith.negf %297 : vector<2x256xf32>
    %299 = math.exp %298 : vector<2x256xf32>
    %cst_74 = arith.constant 1.000000e+00 : f32
    %300 = vector.broadcast %cst_74 : f32 to vector<2x256xf32>
    %301 = arith.addf %300, %299 : vector<2x256xf32>
    %302 = arith.divf %300, %301 : vector<2x256xf32>
    %303 = vector.extract_strided_slice %297 {offsets = [0, 128], sizes = [2, 128], strides = [1, 1]} : vector<2x256xf32> to vector<2x128xf32>
    %304 = math.tanh %303 : vector<2x128xf32>
    %305 = vector.extract_strided_slice %302 {offsets = [0, 0], sizes = [2, 64], strides = [1, 1]} : vector<2x256xf32> to vector<2x64xf32>
    %306 = vector.extract_strided_slice %302 {offsets = [0, 64], sizes = [2, 64], strides = [1, 1]} : vector<2x256xf32> to vector<2x64xf32>
    %307 = vector.extract_strided_slice %302 {offsets = [0, 128], sizes = [2, 64], strides = [1, 1]} : vector<2x256xf32> to vector<2x64xf32>
    %308 = vector.extract_strided_slice %304 {offsets = [0, 64], sizes = [2, 64], strides = [1, 1]} : vector<2x128xf32> to vector<2x64xf32>
    %309 = arith.mulf %306, %268 : vector<2x64xf32>
    %310 = arith.mulf %305, %308 : vector<2x64xf32>
    %311 = arith.addf %309, %310 : vector<2x64xf32>
    %312 = math.tanh %311 : vector<2x64xf32>
    %313 = arith.mulf %307, %312 : vector<2x64xf32>
    %c136_75 = arith.constant 136 : index
    %c0_76 = arith.constant 0 : index
    %314 = vector.load %arg1[%c136_75, %c0_76] : memref<200x256xf32, #tpu.memory_space<vmem>>, vector<64x256xf32>
    %cst_77 = arith.constant dense<0.000000e+00> : vector<2x256xf32>
    %315 = tpu.matmul %313, %314, %cst_77 {dimension_numbers = #tpu.dot_dimension_numbers<[1], [0], [0], [1], [0, 0, 1, 1], [], []>} : vector<2x64xf32>, vector<64x256xf32>, vector<2x256xf32> -> vector<2x256xf32>
    %316 = arith.addf %315, %17 : vector<2x256xf32>
    %317 = vector.extract_strided_slice %15 {offsets = [0, 7, 0], sizes = [2, 1, 256], strides = [1, 1, 1]} : vector<2x8x256xf32> to vector<2x1x256xf32>
    %318 = vector.shape_cast %317 : vector<2x1x256xf32> to vector<2x256xf32>
    %c8_78 = arith.constant 8 : index
    %c0_79 = arith.constant 0 : index
    %319 = vector.load %arg1[%c8_78, %c0_79] : memref<200x256xf32, #tpu.memory_space<vmem>>, vector<64x256xf32>
    %cst_80 = arith.constant dense<0.000000e+00> : vector<2x256xf32>
    %320 = tpu.matmul %294, %319, %cst_80 {dimension_numbers = #tpu.dot_dimension_numbers<[1], [0], [0], [1], [0, 0, 1, 1], [], []>} : vector<2x64xf32>, vector<64x256xf32>, vector<2x256xf32> -> vector<2x256xf32>
    %321 = arith.addf %318, %320 : vector<2x256xf32>
    %322 = arith.negf %321 : vector<2x256xf32>
    %323 = math.exp %322 : vector<2x256xf32>
    %cst_81 = arith.constant 1.000000e+00 : f32
    %324 = vector.broadcast %cst_81 : f32 to vector<2x256xf32>
    %325 = arith.addf %324, %323 : vector<2x256xf32>
    %326 = arith.divf %324, %325 : vector<2x256xf32>
    %327 = vector.extract_strided_slice %321 {offsets = [0, 128], sizes = [2, 128], strides = [1, 1]} : vector<2x256xf32> to vector<2x128xf32>
    %328 = math.tanh %327 : vector<2x128xf32>
    %329 = vector.extract_strided_slice %326 {offsets = [0, 0], sizes = [2, 64], strides = [1, 1]} : vector<2x256xf32> to vector<2x64xf32>
    %330 = vector.extract_strided_slice %326 {offsets = [0, 64], sizes = [2, 64], strides = [1, 1]} : vector<2x256xf32> to vector<2x64xf32>
    %331 = vector.extract_strided_slice %326 {offsets = [0, 128], sizes = [2, 64], strides = [1, 1]} : vector<2x256xf32> to vector<2x64xf32>
    %332 = vector.extract_strided_slice %328 {offsets = [0, 64], sizes = [2, 64], strides = [1, 1]} : vector<2x128xf32> to vector<2x64xf32>
    %333 = arith.mulf %330, %292 : vector<2x64xf32>
    %334 = arith.mulf %329, %332 : vector<2x64xf32>
    %335 = arith.addf %333, %334 : vector<2x64xf32>
    %336 = math.tanh %335 : vector<2x64xf32>
    %337 = arith.mulf %331, %336 : vector<2x64xf32>
    %c72_82 = arith.constant 72 : index
    %c0_83 = arith.constant 0 : index
    %338 = vector.load %arg1[%c72_82, %c0_83] : memref<200x256xf32, #tpu.memory_space<vmem>>, vector<64x256xf32>
    %cst_84 = arith.constant dense<0.000000e+00> : vector<2x256xf32>
    %339 = tpu.matmul %337, %338, %cst_84 {dimension_numbers = #tpu.dot_dimension_numbers<[1], [0], [0], [1], [0, 0, 1, 1], [], []>} : vector<2x64xf32>, vector<64x256xf32>, vector<2x256xf32> -> vector<2x256xf32>
    %340 = arith.addf %339, %316 : vector<2x256xf32>
    %341 = arith.negf %340 : vector<2x256xf32>
    %342 = math.exp %341 : vector<2x256xf32>
    %cst_85 = arith.constant 1.000000e+00 : f32
    %343 = vector.broadcast %cst_85 : f32 to vector<2x256xf32>
    %344 = arith.addf %343, %342 : vector<2x256xf32>
    %345 = arith.divf %343, %344 : vector<2x256xf32>
    %346 = vector.extract_strided_slice %340 {offsets = [0, 128], sizes = [2, 128], strides = [1, 1]} : vector<2x256xf32> to vector<2x128xf32>
    %347 = math.tanh %346 : vector<2x128xf32>
    %348 = vector.extract_strided_slice %345 {offsets = [0, 0], sizes = [2, 64], strides = [1, 1]} : vector<2x256xf32> to vector<2x64xf32>
    %349 = vector.extract_strided_slice %345 {offsets = [0, 64], sizes = [2, 64], strides = [1, 1]} : vector<2x256xf32> to vector<2x64xf32>
    %350 = vector.extract_strided_slice %345 {offsets = [0, 128], sizes = [2, 64], strides = [1, 1]} : vector<2x256xf32> to vector<2x64xf32>
    %351 = vector.extract_strided_slice %347 {offsets = [0, 64], sizes = [2, 64], strides = [1, 1]} : vector<2x128xf32> to vector<2x64xf32>
    %352 = arith.mulf %349, %311 : vector<2x64xf32>
    %353 = arith.mulf %348, %351 : vector<2x64xf32>
    %354 = arith.addf %352, %353 : vector<2x64xf32>
    %355 = math.tanh %354 : vector<2x64xf32>
    %356 = arith.mulf %350, %355 : vector<2x64xf32>
    %357 = vector.broadcast %4 : vector<1x64xf32> to vector<2x64xf32>
    %358 = arith.mulf %356, %357 : vector<2x64xf32>
    %cst_86 = arith.constant dense<0.000000e+00> : vector<2xf32>
    %359 = vector.multi_reduction <add>, %358, %cst_86 [1] : vector<2x64xf32> to vector<2xf32>
    %360 = vector.shape_cast %359 : vector<2xf32> to vector<2x1xf32>
    %361 = vector.broadcast %6 : vector<1x1xf32> to vector<2x1xf32>
    %362 = arith.addf %360, %361 : vector<2x1xf32>
    %c0_87 = arith.constant 0 : index
    %c0_88 = arith.constant 0 : index
    %363 = vector.load %arg2[%c0_87, %c0_88] : memref<2x1xf32, #tpu.memory_space<vmem>>, vector<2x1xf32>
    tpu.vector_store %arg2[%c0_87, %c0_88], %362 {strides = array<i32>} : memref<2x1xf32, #tpu.memory_space<vmem>>, vector<2x1xf32>,
    return
  }
}

</mosaic_0001>

<bundles_post_ra>
// kernel: tpu_custom_call.1
= control target key start
LH: loop header
LB: loop body
LE: loop exit
PB: predicated region body
PF: predicated region fallthrough
CT: control target
= control target key end

     0   :  { %7 = vsyncpa [#allocation3], 0  ;;  %s4036_s0 = inlined_call_operand.hbm [shape: f32[2,8], index: 0, kind: input, shape index: {}]   ;;  %s4037_s1 = inlined_call_operand.hbm [shape: f32[200,256], index: 1, kind: input, shape index: {}]   ;;  %s4038_s2 = inlined_call_operand.vmem [shape: f32[2,1], index: 2, kind: output, shape index: {}]  }
   0x1   :  { %s14_s11 = sshll.u32 %s4036_s0, 4  ;;  %s15_s11 = int_to_ptr.hbm [resolvable:$true] %s14_s11 }
   0x2   :  { %8 = vsyncpa [#allocation5], 0  ;;  %s3113_s12 = smov [#allocation2]   ;;  %s24_s16 = sshll.u32 %s4037_s1, 4  ;;  %s25_s16 = int_to_ptr.hbm [resolvable:$true] %s24_s16 }
   0x3   :  { %s16_s13 = sshll.u32 %s3113_s12, 4  ;;  %s3114_s17 = smov [#allocation4]   ;;  %s17_s13 = int_to_ptr.vmem [resolvable:$true] %s16_s13 }
   0x4   :  { %19 = dma.hbm_to_vmem [thread:$0]  %s15_s11, 32, %s17_s13, [#allocation3]  }
   0x5   :  { %s26_s18 = sshll.u32 %s3114_s17, 4  ;;  %s3115_s19 = smov 256   ;;  %s27_s18 = int_to_ptr.vmem [resolvable:$true] %s26_s18 }
   0x6   :  { %s3116_s20 = smov 16  }
   0x7   :  { %32 = dma.hbm_to_vmem [thread:$0]  %s25_s16, 6400, %s27_s18, [#allocation5], %s3115_s19, %s3115_s19, %s3116_s20  }
   0x8   :  { %3109 = dma.done.wait [#allocation3], 32  }
   0x9   :  { %3110 = vsyncadd [#allocation3], 4294967264 }
   0xa   :  { %3111 = dma.done.wait [#allocation5], 6400  }
   0xb   :  { %3112 = vsyncadd [#allocation5], 4294960896  ;;  %v52_v0 = vlaneseq  ;;  %v50_v2 = vld [vmem:[#allocation2] sm:$0x3]  ;;  %s3117_s0 = smov 64   ;;  %v3155_v53 = vld [vmem:[#allocation4 + $0x100] sm:$0xff] }
   0xc   :  { %v58_v3 = vperm.slane %v50_v2, 1  ;;  %v51_v4 = vperm.slane %v50_v2, 0  ;;  %v41_v5 = vld [vmem:[#allocation4] ss:$8 sm:$0x3]  ;;  %v3159_v55 = vld [vmem:[#allocation4 + $0xf0] sm:$0xff]  ;;  %232 = vmatpush.msra.mxu0 %v3155_v53 }
   0xd   :  { %v53_v1 = vshrl.u32 %v52_v0, 7  ;;  %v43_v6 = vld [vmem:[#allocation4 + $0x1] ss:$8 sm:$0x3]  ;;  %v66_v7 = vperm.slane %v41_v5, 0  ;;  %v67_v8 = vperm.slane %v41_v5, 1 }
   0xe   :  { %v75_v9 = vperm.slane %v43_v6, 0  ;;  %v76_v10 = vperm.slane %v43_v6, 1  ;;  %v3157_v54 = vld [vmem:[#allocation4 + $0x108] sm:$0xff]  ;;  %v3163_v56 = vld [vmem:[#allocation4 + $0xf8] sm:$0xff]  ;;  %v3165_v57 = vld [vmem:[#allocation4 + $0xe0] sm:$0xff]  ;;  %233 = vmatpush.msra.mxu0 %v3159_v55 }
   0xf   :  { %2692 = vset.pattern.permute.xlu0 %v53_v1  ;;  %252 = vmatpush.msra.mxu1 %v3157_v54  ;;  %v3167_v58 = vld [vmem:[#allocation4 + $0xe8] sm:$0xff]  ;;  %v3171_v59 = vld [vmem:[#allocation4 + $0xd0] sm:$0xff]  ;;  %v3173_v60 = vld [vmem:[#allocation4 + $0xd8] sm:$0xff] }
  0x10   :  { %234 = vmatpush.msra.mxu0 %v3165_v57  ;;  %v3177_v61 = vld [vmem:[#allocation4 + $0xc0] sm:$0xff]  ;;  %v3179_v62 = vld [vmem:[#allocation4 + $0xc8] sm:$0xff]  ;;  %v3183_v63 = vld [vmem:[#allocation4 + $0xb0] sm:$0xff] }
  0x11   :  { %253 = vmatpush.msra.mxu1 %v3163_v56  ;;  %v3185_v0 = vld [vmem:[#allocation4 + $0xb8] sm:$0xff] }
  0x12   :  { %235 = vmatpush.msra.mxu0 %v3171_v59 }
  0x13   :  { %254 = vmatpush.msra.mxu1 %v3167_v58 }
  0x14   :  { %236 = vmatpush.msra.mxu0 %v3177_v61 }
  0x15   :  { %255 = vmatpush.msra.mxu1 %v3173_v60 }
  0x16   :  { %237 = vmatpush.msra.mxu0 %v3183_v63 }
  0x17   :  { %63 = vperm.xlu0 %2692, %v58_v3   ;;  %256 = vmatpush.msra.mxu1 %v3179_v62 }
  0x19   :  { %257 = vmatpush.msra.mxu1 %v3185_v0 }
  0x1f   :  { %56 = vperm.xlu0 %2692, %v51_v4  }
  0x89   :  { %v64_v11 = vpop.permute.xlu0 %63 }
  0x8a   :  { %v72_v12 = vmul.f32 %v66_v7, %v64_v11  ;;  %v73_v13 = vmul.f32 %v67_v8, %v64_v11 }
  0x8c   :  { %v3139_v14 = vadd.f32 %v75_v9, %v72_v12  ;;  %v3141_v15 = vadd.f32 %v76_v10, %v73_v13  ;;  %v3201_v12 = vld [vmem:[#allocation4 + $0xa0] sm:$0xff]  ;;  %v3203_v13 = vld [vmem:[#allocation4 + $0xa8] sm:$0xff] }
  0x8d   :  { %238 = vmatpush.msra.mxu0 %v3201_v12  ;;  %258 = vmatpush.msra.mxu1 %v3203_v13 }
  0x8e   :  { %4069 = vst [vmem:[#allocation8_spill] sm:$0xff] %v3139_v14  ;;  %2693 = vtanh.f32 %v3141_v15  ;;  %v2597_v23 = vmul.f32 -1.442695, %v3139_v14 }
  0x8f   :  { %4070 = vst [vmem:[#allocation9_spill] sm:$0xff] %v3141_v15 }
  0x91   :  { %v57_v16 = vpop.permute.xlu0 %56 }
  0x92   :  { %v70_v17 = vmul.f32 %v66_v7, %v57_v16  ;;  %v71_v18 = vmul.f32 %v67_v8, %v57_v16  ;;  %v3205_v16 = vld [vmem:[#allocation4 + $0x90] sm:$0xff] }
  0x93   :  { %239 = vmatpush.msra.mxu0 %v3205_v16 }
  0x94   :  { %v2694_v19 = vpop.eup %2693  ;;  %v3144_v20 = vadd.f32 %v75_v9, %v70_v17  ;;  %v3146_v21 = vadd.f32 %v76_v10, %v71_v18  ;;  %v2598_v9 = vmul.f32 -1.442695, %v3141_v15  ;;  %v3209_v18 = vld [vmem:[#allocation4 + $0x98] sm:$0xff] }
  0x95   :  { %172 = vrot.lane.b32.xlu1 %v2694_v19, %s3117_s0  ;;  %v3211_v19 = vld [vmem:[#allocation4 + $0x80] sm:$0xff]  ;;  %259 = vmatpush.msra.mxu1 %v3209_v18 }
  0x96   :  { %4071 = vst [vmem:[#allocation10_spill] sm:$0xff] %v3144_v20  ;;  %2695 = vtanh.f32 %v3146_v21  ;;  %v2595_v24 = vmul.f32 -1.442695, %v3144_v20  ;;  %v2596_v10 = vmul.f32 -1.442695, %v3146_v21  ;;  %403 = vmatpush.msrb.mxu0 %v3211_v19 }
  0x97   :  { %4072 = vst [vmem:[#allocation11_spill] sm:$0xff] %v3146_v21  ;;  %2697 = vpow2.f32 %v2597_v23 }
  0x98   :  { %2699 = vpow2.f32 %v2595_v24  ;;  %v3217_v24 = vld [vmem:[#allocation4 + $0x70] sm:$0xff] }
  0x99   :  { %404 = vmatpush.msrb.mxu0 %v3217_v24 }
  0x9c   :  { %v2696_v22 = vpop.eup %2695 }
  0x9d   :  { %170 = vrot.lane.b32.xlu1 %v2696_v22, %s3117_s0  ;;  %v2698_v25 = vpop.eup %2697  ;;  %v3213_v22 = vld [vmem:[#allocation4 + $0x88] sm:$0xff] }
  0x9e   :  { %v102_v26 = vadd.f32 1.0, %v2698_v25  ;;  %v2700_v27 = vpop.eup %2699  ;;  %v3219_v25 = vld [vmem:[#allocation4 + $0x78] sm:$0xff]  ;;  %423 = vmatpush.msrb.mxu1 %v3213_v22 }
  0x9f   :  { %v100_v28 = vadd.f32 1.0, %v2700_v27  ;;  %v3225_v27 = vld [vmem:[#allocation4 + $0x60] sm:$0xff] }
  0xa0   :  { %2701 = vrcp.f32 %v102_v26  ;;  %v145_v37 = vand.u32 2147483648, %v102_v26  ;;  %vm139_vm1 = vweird.f32 %v102_v26  ;;  %v143_v38 = vand.u32 2147483647, %v102_v26  ;;  %424 = vmatpush.msrb.mxu1 %v3219_v25  ;;  %405 = vmatpush.msrb.mxu0 %v3225_v27 }
  0xa1   :  { %2703 = vrcp.f32 %v100_v28  ;;  %v115_v46 = vand.u32 2147483648, %v100_v28  ;;  %vm109_vm5 = vweird.f32 %v100_v28  ;;  %v113_v47 = vand.u32 2147483647, %v100_v28 }
  0xa2   :  { %v146_v41 = vor.u32 1.1754944e-38, %v145_v37  ;;  %vm144_vm3 = vcmp.eq.f32.partialorder %v143_v38, 8.507059e+37  ;;  %v3249_v37 = vld [vmem:[#allocation4 + $0x28] sm:$0xff] }
  0xa3   :  { %v116_v49 = vor.u32 1.1754944e-38, %v115_v46  ;;  %vm114_vm7 = vcmp.eq.f32.partialorder %v113_v47, 8.507059e+37 }
  0xa6   :  { %v2702_v29 = vpop.eup %2701 }
  0xa7   :  { %v135_v30 = vmul.f32 %v2702_v29, %v102_v26  ;;  %v2704_v32 = vpop.eup %2703  ;;  %vm140_vm0 = vweird.f32 %v2702_v29 }
  0xa8   :  { %v105_v34 = vmul.f32 %v2704_v32, %v100_v28  ;;  %vm141_vm2 = vmor %vm139_vm1, %vm140_vm0  ;;  %vm110_vm4 = vweird.f32 %v2704_v32  ;;  %v3227_v28 = vld [vmem:[#allocation4 + $0x68] sm:$0xff]  ;;  %vm219_vm0 = vcmask 1041409   ;;  %vm221_vm1 = vcmask 523264  }
  0xa9   :  { %v136_v31 = vsub.f32 1.0, %v135_v30  ;;  %vm111_vm6 = vmor %vm109_vm5, %vm110_vm4  ;;  %v3231_v30 = vld [vmem:[#allocation4 + $0x58] sm:$0xff]  ;;  %425 = vmatpush.msrb.mxu1 %v3227_v28 }
  0xaa   :  { %v106_v36 = vsub.f32 1.0, %v105_v34  ;;  %v3241_v34 = vld [vmem:[#allocation4 + $0x30] sm:$0xff] }
  0xab   :  { %v137_v33 = vmul.f32 %v2702_v29, %v136_v31  ;;  %v3235_v31 = vld [vmem:[#allocation4 + $0x40] sm:$0xff]  ;;  %426 = vmatpush.msrb.mxu1 %v3231_v30 }
  0xac   :  { %v107_v40 = vmul.f32 %v2704_v32, %v106_v36  ;;  %v3247_v36 = vld [vmem:[#allocation4 + $0x20] sm:$0xff] }
  0xad   :  { %v138_v35 = vadd.f32 %v2702_v29, %v137_v33 }
  0xae   :  { %v108_v45 = vadd.f32 %v2704_v32, %v107_v40  ;;  %v3253_v40 = vld [vmem:[#allocation4 + $0x10] sm:$0xff] }
  0xaf   :  { %v142_v39 = vsel %vm141_vm2, %v2702_v29, %v138_v35  ;;  %v3229_v29 = vld [vmem:[#allocation4 + $0x50] sm:$0xff]  ;;  %v3243_v35 = vld [vmem:[#allocation4 + $0x38] sm:$0xff] }
  0xb0   :  { %v147_v43 = vsel %vm144_vm3, %v146_v41, %v142_v39  ;;  %v112_v48 = vsel %vm111_vm6, %v2704_v32, %v108_v45  ;;  %v3237_v32 = vld [vmem:[#allocation4 + $0x48] sm:$0xff]  ;;  %406 = vmatpush.msrb.mxu0 %v3229_v29  ;;  %v3255_v41 = vld [vmem:[#allocation4 + $0x18] sm:$0xff] }
  0xb1   :  { %v117_v51 = vsel %vm114_vm7, %v116_v49, %v112_v48  ;;  %v167_v1 = vmul.f32 0.0, %v147_v43  ;;  %427 = vmatpush.msrb.mxu1 %v3237_v32 }
  0xb2   :  { %v166_v4 = vmul.f32 0.0, %v117_v51  ;;  %407 = vmatpush.msrb.mxu0 %v3235_v31 }
  0xb3   :  { %428 = vmatpush.msrb.mxu1 %v3243_v35 }
  0xb4   :  { %408 = vmatpush.msrb.mxu0 %v3241_v34 }
  0xb5   :  { %429 = vmatpush.msrb.mxu1 %v3249_v37 }
  0xb6   :  { %409 = vmatpush.msrb.mxu0 %v3247_v36 }
  0xb7   :  { %430 = vmatpush.msrb.mxu1 %v3255_v41 }
  0xb8   :  { %410 = vmatpush.msrb.mxu0 %v3253_v40 }
 0x107   :  { %v173_v42 = vpop.permute.xlu1 %172 }
 0x108   :  { %v177_v44 = vmul.f32 %v173_v42, %v147_v43 }
 0x10a   :  { %182 = vrot.lane.b32.xlu2 %v177_v44, %s3117_s0 }
 0x10f   :  { %v171_v50 = vpop.permute.xlu1 %170 }
 0x110   :  { %v176_v52 = vmul.f32 %v171_v50, %v117_v51 }
 0x112   :  { %180 = vrot.lane.b32.xlu2 %v176_v52, %s3117_s0 }
 0x164   :  { %v183_v2 = vpop.permute.xlu2 %182 }
 0x165   :  { %v3191_v3 = vadd.f32 %v183_v2, %v167_v1 }
 0x167   :  { %2705 = vtanh.f32 %v3191_v3 }
 0x16c   :  { %v181_v5 = vpop.permute.xlu2 %180 }
 0x16d   :  { %v2706_v6 = vpop.eup %2705  ;;  %v3194_v7 = vadd.f32 %v181_v5, %v166_v4 }
 0x16e   :  { %194 = vrot.lane.b32.xlu0 %v2706_v6, %s3117_s0 }
 0x16f   :  { %2707 = vtanh.f32 %v3194_v7 }
 0x170   :  { %2709 = vpow2.f32 %v2598_v9 }
 0x171   :  { %2711 = vpow2.f32 %v2596_v10 }
 0x175   :  { %v2708_v8 = vpop.eup %2707 }
 0x176   :  { %192 = vrot.lane.b32.xlu1 %v2708_v8, %s3117_s0  ;;  %v2710_v11 = vpop.eup %2709 }
 0x177   :  { %v103_v17 = vadd.f32 1.0, %v2710_v11  ;;  %v2712_v23 = vpop.eup %2711 }
 0x178   :  { %v101_v26 = vadd.f32 1.0, %v2712_v23 }
 0x179   :  { %2713 = vrcp.f32 %v103_v17  ;;  %v160_v48 = vand.u32 2147483648, %v103_v17  ;;  %vm154_vm9 = vweird.f32 %v103_v17  ;;  %v158_v49 = vand.u32 2147483647, %v103_v17 }
 0x17a   :  { %2715 = vrcp.f32 %v101_v26  ;;  %v130_v2 = vand.u32 2147483648, %v101_v26  ;;  %vm124_vm13 = vweird.f32 %v101_v26  ;;  %v128_v4 = vand.u32 2147483647, %v101_v26 }
 0x17b   :  { %v161_v52 = vor.u32 1.1754944e-38, %v160_v48  ;;  %vm159_vm12 = vcmp.eq.f32.partialorder %v158_v49, 8.507059e+37 }
 0x17c   :  { %v131_v9 = vor.u32 1.1754944e-38, %v130_v2  ;;  %vm129_vm15 = vcmp.eq.f32.partialorder %v128_v4, 8.507059e+37 }
 0x17f   :  { %v2714_v33 = vpop.eup %2713 }
 0x180   :  { %v150_v38 = vmul.f32 %v2714_v33, %v103_v17  ;;  %v2716_v39 = vpop.eup %2715  ;;  %vm155_vm8 = vweird.f32 %v2714_v33 }
 0x181   :  { %v120_v43 = vmul.f32 %v2716_v39, %v101_v26  ;;  %vm156_vm10 = vmor %vm154_vm9, %vm155_vm8  ;;  %vm125_vm11 = vweird.f32 %v2716_v39  ;;  %v45_v26 = vld [vmem:[#allocation4 + $0x2] ss:$8 sm:$0x3] }
 0x182   :  { %v151_v42 = vsub.f32 1.0, %v150_v38  ;;  %vm126_vm14 = vmor %vm124_vm13, %vm125_vm11  ;;  %v3266_v38 = vperm.slane %v45_v26, 1 }
 0x183   :  { %v121_v45 = vsub.f32 1.0, %v120_v43 }
 0x184   :  { %v152_v44 = vmul.f32 %v2714_v33, %v151_v42  ;;  %4073 = vst [vmem:[#allocation12_spill] sm:$0xff] %v3266_v38 }
 0x185   :  { %v122_v47 = vmul.f32 %v2716_v39, %v121_v45 }
 0x186   :  { %v153_v46 = vadd.f32 %v2714_v33, %v152_v44 }
 0x187   :  { %v123_v51 = vadd.f32 %v2716_v39, %v122_v47 }
 0x188   :  { %v157_v50 = vsel %vm156_vm10, %v2714_v33, %v153_v46 }
 0x189   :  { %v162_v5 = vsel %vm159_vm12, %v161_v52, %v157_v50  ;;  %v127_v8 = vsel %vm126_vm14, %v2716_v39, %v123_v51  ;;  %v3283_v50 = vperm.slane %v45_v26, 0 }
 0x18a   :  { %v132_v10 = vsel %vm129_vm15, %v131_v9, %v127_v8 }
 0x18b   :  { %4074 = vst [vmem:[#allocation13_spill] sm:$0xff] %v3283_v50 }
 0x1e0   :  { %v195_v1 = vpop.permute.xlu0 %194 }
 0x1e1   :  { %v199_v6 = vmul.f32 %v195_v1, %v162_v5 }
 0x1e3   :  { %v218_v17 = vrot.slane %v199_v6, 7 }
 0x1e8   :  { %v193_v11 = vpop.permute.xlu1 %192 }
 0x1e9   :  { %v198_v23 = vmul.f32 %v193_v11, %v132_v10 }
 0x1eb   :  { %v220_v33 = vsel %vm219_vm0, %v218_v17, %v198_v23 }
 0x1ec   :  { %2599 = vmatmul.msk.f32.vlgmr.msra.gmra.mxu0 %vm221_vm1, %v220_v33  ;;  %2600 = vmatmul.msk.f32.vlgmr.msra.gmra.mxu1 %vm221_vm1, %v220_v33 }
 0x1f4   :  { %2605 = vmatmul.msk.f32.vlgmr.msrb.gmra.mxu0 %vm221_vm1, %v220_v33  ;;  %2606 = vmatmul.msk.f32.vlgmr.msrb.gmra.mxu1 %vm221_vm1, %v220_v33 }
 0x269   :  { %v261_v39 = vpop.f32.mrf.mxu1  ;;  %v241_v51 = vpop.f32.mrf.mxu0 }
 0x26a   :  { %v3269_v42 = vadd.f32 %v261_v39, %v3266_v38  ;;  %v242_v52 = vadd.f32 %v241_v51, %v3283_v50 }
 0x26c   :  { %2717 = vtanh.f32 %v3269_v42  ;;  %v2601_v1 = vmul.f32 -1.442695, %v242_v52 }
 0x271   :  { %v432_v43 = vpop.f32.mrf.mxu1  ;;  %v412_v6 = vpop.f32.mrf.mxu0 }
 0x272   :  { %v2718_v44 = vpop.eup %2717  ;;  %v3273_v45 = vadd.f32 %v432_v43, %v3141_v15  ;;  %v438_v46 = vrot.slane %v432_v43, 7  ;;  %v445_v9 = vadd.f32 %v412_v6, %v3139_v14  ;;  %v437_v11 = vrot.slane %v412_v6, 7 }
 0x273   :  { %305 = vrot.lane.b32.xlu2 %v2718_v44, %s3117_s0 }
 0x274   :  { %2719 = vtanh.f32 %v3273_v45  ;;  %v3278_v47 = vadd.f32 %v438_v46, %v3146_v21  ;;  %v2609_v17 = vmul.f32 -1.442695, %v445_v9  ;;  %v443_v33 = vadd.f32 %v437_v11, %v3144_v20 }
 0x276   :  { %2721 = vtanh.f32 %v3278_v47  ;;  %v2607_v43 = vmul.f32 -1.442695, %v443_v33 }
 0x277   :  { %2723 = vpow2.f32 %v2601_v1 }
 0x27a   :  { %v2720_v48 = vpop.eup %2719 }
 0x27b   :  { %537 = vrot.lane.b32.xlu1 %v2720_v48, %s3117_s0 }
 0x27c   :  { %v2722_v49 = vpop.eup %2721 }
 0x27d   :  { %535 = vrot.lane.b32.xlu0 %v2722_v49, %s3117_s0  ;;  %v2724_v2 = vpop.eup %2723 }
 0x27e   :  { %v270_v4 = vadd.f32 1.0, %v2724_v2 }
 0x280   :  { %2725 = vrcp.f32 %v270_v4  ;;  %v283_v39 = vand.u32 2147483648, %v270_v4  ;;  %vm277_vm3 = vweird.f32 %v270_v4  ;;  %v281_v44 = vand.u32 2147483647, %v270_v4 }
 0x281   :  { %2727 = vpow2.f32 %v2609_v17 }
 0x282   :  { %v284_v49 = vor.u32 1.1754944e-38, %v283_v39  ;;  %2729 = vpow2.f32 %v2607_v43  ;;  %vm282_vm5 = vcmp.eq.f32.partialorder %v281_v44, 8.507059e+37 }
 0x286   :  { %v2726_v5 = vpop.eup %2725 }
 0x287   :  { %v273_v8 = vmul.f32 %v2726_v5, %v270_v4  ;;  %vm278_vm2 = vweird.f32 %v2726_v5  ;;  %v2728_v48 = vpop.eup %2727 }
 0x288   :  { %vm279_vm4 = vmor %vm277_vm3, %vm278_vm2  ;;  %v461_v1 = vadd.f32 1.0, %v2728_v48  ;;  %v2730_v6 = vpop.eup %2729 }
 0x289   :  { %v274_v10 = vsub.f32 1.0, %v273_v8  ;;  %v459_v8 = vadd.f32 1.0, %v2730_v6 }
 0x28a   :  { %2731 = vrcp.f32 %v461_v1  ;;  %vm498_vm7 = vweird.f32 %v461_v1  ;;  %v502_v39 = vand.u32 2147483647, %v461_v1 }
 0x28b   :  { %v275_v23 = vmul.f32 %v2726_v5, %v274_v10  ;;  %2733 = vrcp.f32 %v459_v8  ;;  %v474_v6 = vand.u32 2147483648, %v459_v8  ;;  %vm468_vm11 = vweird.f32 %v459_v8 }
 0x28c   :  { %vm503_vm9 = vcmp.eq.f32.partialorder %v502_v39, 8.507059e+37 }
 0x28d   :  { %v276_v26 = vadd.f32 %v2726_v5, %v275_v23 }
 0x28f   :  { %v280_v46 = vsel %vm279_vm4, %v2726_v5, %v276_v26  ;;  %v504_v26 = vand.u32 2147483648, %v461_v1 }
 0x290   :  { %v285_v52 = vsel %vm282_vm5, %v284_v49, %v280_v46  ;;  %v2732_v9 = vpop.eup %2731 }
 0x291   :  { %v494_v10 = vmul.f32 %v2732_v9, %v461_v1  ;;  %v2734_v11 = vpop.eup %2733  ;;  %vm499_vm6 = vweird.f32 %v2732_v9  ;;  %v505_v46 = vor.u32 1.1754944e-38, %v504_v26  ;;  %v475_v1 = vor.u32 1.1754944e-38, %v474_v6  ;;  %v3326_v6 = vld [vmem:[#allocation4 + $0x148] sm:$0xff] }
 0x292   :  { %v464_v17 = vmul.f32 %v2734_v11, %v459_v8  ;;  %vm500_vm8 = vmor %vm498_vm7, %vm499_vm6  ;;  %vm469_vm10 = vweird.f32 %v2734_v11 }
 0x293   :  { %v495_v4 = vsub.f32 1.0, %v494_v10  ;;  %v472_v10 = vand.u32 2147483647, %v459_v8  ;;  %vm470_vm12 = vmor %vm468_vm11, %vm469_vm10  ;;  %v3298_v8 = vld [vmem:[#allocation4 + $0x180] sm:$0xff] }
 0x294   :  { %v465_v23 = vsub.f32 1.0, %v464_v17  ;;  %347 = vmatpush.msra.mxu2 %v3298_v8  ;;  %678 = vmatpush.msra.mxu0 %v3298_v8 }
 0x295   :  { %v496_v5 = vmul.f32 %v2732_v9, %v495_v4  ;;  %vm473_vm13 = vcmp.eq.f32.partialorder %v472_v10, 8.507059e+37  ;;  %v3332_v10 = vld [vmem:[#allocation4 + $0x130] sm:$0xff] }
 0x296   :  { %v466_v43 = vmul.f32 %v2734_v11, %v465_v23  ;;  %v303_v23 = vmul.f32 0.0, %v285_v52 }
 0x297   :  { %v497_v33 = vadd.f32 %v2732_v9, %v496_v5 }
 0x299   :  { %v501_v44 = vsel %vm500_vm8, %v2732_v9, %v497_v33 }
 0x29a   :  { %v3289_v49 = vsel %vm503_vm9, %v505_v46, %v501_v44  ;;  %v3306_v44 = vld [vmem:[#allocation4 + $0x178] sm:$0xff]  ;;  %v3310_v46 = vld [vmem:[#allocation4 + $0x168] sm:$0xff] }
 0x2cd   :  { %v306_v51 = vpop.permute.xlu2 %305 }
 0x2ce   :  { %v308_v2 = vmul.f32 %v306_v51, %v285_v52  ;;  %v467_v51 = vadd.f32 %v2734_v11, %v466_v43  ;;  %v3300_v43 = vld [vmem:[#allocation4 + $0x188] sm:$0xff]  ;;  %v3308_v52 = vld [vmem:[#allocation4 + $0x160] sm:$0xff] }
 0x2cf   :  { %367 = vmatpush.msra.mxu3 %v3300_v43  ;;  %698 = vmatpush.msra.mxu1 %v3300_v43 }
 0x2d0   :  { %310 = vrot.lane.b32.xlu2 %v308_v2, %s3117_s0  ;;  %v471_v4 = vsel %vm470_vm12, %v2734_v11, %v467_v51  ;;  %v3302_v11 = vld [vmem:[#allocation4 + $0x170] sm:$0xff]  ;;  %v3318_v51 = vld [vmem:[#allocation4 + $0x158] sm:$0xff] }
 0x2d1   :  { %v476_v9 = vsel %vm473_vm13, %v475_v1, %v471_v4  ;;  %348 = vmatpush.msra.mxu2 %v3302_v11  ;;  %368 = vmatpush.msra.mxu3 %v3306_v44  ;;  %v3334_v4 = vld [vmem:[#allocation4 + $0x138] sm:$0xff]  ;;  %v3340_v1 = vld [vmem:[#allocation4 + $0x120] sm:$0xff] }
 0x2d2   :  { %679 = vmatpush.msra.mxu0 %v3302_v11  ;;  %699 = vmatpush.msra.mxu1 %v3306_v44 }
 0x2d3   :  { %349 = vmatpush.msra.mxu2 %v3308_v52  ;;  %369 = vmatpush.msra.mxu3 %v3310_v46 }
 0x2d4   :  { %680 = vmatpush.msra.mxu0 %v3308_v52  ;;  %700 = vmatpush.msra.mxu1 %v3310_v46 }
 0x2d5   :  { %370 = vmatpush.msra.mxu3 %v3318_v51 }
 0x2d6   :  { %701 = vmatpush.msra.mxu1 %v3318_v51 }
 0x2d7   :  { %371 = vmatpush.msra.mxu3 %v3326_v6 }
 0x2d8   :  { %702 = vmatpush.msra.mxu1 %v3326_v6 }
 0x2d9   :  { %372 = vmatpush.msra.mxu3 %v3334_v4 }
 0x2da   :  { %703 = vmatpush.msra.mxu1 %v3334_v4 }
 0x2ed   :  { %v538_v48 = vpop.permute.xlu1 %537 }
 0x2ee   :  { %v542_v2 = vmul.f32 %v538_v48, %v3289_v49  ;;  %v3316_v48 = vld [vmem:[#allocation4 + $0x150] sm:$0xff] }
 0x2ef   :  { %v536_v17 = vpop.permute.xlu0 %535  ;;  %350 = vmatpush.msra.mxu2 %v3316_v48  ;;  %681 = vmatpush.msra.mxu0 %v3316_v48 }
 0x2f0   :  { %547 = vrot.lane.b32.xlu1 %v542_v2, %s3117_s0  ;;  %v541_v5 = vmul.f32 %v536_v17, %v476_v9  ;;  %v3324_v2 = vld [vmem:[#allocation4 + $0x140] sm:$0xff]  ;;  %v3342_v17 = vld [vmem:[#allocation4 + $0x128] sm:$0xff] }
 0x2f1   :  { %351 = vmatpush.msra.mxu2 %v3324_v2  ;;  %682 = vmatpush.msra.mxu0 %v3324_v2 }
 0x2f2   :  { %545 = vrot.lane.b32.xlu0 %v541_v5, %s3117_s0  ;;  %v528_v5 = vrot.slane %v3191_v3, 7  ;;  %373 = vmatpush.msra.mxu3 %v3342_v17  ;;  %v527_v3 = vrot.slane %v3194_v7, 7 }
 0x2f3   :  { %352 = vmatpush.msra.mxu2 %v3332_v10  ;;  %683 = vmatpush.msra.mxu0 %v3332_v10 }
 0x2f4   :  { %704 = vmatpush.msra.mxu1 %v3342_v17  ;;  %v531_v14 = vmul.f32 %v527_v3, %v476_v9 }
 0x2f5   :  { %353 = vmatpush.msra.mxu2 %v3340_v1  ;;  %684 = vmatpush.msra.mxu0 %v3340_v1 }
 0x32a   :  { %v311_v33 = vpop.permute.xlu2 %310 }
 0x32b   :  { %v3294_v26 = vadd.f32 %v311_v33, %v303_v23  ;;  %v2602_v23 = vmul.f32 -1.442695, %v3269_v42  ;;  %v532_v33 = vmul.f32 %v528_v5, %v3289_v49  ;;  %v3365_v5 = vld [vmem:[#allocation4 + $0x110] sm:$0xff] }
 0x32c   :  { %354 = vmatpush.msra.mxu2 %v3365_v5  ;;  %685 = vmatpush.msra.mxu0 %v3365_v5 }
 0x32d   :  { %4075 = vst [vmem:[#allocation14_spill] sm:$0xff] %v3294_v26  ;;  %2735 = vtanh.f32 %v3294_v26 }
 0x32e   :  { %2737 = vpow2.f32 %v2602_v23  ;;  %579 = vmatpush.msrb.mxu2 %v3155_v53  ;;  %897 = vmatpush.msrb.mxu0 %v3155_v53 }
 0x330   :  { %580 = vmatpush.msrb.mxu2 %v3159_v55  ;;  %898 = vmatpush.msrb.mxu0 %v3159_v55 }
 0x332   :  { %581 = vmatpush.msrb.mxu2 %v3165_v57  ;;  %899 = vmatpush.msrb.mxu0 %v3165_v57 }
 0x333   :  { %v2736_v39 = vpop.eup %2735 }
 0x334   :  { %316 = vrot.lane.b32.xlu2 %v2736_v39, %s3117_s0  ;;  %v2738_v20 = vpop.eup %2737  ;;  %582 = vmatpush.msrb.mxu2 %v3171_v59 }
 0x335   :  { %v271_v49 = vadd.f32 1.0, %v2738_v20  ;;  %900 = vmatpush.msrb.mxu0 %v3171_v59 }
 0x336   :  { %583 = vmatpush.msrb.mxu2 %v3177_v61 }
 0x337   :  { %901 = vmatpush.msrb.mxu0 %v3177_v61  ;;  %vm292_vm15 = vweird.f32 %v271_v49  ;;  %v296_v3 = vand.u32 2147483647, %v271_v49 }
 0x338   :  { %584 = vmatpush.msrb.mxu2 %v3183_v63 }
 0x339   :  { %902 = vmatpush.msrb.mxu0 %v3183_v63  ;;  %vm297_vm3 = vcmp.eq.f32.partialorder %v296_v3, 8.507059e+37 }
 0x33a   :  { %585 = vmatpush.msrb.mxu2 %v3201_v12 }
 0x33b   :  { %903 = vmatpush.msrb.mxu0 %v3201_v12 }
 0x33c   :  { %586 = vmatpush.msrb.mxu2 %v3205_v16 }
 0x33d   :  { %904 = vmatpush.msrb.mxu0 %v3205_v16 }
 0x362   :  { %v548_v39 = vpop.permute.xlu1 %547 }
 0x363   :  { %v3357_v26 = vadd.f32 %v548_v39, %v532_v33  ;;  %v3367_v33 = vld [vmem:[#allocation4 + $0x118] sm:$0xff]  ;;  %v298_v39 = vand.u32 2147483648, %v271_v49 }
 0x364   :  { %v546_v42 = vpop.permute.xlu0 %545  ;;  %374 = vmatpush.msra.mxu3 %v3367_v33  ;;  %705 = vmatpush.msra.mxu1 %v3367_v33 }
 0x365   :  { %4076 = vst [vmem:[#allocation15_spill] sm:$0xff] %v3357_v26  ;;  %2739 = vtanh.f32 %v3357_v26  ;;  %v3361_v50 = vadd.f32 %v546_v42, %v531_v14 }
 0x366   :  { %599 = vmatpush.msrb.mxu3 %v3157_v54  ;;  %917 = vmatpush.msrb.mxu1 %v3157_v54 }
 0x367   :  { %4077 = vst [vmem:[#allocation16_spill] sm:$0xff] %v3361_v50  ;;  %2741 = vtanh.f32 %v3361_v50 }
 0x368   :  { %2743 = vrcp.f32 %v271_v49  ;;  %600 = vmatpush.msrb.mxu3 %v3163_v56  ;;  %918 = vmatpush.msrb.mxu1 %v3163_v56 }
 0x36a   :  { %601 = vmatpush.msrb.mxu3 %v3167_v58  ;;  %919 = vmatpush.msrb.mxu1 %v3167_v58 }
 0x36b   :  { %v2740_v15 = vpop.eup %2739 }
 0x36c   :  { %559 = vrot.lane.b32.xlu1 %v2740_v15, %s3117_s0  ;;  %602 = vmatpush.msrb.mxu3 %v3173_v60 }
 0x36d   :  { %v2742_v14 = vpop.eup %2741  ;;  %920 = vmatpush.msrb.mxu1 %v3173_v60 }
 0x36e   :  { %557 = vrot.lane.b32.xlu0 %v2742_v14, %s3117_s0  ;;  %v2744_v15 = vpop.eup %2743  ;;  %603 = vmatpush.msrb.mxu3 %v3179_v62  ;;  %v299_v14 = vor.u32 1.1754944e-38, %v298_v39 }
 0x36f   :  { %v288_v20 = vmul.f32 %v2744_v15, %v271_v49  ;;  %921 = vmatpush.msrb.mxu1 %v3179_v62  ;;  %vm293_vm14 = vweird.f32 %v2744_v15 }
 0x370   :  { %604 = vmatpush.msrb.mxu3 %v3185_v0  ;;  %vm294_vm2 = vmor %vm292_vm15, %vm293_vm14 }
 0x371   :  { %v289_v7 = vsub.f32 1.0, %v288_v20  ;;  %922 = vmatpush.msrb.mxu1 %v3185_v0 }
 0x372   :  { %605 = vmatpush.msrb.mxu3 %v3203_v13 }
 0x373   :  { %923 = vmatpush.msrb.mxu1 %v3203_v13  ;;  %v290_v9 = vmul.f32 %v2744_v15, %v289_v7 }
 0x374   :  { %606 = vmatpush.msrb.mxu3 %v3209_v18 }
 0x375   :  { %924 = vmatpush.msrb.mxu1 %v3209_v18  ;;  %v291_v23 = vadd.f32 %v2744_v15, %v290_v9 }
 0x377   :  { %v295_v42 = vsel %vm294_vm2, %v2744_v15, %v291_v23 }
 0x378   :  { %v300_v20 = vsel %vm297_vm3, %v299_v14, %v295_v42 }
 0x38e   :  { %v317_v26 = vpop.permute.xlu2 %316 }
 0x38f   :  { %v319_v50 = vmul.f32 %v317_v26, %v300_v20 }
 0x391   :  { %2603 = vmatmul.msk.f32.vlgmr.msra.gmra.mxu2 %vm221_vm1, %v319_v50  ;;  %2604 = vmatmul.msk.f32.vlgmr.msra.gmra.mxu3 %vm221_vm1, %v319_v50 }
 0x392   :  { %718 = vmatpush.msra.mxu2 %v3211_v19  ;;  %738 = vmatpush.msra.mxu3 %v3213_v22  ;;  %v2608_v19 = vmul.f32 -1.442695, %v3278_v47  ;;  %v2610_v22 = vmul.f32 -1.442695, %v3273_v45 }
 0x394   :  { %719 = vmatpush.msra.mxu2 %v3217_v24  ;;  %739 = vmatpush.msra.mxu3 %v3219_v25  ;;  %2745 = vpow2.f32 %v2608_v19 }
 0x395   :  { %2747 = vpow2.f32 %v2610_v22 }
 0x396   :  { %720 = vmatpush.msra.mxu2 %v3225_v27  ;;  %740 = vmatpush.msra.mxu3 %v3227_v28 }
 0x398   :  { %721 = vmatpush.msra.mxu2 %v3229_v29  ;;  %741 = vmatpush.msra.mxu3 %v3231_v30 }
 0x39a   :  { %722 = vmatpush.msra.mxu2 %v3235_v31  ;;  %742 = vmatpush.msra.mxu3 %v3237_v32  ;;  %v2746_v24 = vpop.eup %2745 }
 0x39b   :  { %v2748_v25 = vpop.eup %2747  ;;  %v460_v27 = vadd.f32 1.0, %v2746_v24 }
 0x39c   :  { %723 = vmatpush.msra.mxu2 %v3241_v34  ;;  %743 = vmatpush.msra.mxu3 %v3243_v35  ;;  %v462_v28 = vadd.f32 1.0, %v2748_v25 }
 0x39d   :  { %2749 = vrcp.f32 %v460_v27  ;;  %v489_v47 = vand.u32 2147483648, %v460_v27  ;;  %vm483_vm6 = vweird.f32 %v460_v27  ;;  %v487_v39 = vand.u32 2147483647, %v460_v27 }
 0x39e   :  { %724 = vmatpush.msra.mxu2 %v3247_v36  ;;  %744 = vmatpush.msra.mxu3 %v3249_v37  ;;  %2751 = vrcp.f32 %v462_v28  ;;  %v519_v3 = vand.u32 2147483648, %v462_v28  ;;  %vm513_vm8 = vweird.f32 %v462_v28  ;;  %v517_v42 = vand.u32 2147483647, %v462_v28 }
 0x39f   :  { %v490_v20 = vor.u32 1.1754944e-38, %v489_v47  ;;  %vm488_vm10 = vcmp.eq.f32.partialorder %v487_v39, 8.507059e+37 }
 0x3a0   :  { %725 = vmatpush.msra.mxu2 %v3253_v40  ;;  %745 = vmatpush.msra.mxu3 %v3255_v41  ;;  %v520_v22 = vor.u32 1.1754944e-38, %v519_v3  ;;  %vm518_vm11 = vcmp.eq.f32.partialorder %v517_v42, 8.507059e+37  ;;  %v4080_v42 = vld [vmem:[#allocation10_spill] sm:$0xff] }
 0x3a3   :  { %v2750_v29 = vpop.eup %2749 }
 0x3a4   :  { %v2752_v30 = vpop.eup %2751  ;;  %v479_v50 = vmul.f32 %v2750_v29, %v460_v27  ;;  %vm484_vm4 = vweird.f32 %v2750_v29 }
 0x3a5   :  { %v509_v26 = vmul.f32 %v2752_v30, %v462_v28  ;;  %vm514_vm5 = vweird.f32 %v2752_v30  ;;  %vm485_vm7 = vmor %vm483_vm6, %vm484_vm4 }
 0x3a6   :  { %v480_v49 = vsub.f32 1.0, %v479_v50  ;;  %vm515_vm9 = vmor %vm513_vm8, %vm514_vm5 }
 0x3a7   :  { %v510_v15 = vsub.f32 1.0, %v509_v26 }
 0x3a8   :  { %v481_v7 = vmul.f32 %v2750_v29, %v480_v49 }
 0x3a9   :  { %v511_v9 = vmul.f32 %v2752_v30, %v510_v15 }
 0x3aa   :  { %v482_v23 = vadd.f32 %v2750_v29, %v481_v7 }
 0x3ab   :  { %v512_v45 = vadd.f32 %v2752_v30, %v511_v9 }
 0x3ac   :  { %v486_v14 = vsel %vm485_vm7, %v2750_v29, %v482_v23 }
 0x3ad   :  { %v516_v19 = vsel %vm515_vm9, %v2752_v30, %v512_v45  ;;  %v491_v25 = vsel %vm488_vm10, %v490_v20, %v486_v14 }
 0x3ae   :  { %v521_v49 = vsel %vm518_vm11, %v520_v22, %v516_v19 }
 0x3de   :  { %v560_v24 = vpop.permute.xlu1 %559 }
 0x3df   :  { %v564_v15 = vmul.f32 %v560_v24, %v521_v49 }
 0x3e0   :  { %v558_v50 = vpop.permute.xlu0 %557 }
 0x3e1   :  { %v563_v26 = vmul.f32 %v558_v50, %v491_v25  ;;  %v4081_v25 = vld [vmem:[#allocation8_spill] sm:$0xff] }
 0x3e3   :  { %v567_v7 = vrot.slane %v563_v26, 1 }
 0x3e5   :  { %v568_v27 = vsel %vm219_vm0, %v564_v15, %v567_v7 }
 0x3e6   :  { %2611 = vmatmul.msk.f32.vlgmr.msrb.gmra.mxu2 %vm221_vm1, %v568_v27  ;;  %2612 = vmatmul.msk.f32.vlgmr.msrb.gmra.mxu3 %vm221_vm1, %v568_v27 }
 0x3e7   :  { %996 = vmatpush.msrb.mxu2 %v3298_v8  ;;  %1016 = vmatpush.msrb.mxu3 %v3300_v43 }
 0x3e9   :  { %997 = vmatpush.msrb.mxu2 %v3302_v11  ;;  %1017 = vmatpush.msrb.mxu3 %v3306_v44 }
 0x3eb   :  { %998 = vmatpush.msrb.mxu2 %v3308_v52  ;;  %1018 = vmatpush.msrb.mxu3 %v3310_v46 }
 0x3ed   :  { %999 = vmatpush.msrb.mxu2 %v3316_v48  ;;  %1019 = vmatpush.msrb.mxu3 %v3318_v51 }
 0x3ee   :  { %2617 = vmatmul.msk.f32.vlgmr.msra.gmra.mxu2 %vm221_vm1, %v568_v27  ;;  %2618 = vmatmul.msk.f32.vlgmr.msra.gmra.mxu3 %vm221_vm1, %v568_v27 }
 0x3ef   :  { %1000 = vmatpush.msrb.mxu2 %v3324_v2  ;;  %1020 = vmatpush.msrb.mxu3 %v3326_v6 }
 0x3f1   :  { %1001 = vmatpush.msrb.mxu2 %v3332_v10  ;;  %1021 = vmatpush.msrb.mxu3 %v3334_v4 }
 0x3f3   :  { %1002 = vmatpush.msrb.mxu2 %v3340_v1  ;;  %1022 = vmatpush.msrb.mxu3 %v3342_v17 }
 0x3f5   :  { %1003 = vmatpush.msrb.mxu2 %v3365_v5  ;;  %1023 = vmatpush.msrb.mxu3 %v3367_v33 }
 0x3f7   :  { %1215 = vmatpush.msra.mxu2 %v3155_v53  ;;  %1235 = vmatpush.msra.mxu3 %v3157_v54 }
 0x3f9   :  { %1216 = vmatpush.msra.mxu2 %v3159_v55  ;;  %1236 = vmatpush.msra.mxu3 %v3163_v56 }
 0x3fb   :  { %1217 = vmatpush.msra.mxu2 %v3165_v57  ;;  %1237 = vmatpush.msra.mxu3 %v3167_v58 }
 0x3fd   :  { %1218 = vmatpush.msra.mxu2 %v3171_v59  ;;  %1238 = vmatpush.msra.mxu3 %v3173_v60 }
 0x3ff   :  { %1219 = vmatpush.msra.mxu2 %v3177_v61  ;;  %1239 = vmatpush.msra.mxu3 %v3179_v62  ;;  %v4078_v62 = vld [vmem:[#allocation9_spill] sm:$0xff] }
 0x401   :  { %1220 = vmatpush.msra.mxu2 %v3183_v63  ;;  %1240 = vmatpush.msra.mxu3 %v3185_v0 }
 0x403   :  { %1221 = vmatpush.msra.mxu2 %v3201_v12  ;;  %1241 = vmatpush.msra.mxu3 %v3203_v13 }
 0x405   :  { %1222 = vmatpush.msra.mxu2 %v3205_v16  ;;  %1242 = vmatpush.msra.mxu3 %v3209_v18  ;;  %v4079_v18 = vld [vmem:[#allocation13_spill] sm:$0xff] }
 0x414   :  { %v376_v53 = vpop.f32.mrf.mxu3  ;;  %v356_v13 = vpop.f32.mrf.mxu2 }
 0x415   :  { %v377_v54 = vadd.f32 %v376_v53, %v3266_v38  ;;  %v357_v28 = vadd.f32 %v356_v13, %v4079_v18 }
 0x469   :  { %v608_v55 = vpop.f32.mrf.mxu3  ;;  %v588_v16 = vpop.f32.mrf.mxu2 }
 0x46a   :  { %v3464_v56 = vadd.f32 %v608_v55, %v377_v54  ;;  %v589_v29 = vadd.f32 %v588_v16, %v357_v28 }
 0x46c   :  { %2753 = vtanh.f32 %v3464_v56  ;;  %v2613_v30 = vmul.f32 -1.442695, %v589_v29 }
 0x471   :  { %v747_v57 = vpop.f32.mrf.mxu3  ;;  %v727_v45 = vpop.f32.mrf.mxu2 }
 0x472   :  { %v2754_v58 = vpop.eup %2753  ;;  %v753_v59 = vrot.slane %v747_v57, 6  ;;  %v755_v61 = vrot.slane %v747_v57, 7  ;;  %v752_v39 = vrot.slane %v727_v45, 6  ;;  %v754_v19 = vrot.slane %v727_v45, 7 }
 0x473   :  { %652 = vrot.lane.b32.xlu2 %v2754_v58, %s3117_s0 }
 0x474   :  { %v3469_v60 = vadd.f32 %v753_v59, %v3146_v21  ;;  %v3473_v63 = vadd.f32 %v755_v61, %v4078_v62  ;;  %v760_v14 = vadd.f32 %v752_v39, %v4080_v42  ;;  %v762_v50 = vadd.f32 %v754_v19, %v4081_v25 }
 0x476   :  { %2755 = vtanh.f32 %v3469_v60  ;;  %v2619_v22 = vmul.f32 -1.442695, %v760_v14  ;;  %v2621_v7 = vmul.f32 -1.442695, %v762_v50 }
 0x477   :  { %2757 = vtanh.f32 %v3473_v63 }
 0x478   :  { %2759 = vpow2.f32 %v2613_v30 }
 0x47c   :  { %v2756_v0 = vpop.eup %2755 }
 0x47d   :  { %852 = vrot.lane.b32.xlu0 %v2756_v0, %s3117_s0  ;;  %v2758_v12 = vpop.eup %2757 }
 0x47e   :  { %854 = vrot.lane.b32.xlu1 %v2758_v12, %s3117_s0  ;;  %v2760_v9 = vpop.eup %2759 }
 0x47f   :  { %v617_v23 = vadd.f32 1.0, %v2760_v9 }
 0x481   :  { %2761 = vrcp.f32 %v617_v23  ;;  %v630_v49 = vand.u32 2147483648, %v617_v23  ;;  %vm624_vm13 = vweird.f32 %v617_v23  ;;  %v628_v15 = vand.u32 2147483647, %v617_v23 }
 0x482   :  { %2763 = vpow2.f32 %v2619_v22 }
 0x483   :  { %v631_v53 = vor.u32 1.1754944e-38, %v630_v49  ;;  %vm629_vm15 = vcmp.eq.f32.partialorder %v628_v15, 8.507059e+37  ;;  %2765 = vpow2.f32 %v2621_v7 }
 0x487   :  { %v2762_v47 = vpop.eup %2761 }
 0x488   :  { %v620_v3 = vmul.f32 %v2762_v47, %v617_v23  ;;  %vm625_vm12 = vweird.f32 %v2762_v47  ;;  %v2764_v54 = vpop.eup %2763 }
 0x489   :  { %vm626_vm14 = vmor %vm624_vm13, %vm625_vm12  ;;  %v776_v59 = vadd.f32 1.0, %v2764_v54  ;;  %v2766_v61 = vpop.eup %2765  ;;  %v4082_v54 = vld [vmem:[#allocation14_spill] sm:$0xff] }
 0x48a   :  { %v621_v20 = vsub.f32 1.0, %v620_v3  ;;  %v778_v0 = vadd.f32 1.0, %v2766_v61 }
 0x48b   :  { %2767 = vrcp.f32 %v776_v59  ;;  %vm785_vm3 = vweird.f32 %v776_v59  ;;  %v789_v45 = vand.u32 2147483647, %v776_v59 }
 0x48c   :  { %v622_v24 = vmul.f32 %v2762_v47, %v621_v20  ;;  %2769 = vrcp.f32 %v778_v0  ;;  %vm815_vm7 = vweird.f32 %v778_v0 }
 0x48d   :  { %vm790_vm5 = vcmp.eq.f32.partialorder %v789_v45, 8.507059e+37 }
 0x48e   :  { %v623_v26 = vadd.f32 %v2762_v47, %v622_v24  ;;  %v821_v24 = vand.u32 2147483648, %v778_v0 }
 0x490   :  { %v627_v27 = vsel %vm626_vm14, %v2762_v47, %v623_v26  ;;  %v791_v47 = vand.u32 2147483648, %v776_v59  ;;  %v819_v26 = vand.u32 2147483647, %v778_v0  ;;  %v822_v15 = vor.u32 1.1754944e-38, %v821_v24 }
 0x491   :  { %v632_v57 = vsel %vm629_vm15, %v631_v53, %v627_v27  ;;  %v2768_v12 = vpop.eup %2767 }
 0x492   :  { %v781_v13 = vmul.f32 %v2768_v12, %v776_v59  ;;  %v2770_v16 = vpop.eup %2769  ;;  %vm786_vm2 = vweird.f32 %v2768_v12  ;;  %v792_v14 = vor.u32 1.1754944e-38, %v791_v47  ;;  %vm820_vm9 = vcmp.eq.f32.partialorder %v819_v26, 8.507059e+37 }
 0x493   :  { %v811_v29 = vmul.f32 %v2770_v16, %v778_v0  ;;  %vm787_vm4 = vmor %vm785_vm3, %vm786_vm2  ;;  %vm816_vm6 = vweird.f32 %v2770_v16  ;;  %v4083_v0 = vld [vmem:[#allocation16_spill] sm:$0xff] }
 0x494   :  { %v782_v28 = vsub.f32 1.0, %v781_v13  ;;  %vm817_vm8 = vmor %vm815_vm7, %vm816_vm6  ;;  %v2614_v13 = vmul.f32 -1.442695, %v3464_v56 }
 0x495   :  { %v812_v9 = vsub.f32 1.0, %v811_v29 }
 0x496   :  { %v783_v30 = vmul.f32 %v2768_v12, %v782_v28 }
 0x497   :  { %v813_v39 = vmul.f32 %v2770_v16, %v812_v9 }
 0x498   :  { %v784_v23 = vadd.f32 %v2768_v12, %v783_v30 }
 0x499   :  { %v814_v20 = vadd.f32 %v2770_v16, %v813_v39 }
 0x49a   :  { %v788_v3 = vsel %vm787_vm4, %v2768_v12, %v784_v23  ;;  %v844_v12 = vrot.slane %v4083_v0, 7  ;;  %v3514_v0 = vld [vmem:[#allocation4 + $0x60] sm:$0xff] }
 0x49b   :  { %v793_v22 = vsel %vm790_vm5, %v792_v14, %v788_v3  ;;  %v818_v49 = vsel %vm817_vm8, %v2770_v16, %v814_v20 }
 0x49c   :  { %v823_v27 = vsel %vm820_vm9, %v822_v15, %v818_v49  ;;  %v848_v16 = vmul.f32 %v844_v12, %v793_v22  ;;  %v3517_v12 = vld [vmem:[#allocation4 + $0x68] sm:$0xff] }
 0x4cd   :  { %v653_v55 = vpop.permute.xlu2 %652 }
 0x4ce   :  { %v655_v58 = vmul.f32 %v653_v55, %v632_v57  ;;  %v650_v55 = vmul.f32 %v632_v57, %v4082_v54  ;;  %v4084_v57 = vld [vmem:[#allocation15_spill] sm:$0xff]  ;;  %v3502_v54 = vld [vmem:[#allocation4 + $0x80] sm:$0xff] }
 0x4cf   :  { %v845_v30 = vrot.slane %v4084_v57, 7  ;;  %v2622_v57 = vmul.f32 -1.442695, %v3473_v63 }
 0x4d0   :  { %657 = vrot.lane.b32.xlu2 %v655_v58, %s3117_s0 }
 0x4d1   :  { %v849_v9 = vmul.f32 %v845_v30, %v823_v27 }
 0x4ef   :  { %v853_v19 = vpop.permute.xlu0 %852 }
 0x4f0   :  { %v858_v50 = vmul.f32 %v853_v19, %v793_v22  ;;  %v855_v7 = vpop.permute.xlu1 %854 }
 0x4f1   :  { %v859_v53 = vmul.f32 %v855_v7, %v823_v27 }
 0x4f2   :  { %862 = vrot.lane.b32.xlu0 %v858_v50, %s3117_s0 }
 0x4f3   :  { %864 = vrot.lane.b32.xlu1 %v859_v53, %s3117_s0 }
 0x52a   :  { %v658_v58 = vpop.permute.xlu2 %657 }
 0x52b   :  { %v3485_v59 = vadd.f32 %v658_v58, %v650_v55  ;;  %v3505_v55 = vld [vmem:[#allocation4 + $0x88] sm:$0xff]  ;;  %v3508_v58 = vld [vmem:[#allocation4 + $0x70] sm:$0xff] }
 0x52d   :  { %2771 = vtanh.f32 %v3485_v59 }
 0x52e   :  { %2773 = vpow2.f32 %v2614_v13  ;;  %v3520_v13 = vld [vmem:[#allocation4 + $0x50] sm:$0xff] }
 0x533   :  { %v2772_v61 = vpop.eup %2771 }
 0x534   :  { %663 = vrot.lane.b32.xlu2 %v2772_v61, %s3117_s0  ;;  %v2774_v23 = vpop.eup %2773  ;;  %v3511_v61 = vld [vmem:[#allocation4 + $0x78] sm:$0xff] }
 0x535   :  { %v618_v3 = vadd.f32 1.0, %v2774_v23 }
 0x537   :  { %v645_v50 = vand.u32 2147483648, %v618_v3  ;;  %vm639_vm11 = vweird.f32 %v618_v3  ;;  %v643_v26 = vand.u32 2147483647, %v618_v3 }
 0x539   :  { %v646_v15 = vor.u32 1.1754944e-38, %v645_v50  ;;  %vm644_vm13 = vcmp.eq.f32.partialorder %v643_v26, 8.507059e+37 }
 0x564   :  { %v863_v28 = vpop.permute.xlu0 %862 }
 0x565   :  { %v3491_v29 = vadd.f32 %v863_v28, %v848_v16  ;;  %v865_v47 = vpop.permute.xlu1 %864  ;;  %v3523_v16 = vld [vmem:[#allocation4 + $0x58] sm:$0xff]  ;;  %v2620_v28 = vmul.f32 -1.442695, %v3469_v60 }
 0x566   :  { %v3495_v45 = vadd.f32 %v865_v47, %v849_v9 }
 0x567   :  { %2775 = vtanh.f32 %v3491_v29 }
 0x568   :  { %2777 = vtanh.f32 %v3495_v45 }
 0x569   :  { %2779 = vrcp.f32 %v618_v3 }
 0x56a   :  { %2781 = vpow2.f32 %v2620_v28 }
 0x56b   :  { %2783 = vpow2.f32 %v2622_v57 }
 0x56d   :  { %v2776_v39 = vpop.eup %2775 }
 0x56e   :  { %874 = vrot.lane.b32.xlu0 %v2776_v39, %s3117_s0  ;;  %v2778_v56 = vpop.eup %2777 }
 0x56f   :  { %876 = vrot.lane.b32.xlu1 %v2778_v56, %s3117_s0  ;;  %v2780_v14 = vpop.eup %2779 }
 0x570   :  { %v635_v20 = vmul.f32 %v2780_v14, %v618_v3  ;;  %vm640_vm10 = vweird.f32 %v2780_v14 }
 0x571   :  { %vm641_vm12 = vmor %vm639_vm11, %vm640_vm10 }
 0x572   :  { %v636_v19 = vsub.f32 1.0, %v635_v20 }
 0x574   :  { %v637_v22 = vmul.f32 %v2780_v14, %v636_v19 }
 0x576   :  { %v638_v24 = vadd.f32 %v2780_v14, %v637_v22 }
 0x578   :  { %v642_v49 = vsel %vm641_vm12, %v2780_v14, %v638_v24 }
 0x579   :  { %v647_v7 = vsel %vm644_vm13, %v646_v15, %v642_v49 }
 0x58e   :  { %v664_v27 = vpop.permute.xlu2 %663 }
 0x58f   :  { %v666_v53 = vmul.f32 %v664_v27, %v647_v7 }
 0x591   :  { %2615 = vmatmul.msk.f32.vlgmr.msra.gmra.mxu0 %vm221_vm1, %v666_v53  ;;  %2616 = vmatmul.msk.f32.vlgmr.msra.gmra.mxu1 %vm221_vm1, %v666_v53 }
 0x592   :  { %1036 = vmatpush.msra.mxu0 %v3502_v54  ;;  %1056 = vmatpush.msra.mxu1 %v3505_v55 }
 0x594   :  { %1037 = vmatpush.msra.mxu0 %v3508_v58  ;;  %1057 = vmatpush.msra.mxu1 %v3511_v61 }
 0x596   :  { %1038 = vmatpush.msra.mxu0 %v3514_v0  ;;  %1058 = vmatpush.msra.mxu1 %v3517_v12 }
 0x598   :  { %1039 = vmatpush.msra.mxu0 %v3520_v13  ;;  %1059 = vmatpush.msra.mxu1 %v3523_v16 }
 0x59a   :  { %1040 = vmatpush.msra.mxu0 %v3235_v31  ;;  %1060 = vmatpush.msra.mxu1 %v3237_v32  ;;  %v2782_v31 = vpop.eup %2781 }
 0x59b   :  { %v777_v32 = vadd.f32 1.0, %v2782_v31  ;;  %v2784_v30 = vpop.eup %2783 }
 0x59c   :  { %1041 = vmatpush.msra.mxu0 %v3241_v34  ;;  %1061 = vmatpush.msra.mxu1 %v3243_v35  ;;  %v779_v34 = vadd.f32 1.0, %v2784_v30 }
 0x59d   :  { %2785 = vrcp.f32 %v777_v32  ;;  %v806_v60 = vand.u32 2147483648, %v777_v32  ;;  %vm800_vm15 = vweird.f32 %v777_v32  ;;  %v804_v63 = vand.u32 2147483647, %v777_v32 }
 0x59e   :  { %1042 = vmatpush.msra.mxu0 %v3247_v36  ;;  %1062 = vmatpush.msra.mxu1 %v3249_v37  ;;  %2787 = vrcp.f32 %v779_v34  ;;  %v836_v14 = vand.u32 2147483648, %v779_v34  ;;  %vm830_vm4 = vweird.f32 %v779_v34  ;;  %v834_v22 = vand.u32 2147483647, %v779_v34 }
 0x59f   :  { %v807_v20 = vor.u32 1.1754944e-38, %v806_v60  ;;  %vm805_vm5 = vcmp.eq.f32.partialorder %v804_v63, 8.507059e+37 }
 0x5a0   :  { %1043 = vmatpush.msra.mxu0 %v3253_v40  ;;  %1063 = vmatpush.msra.mxu1 %v3255_v41  ;;  %v837_v49 = vor.u32 1.1754944e-38, %v836_v14  ;;  %vm835_vm7 = vcmp.eq.f32.partialorder %v834_v22, 8.507059e+37 }
 0x5a3   :  { %v2786_v35 = vpop.eup %2785 }
 0x5a4   :  { %v796_v36 = vmul.f32 %v2786_v35, %v777_v32  ;;  %v2788_v9 = vpop.eup %2787  ;;  %vm801_vm14 = vweird.f32 %v2786_v35 }
 0x5a5   :  { %v826_v37 = vmul.f32 %v2788_v9, %v779_v34  ;;  %vm802_vm2 = vmor %vm800_vm15, %vm801_vm14  ;;  %vm831_vm3 = vweird.f32 %v2788_v9 }
 0x5a6   :  { %v797_v23 = vsub.f32 1.0, %v796_v36  ;;  %vm832_vm6 = vmor %vm830_vm4, %vm831_vm3 }
 0x5a7   :  { %v827_v40 = vsub.f32 1.0, %v826_v37 }
 0x5a8   :  { %v798_v47 = vmul.f32 %v2786_v35, %v797_v23 }
 0x5a9   :  { %v828_v41 = vmul.f32 %v2788_v9, %v827_v40 }
 0x5aa   :  { %v799_v39 = vadd.f32 %v2786_v35, %v798_v47 }
 0x5ab   :  { %v829_v3 = vadd.f32 %v2788_v9, %v828_v41 }
 0x5ac   :  { %v803_v56 = vsel %vm802_vm2, %v2786_v35, %v799_v39 }
 0x5ad   :  { %v808_v24 = vsel %vm805_vm5, %v807_v20, %v803_v56  ;;  %v833_v50 = vsel %vm832_vm6, %v2788_v9, %v829_v3 }
 0x5ae   :  { %v838_v15 = vsel %vm835_vm7, %v837_v49, %v833_v50 }
 0x5e0   :  { %v875_v19 = vpop.permute.xlu0 %874 }
 0x5e1   :  { %v880_v26 = vmul.f32 %v875_v19, %v808_v24  ;;  %v877_v7 = vpop.permute.xlu1 %876 }
 0x5e2   :  { %v881_v27 = vmul.f32 %v877_v7, %v838_v15 }
 0x5e3   :  { %v884_v53 = vrot.slane %v880_v26, 2 }
 0x5e4   :  { %v885_v28 = vrot.slane %v881_v27, 1 }
 0x5e6   :  { %v886_v57 = vsel %vm219_vm0, %v885_v28, %v884_v53 }
 0x5e7   :  { %2623 = vmatmul.msk.f32.vlgmr.msrb.gmra.mxu0 %vm221_vm1, %v886_v57  ;;  %2624 = vmatmul.msk.f32.vlgmr.msrb.gmra.mxu1 %vm221_vm1, %v886_v57 }
 0x5e8   :  { %1314 = vmatpush.msrb.mxu0 %v3298_v8  ;;  %1334 = vmatpush.msrb.mxu1 %v3300_v43  ;;  %v3557_v8 = vld [vmem:[#allocation4 + $0x100] sm:$0xff]  ;;  %v3560_v43 = vld [vmem:[#allocation4 + $0x108] sm:$0xff] }
 0x5ea   :  { %1315 = vmatpush.msrb.mxu0 %v3302_v11  ;;  %1335 = vmatpush.msrb.mxu1 %v3306_v44  ;;  %v3563_v11 = vld [vmem:[#allocation4 + $0xf0] sm:$0xff]  ;;  %v3566_v44 = vld [vmem:[#allocation4 + $0xf8] sm:$0xff] }
 0x5ec   :  { %1316 = vmatpush.msrb.mxu0 %v3308_v52  ;;  %1336 = vmatpush.msrb.mxu1 %v3310_v46  ;;  %v3569_v52 = vld [vmem:[#allocation4 + $0xe0] sm:$0xff]  ;;  %v3572_v46 = vld [vmem:[#allocation4 + $0xe8] sm:$0xff] }
 0x5ed   :  { %4085 = vst [vmem:[#allocation14_spill] sm:$0xff] %v3572_v46 }
 0x5ee   :  { %1317 = vmatpush.msrb.mxu0 %v3316_v48  ;;  %1337 = vmatpush.msrb.mxu1 %v3318_v51  ;;  %v3575_v48 = vld [vmem:[#allocation4 + $0xd0] sm:$0xff]  ;;  %v3578_v51 = vld [vmem:[#allocation4 + $0xd8] sm:$0xff] }
 0x5ef   :  { %2629 = vmatmul.msk.f32.vlgmr.msra.gmra.mxu0 %vm221_vm1, %v886_v57  ;;  %2630 = vmatmul.msk.f32.vlgmr.msra.gmra.mxu1 %vm221_vm1, %v886_v57  ;;  %4086 = vst [vmem:[#allocation16_spill] sm:$0xff] %v3575_v48 }
 0x5f0   :  { %1318 = vmatpush.msrb.mxu0 %v3324_v2  ;;  %1338 = vmatpush.msrb.mxu1 %v3326_v6  ;;  %4087 = vst [vmem:[#allocation15_spill] sm:$0xff] %v3578_v51  ;;  %v3581_v2 = vld [vmem:[#allocation4 + $0xc0] sm:$0xff]  ;;  %v3584_v6 = vld [vmem:[#allocation4 + $0xc8] sm:$0xff] }
 0x5f1   :  { %4088 = vst [vmem:[#allocation17_spill] sm:$0xff] %v3581_v2 }
 0x5f2   :  { %1319 = vmatpush.msrb.mxu0 %v3332_v10  ;;  %1339 = vmatpush.msrb.mxu1 %v3334_v4  ;;  %4089 = vst [vmem:[#allocation18_spill] sm:$0xff] %v3584_v6  ;;  %v3587_v10 = vld [vmem:[#allocation4 + $0xb0] sm:$0xff]  ;;  %v3590_v4 = vld [vmem:[#allocation4 + $0xb8] sm:$0xff] }
 0x5f3   :  { %4090 = vst [vmem:[#allocation19_spill] sm:$0xff] %v3587_v10 }
 0x5f4   :  { %1320 = vmatpush.msrb.mxu0 %v3340_v1  ;;  %1340 = vmatpush.msrb.mxu1 %v3342_v17  ;;  %4091 = vst [vmem:[#allocation20_spill] sm:$0xff] %v3590_v4  ;;  %v3593_v1 = vld [vmem:[#allocation4 + $0xa0] sm:$0xff]  ;;  %v3596_v17 = vld [vmem:[#allocation4 + $0xa8] sm:$0xff] }
 0x5f5   :  { %4092 = vst [vmem:[#allocation21_spill] sm:$0xff] %v3593_v1 }
 0x5f6   :  { %1321 = vmatpush.msrb.mxu0 %v3365_v5  ;;  %1341 = vmatpush.msrb.mxu1 %v3367_v33  ;;  %4093 = vst [vmem:[#allocation22_spill] sm:$0xff] %v3596_v17  ;;  %v3599_v5 = vld [vmem:[#allocation4 + $0x90] sm:$0xff]  ;;  %v3602_v33 = vld [vmem:[#allocation4 + $0x98] sm:$0xff] }
 0x5f7   :  { %4094 = vst [vmem:[#allocation23_spill] sm:$0xff] %v3599_v5 }
 0x5f8   :  { %1533 = vmatpush.msra.mxu0 %v3557_v8  ;;  %1553 = vmatpush.msra.mxu1 %v3560_v43  ;;  %4095 = vst [vmem:[#allocation24_spill] sm:$0xff] %v3602_v33 }
 0x5fa   :  { %1534 = vmatpush.msra.mxu0 %v3563_v11  ;;  %1554 = vmatpush.msra.mxu1 %v3566_v44 }
 0x5fc   :  { %1535 = vmatpush.msra.mxu0 %v3569_v52  ;;  %1555 = vmatpush.msra.mxu1 %v3572_v46 }
 0x5fe   :  { %1536 = vmatpush.msra.mxu0 %v3575_v48  ;;  %1556 = vmatpush.msra.mxu1 %v3578_v51 }
 0x600   :  { %1537 = vmatpush.msra.mxu0 %v3581_v2  ;;  %1557 = vmatpush.msra.mxu1 %v3584_v6 }
 0x602   :  { %1538 = vmatpush.msra.mxu0 %v3587_v10  ;;  %1558 = vmatpush.msra.mxu1 %v3590_v4 }
 0x604   :  { %1539 = vmatpush.msra.mxu0 %v3593_v1  ;;  %1559 = vmatpush.msra.mxu1 %v3596_v17 }
 0x606   :  { %1540 = vmatpush.msra.mxu0 %v3599_v5  ;;  %1560 = vmatpush.msra.mxu1 %v3602_v33 }
 0x60e   :  { %v707_v31 = vpop.f32.mrf.mxu1  ;;  %v687_v39 = vpop.f32.mrf.mxu0 }
 0x60f   :  { %v708_v32 = vadd.f32 %v707_v31, %v3266_v38  ;;  %v688_v63 = vadd.f32 %v687_v39, %v4079_v18 }
 0x664   :  { %v926_v30 = vpop.f32.mrf.mxu1  ;;  %v906_v60 = vpop.f32.mrf.mxu0 }
 0x665   :  { %v3606_v34 = vadd.f32 %v926_v30, %v708_v32  ;;  %v907_v3 = vadd.f32 %v906_v60, %v688_v63 }
 0x667   :  { %2789 = vtanh.f32 %v3606_v34  ;;  %v2625_v56 = vmul.f32 -1.442695, %v907_v3 }
 0x66c   :  { %v1065_v35 = vpop.f32.mrf.mxu1  ;;  %v1045_v22 = vpop.f32.mrf.mxu0 }
 0x66d   :  { %v2790_v36 = vpop.eup %2789  ;;  %v1071_v9 = vrot.slane %v1065_v35, 5  ;;  %v1073_v23 = vrot.slane %v1065_v35, 6  ;;  %v1070_v24 = vrot.slane %v1045_v22, 5  ;;  %v1072_v15 = vrot.slane %v1045_v22, 6 }
 0x66e   :  { %970 = vrot.lane.b32.xlu2 %v2790_v36, %s3117_s0 }
 0x66f   :  { %v3611_v37 = vadd.f32 %v1071_v9, %v3146_v21  ;;  %v3615_v40 = vadd.f32 %v1073_v23, %v4078_v62  ;;  %v1078_v26 = vadd.f32 %v1070_v24, %v4080_v42  ;;  %v1080_v53 = vadd.f32 %v1072_v15, %v4081_v25 }
 0x671   :  { %2791 = vtanh.f32 %v3611_v37  ;;  %v2631_v7 = vmul.f32 -1.442695, %v1078_v26  ;;  %v2633_v32 = vmul.f32 -1.442695, %v1080_v53 }
 0x672   :  { %2793 = vtanh.f32 %v3615_v40 }
 0x673   :  { %2795 = vpow2.f32 %v2625_v56 }
 0x677   :  { %v2792_v47 = vpop.eup %2791 }
 0x678   :  { %1170 = vrot.lane.b32.xlu0 %v2792_v47, %s3117_s0  ;;  %v2794_v41 = vpop.eup %2793 }
 0x679   :  { %1172 = vrot.lane.b32.xlu1 %v2794_v41, %s3117_s0  ;;  %v2796_v14 = vpop.eup %2795 }
 0x67a   :  { %v935_v20 = vadd.f32 1.0, %v2796_v14 }
 0x67c   :  { %2797 = vrcp.f32 %v935_v20  ;;  %v948_v57 = vand.u32 2147483648, %v935_v20  ;;  %vm942_vm9 = vweird.f32 %v935_v20  ;;  %v946_v31 = vand.u32 2147483647, %v935_v20 }
 0x67d   :  { %2799 = vpow2.f32 %v2631_v7 }
 0x67e   :  { %v949_v35 = vor.u32 1.1754944e-38, %v948_v57  ;;  %vm947_vm11 = vcmp.eq.f32.partialorder %v946_v31, 8.507059e+37  ;;  %2801 = vpow2.f32 %v2633_v32 }
 0x682   :  { %v2798_v19 = vpop.eup %2797 }
 0x683   :  { %v938_v50 = vmul.f32 %v2798_v19, %v935_v20  ;;  %vm943_vm8 = vweird.f32 %v2798_v19  ;;  %v2800_v36 = vpop.eup %2799 }
 0x684   :  { %vm944_vm10 = vmor %vm942_vm9, %vm943_vm8  ;;  %v1094_v41 = vadd.f32 1.0, %v2800_v36  ;;  %v2802_v39 = vpop.eup %2801 }
 0x685   :  { %v939_v49 = vsub.f32 1.0, %v938_v50  ;;  %v1096_v60 = vadd.f32 1.0, %v2802_v39 }
 0x686   :  { %2803 = vrcp.f32 %v1094_v41  ;;  %v1109_v50 = vand.u32 2147483648, %v1094_v41  ;;  %vm1103_vm13 = vweird.f32 %v1094_v41  ;;  %v1107_v26 = vand.u32 2147483647, %v1094_v41 }
 0x687   :  { %v940_v27 = vmul.f32 %v2798_v19, %v939_v49  ;;  %2805 = vrcp.f32 %v1096_v60  ;;  %v1139_v57 = vand.u32 2147483648, %v1096_v60  ;;  %vm1133_vm3 = vweird.f32 %v1096_v60 }
 0x688   :  { %v1110_v7 = vor.u32 1.1754944e-38, %v1109_v50  ;;  %vm1108_vm15 = vcmp.eq.f32.partialorder %v1107_v26, 8.507059e+37  ;;  %v1137_v32 = vand.u32 2147483647, %v1096_v60 }
 0x689   :  { %v941_v28 = vadd.f32 %v2798_v19, %v940_v27 }
 0x68a   :  { %vm1138_vm5 = vcmp.eq.f32.partialorder %v1137_v32, 8.507059e+37 }
 0x68b   :  { %v945_v30 = vsel %vm944_vm10, %v2798_v19, %v941_v28 }
 0x68c   :  { %v950_v23 = vsel %vm947_vm11, %v949_v35, %v945_v30  ;;  %v2804_v63 = vpop.eup %2803  ;;  %v1140_v35 = vor.u32 1.1754944e-38, %v1139_v57 }
 0x68d   :  { %v1099_v3 = vmul.f32 %v2804_v63, %v1094_v41  ;;  %v2806_v56 = vpop.eup %2805  ;;  %vm1104_vm12 = vweird.f32 %v2804_v63  ;;  %v968_v41 = vmul.f32 %v950_v23, %v3485_v59  ;;  %v1163_v59 = vrot.slane %v3495_v45, 7 }
 0x68e   :  { %v1129_v20 = vmul.f32 %v2806_v56, %v1096_v60  ;;  %vm1105_vm14 = vmor %vm1103_vm13, %vm1104_vm12  ;;  %vm1134_vm2 = vweird.f32 %v2806_v56  ;;  %v1162_v60 = vrot.slane %v3491_v29, 7 }
 0x68f   :  { %v1100_v14 = vsub.f32 1.0, %v1099_v3  ;;  %vm1135_vm4 = vmor %vm1133_vm3, %vm1134_vm2 }
 0x690   :  { %v1130_v22 = vsub.f32 1.0, %v1129_v20 }
 0x691   :  { %v1101_v19 = vmul.f32 %v2804_v63, %v1100_v14 }
 0x692   :  { %v1131_v49 = vmul.f32 %v2806_v56, %v1130_v22 }
 0x693   :  { %v1102_v24 = vadd.f32 %v2804_v63, %v1101_v19 }
 0x694   :  { %v1132_v27 = vadd.f32 %v2806_v56, %v1131_v49 }
 0x695   :  { %v1106_v15 = vsel %vm1105_vm14, %v2804_v63, %v1102_v24 }
 0x696   :  { %v1111_v28 = vsel %vm1108_vm15, %v1110_v7, %v1106_v15  ;;  %v1136_v30 = vsel %vm1135_vm4, %v2806_v56, %v1132_v27  ;;  %v2626_v56 = vmul.f32 -1.442695, %v3606_v34 }
 0x697   :  { %v1166_v14 = vmul.f32 %v1162_v60, %v1111_v28  ;;  %v3670_v60 = vld [vmem:[#allocation4 + $0x10] sm:$0xff] }
 0x6c8   :  { %v971_v9 = vpop.permute.xlu2 %970 }
 0x6c9   :  { %v973_v47 = vmul.f32 %v971_v9, %v950_v23  ;;  %v1141_v9 = vsel %vm1138_vm5, %v1140_v35, %v1136_v30 }
 0x6ca   :  { %v1167_v23 = vmul.f32 %v1163_v59, %v1141_v9 }
 0x6cb   :  { %975 = vrot.lane.b32.xlu2 %v973_v47, %s3117_s0 }
 0x6ea   :  { %v1171_v53 = vpop.permute.xlu0 %1170 }
 0x6eb   :  { %v1176_v31 = vmul.f32 %v1171_v53, %v1111_v28  ;;  %v1173_v36 = vpop.permute.xlu1 %1172 }
 0x6ec   :  { %v1177_v47 = vmul.f32 %v1173_v36, %v1141_v9  ;;  %v3652_v36 = vld [vmem:[#allocation4 + $0x40] sm:$0xff]  ;;  %v3655_v9 = vld [vmem:[#allocation4 + $0x48] sm:$0xff] }
 0x6ed   :  { %1180 = vrot.lane.b32.xlu0 %v1176_v31, %s3117_s0 }
 0x6ee   :  { %1182 = vrot.lane.b32.xlu1 %v1177_v47, %s3117_s0  ;;  %v3658_v47 = vld [vmem:[#allocation4 + $0x30] sm:$0xff] }
 0x725   :  { %v976_v39 = vpop.permute.xlu2 %975 }
 0x726   :  { %v3627_v63 = vadd.f32 %v976_v39, %v968_v41  ;;  %v3661_v41 = vld [vmem:[#allocation4 + $0x38] sm:$0xff]  ;;  %v3664_v39 = vld [vmem:[#allocation4 + $0x20] sm:$0xff] }
 0x728   :  { %2807 = vtanh.f32 %v3627_v63 }
 0x729   :  { %2809 = vpow2.f32 %v2626_v56  ;;  %v3673_v56 = vld [vmem:[#allocation4 + $0x18] sm:$0xff] }
 0x72e   :  { %v2808_v3 = vpop.eup %2807 }
 0x72f   :  { %981 = vrot.lane.b32.xlu2 %v2808_v3, %s3117_s0  ;;  %v2810_v22 = vpop.eup %2809  ;;  %v3667_v3 = vld [vmem:[#allocation4 + $0x28] sm:$0xff] }
 0x730   :  { %v936_v49 = vadd.f32 1.0, %v2810_v22 }
 0x732   :  { %v963_v53 = vand.u32 2147483648, %v936_v49  ;;  %vm957_vm7 = vweird.f32 %v936_v49  ;;  %v961_v28 = vand.u32 2147483647, %v936_v49 }
 0x734   :  { %v964_v31 = vor.u32 1.1754944e-38, %v963_v53  ;;  %vm962_vm9 = vcmp.eq.f32.partialorder %v961_v28, 8.507059e+37 }
 0x75f   :  { %v1181_v20 = vpop.permute.xlu0 %1180 }
 0x760   :  { %v3633_v19 = vadd.f32 %v1181_v20, %v1166_v14  ;;  %v1183_v24 = vpop.permute.xlu1 %1182  ;;  %v2632_v14 = vmul.f32 -1.442695, %v3611_v37  ;;  %v2634_v20 = vmul.f32 -1.442695, %v3615_v40 }
 0x761   :  { %v3637_v50 = vadd.f32 %v1183_v24, %v1167_v23 }
 0x762   :  { %2811 = vtanh.f32 %v3633_v19 }
 0x763   :  { %2813 = vtanh.f32 %v3637_v50 }
 0x764   :  { %2815 = vrcp.f32 %v936_v49 }
 0x765   :  { %2817 = vpow2.f32 %v2632_v14 }
 0x766   :  { %2819 = vpow2.f32 %v2634_v20 }
 0x768   :  { %v2812_v26 = vpop.eup %2811 }
 0x769   :  { %1192 = vrot.lane.b32.xlu0 %v2812_v26, %s3117_s0  ;;  %v2814_v29 = vpop.eup %2813 }
 0x76a   :  { %1194 = vrot.lane.b32.xlu1 %v2814_v29, %s3117_s0  ;;  %v2816_v34 = vpop.eup %2815 }
 0x76b   :  { %v953_v15 = vmul.f32 %v2816_v34, %v936_v49  ;;  %vm958_vm6 = vweird.f32 %v2816_v34  ;;  %v2818_v59 = vpop.eup %2817 }
 0x76c   :  { %vm959_vm8 = vmor %vm957_vm7, %vm958_vm6  ;;  %v1095_v23 = vadd.f32 1.0, %v2818_v59  ;;  %v2820_v22 = vpop.eup %2819 }
 0x76d   :  { %v954_v7 = vsub.f32 1.0, %v953_v15  ;;  %v1097_v24 = vadd.f32 1.0, %v2820_v22 }
 0x76e   :  { %2821 = vrcp.f32 %v1095_v23  ;;  %v1124_v37 = vand.u32 2147483648, %v1095_v23  ;;  %vm1118_vm11 = vweird.f32 %v1095_v23  ;;  %v1122_v40 = vand.u32 2147483647, %v1095_v23 }
 0x76f   :  { %v955_v27 = vmul.f32 %v2816_v34, %v954_v7  ;;  %2823 = vrcp.f32 %v1097_v24  ;;  %vm1148_vm14 = vweird.f32 %v1097_v24 }
 0x770   :  { %vm1123_vm15 = vcmp.eq.f32.partialorder %v1122_v40, 8.507059e+37  ;;  %v3699_v40 = vld [vmem:[#allocation4 + $0x150] sm:$0xff] }
 0x771   :  { %v956_v45 = vadd.f32 %v2816_v34, %v955_v27 }
 0x773   :  { %v960_v57 = vsel %vm959_vm8, %v2816_v34, %v956_v45 }
 0x774   :  { %v965_v32 = vsel %vm962_vm9, %v964_v31, %v960_v57  ;;  %v2822_v26 = vpop.eup %2821  ;;  %v1154_v31 = vand.u32 2147483648, %v1097_v24 }
 0x775   :  { %v1114_v49 = vmul.f32 %v2822_v26, %v1095_v23  ;;  %v2824_v29 = vpop.eup %2823  ;;  %vm1119_vm10 = vweird.f32 %v2822_v26 }
 0x776   :  { %v1144_v34 = vmul.f32 %v2824_v29, %v1097_v24  ;;  %vm1120_vm12 = vmor %vm1118_vm11, %vm1119_vm10  ;;  %vm1149_vm13 = vweird.f32 %v2824_v29  ;;  %v1155_v22 = vor.u32 1.1754944e-38, %v1154_v31  ;;  %v3710_v31 = vld [vmem:[#allocation4 + $0x148] sm:$0xff] }
 0x777   :  { %v1115_v15 = vsub.f32 1.0, %v1114_v49  ;;  %vm1150_vm2 = vmor %vm1148_vm14, %vm1149_vm13 }
 0x778   :  { %v1145_v7 = vsub.f32 1.0, %v1144_v34 }
 0x779   :  { %v1116_v27 = vmul.f32 %v2822_v26, %v1115_v15 }
 0x77a   :  { %v1146_v45 = vmul.f32 %v2824_v29, %v1145_v7 }
 0x77b   :  { %v1117_v53 = vadd.f32 %v2822_v26, %v1116_v27 }
 0x77c   :  { %v1147_v28 = vadd.f32 %v2824_v29, %v1146_v45  ;;  %v3690_v45 = vld [vmem:[#allocation4 + $0x178] sm:$0xff] }
 0x77d   :  { %v1121_v57 = vsel %vm1120_vm12, %v2822_v26, %v1117_v53  ;;  %v3681_v26 = vld [vmem:[#allocation4 + $0x180] sm:$0xff] }
 0x77e   :  { %v1151_v20 = vsel %vm1150_vm2, %v2824_v29, %v1147_v28  ;;  %v3687_v29 = vld [vmem:[#allocation4 + $0x170] sm:$0xff]  ;;  %v3693_v53 = vld [vmem:[#allocation4 + $0x160] sm:$0xff]  ;;  %v3702_v28 = vld [vmem:[#allocation4 + $0x158] sm:$0xff] }
 0x789   :  { %v982_v30 = vpop.permute.xlu2 %981 }
 0x78a   :  { %v984_v35 = vmul.f32 %v982_v30, %v965_v32  ;;  %v1125_v32 = vor.u32 1.1754944e-38, %v1124_v37  ;;  %v3696_v37 = vld [vmem:[#allocation4 + $0x168] sm:$0xff] }
 0x78c   :  { %2627 = vmatmul.msk.f32.vlgmr.msrb.gmra.mxu2 %vm221_vm1, %v984_v35  ;;  %2628 = vmatmul.msk.f32.vlgmr.msrb.gmra.mxu3 %vm221_vm1, %v984_v35  ;;  %v1152_v35 = vand.u32 2147483647, %v1097_v24  ;;  %v1126_v14 = vsel %vm1123_vm15, %v1125_v32, %v1121_v57  ;;  %v3684_v24 = vld [vmem:[#allocation4 + $0x188] sm:$0xff]  ;;  %v3707_v57 = vld [vmem:[#allocation4 + $0x140] sm:$0xff]  ;;  %v3713_v32 = vld [vmem:[#allocation4 + $0x130] sm:$0xff] }
 0x78d   :  { %1354 = vmatpush.msrb.mxu2 %v3502_v54  ;;  %1374 = vmatpush.msrb.mxu3 %v3505_v55 }
 0x78e   :  { %vm1153_vm3 = vcmp.eq.f32.partialorder %v1152_v35, 8.507059e+37  ;;  %v3719_v35 = vld [vmem:[#allocation4 + $0x120] sm:$0xff] }
 0x78f   :  { %1355 = vmatpush.msrb.mxu2 %v3508_v58  ;;  %1375 = vmatpush.msrb.mxu3 %v3511_v61  ;;  %v1156_v49 = vsel %vm1153_vm3, %v1155_v22, %v1151_v20  ;;  %v3725_v20 = vld [vmem:[#allocation4 + $0x110] sm:$0xff] }
 0x791   :  { %1356 = vmatpush.msrb.mxu2 %v3514_v0  ;;  %1376 = vmatpush.msrb.mxu3 %v3517_v12 }
 0x793   :  { %1357 = vmatpush.msrb.mxu2 %v3520_v13  ;;  %1377 = vmatpush.msrb.mxu3 %v3523_v16 }
 0x795   :  { %1358 = vmatpush.msrb.mxu2 %v3652_v36  ;;  %1378 = vmatpush.msrb.mxu3 %v3655_v9 }
 0x797   :  { %1359 = vmatpush.msrb.mxu2 %v3658_v47  ;;  %1379 = vmatpush.msrb.mxu3 %v3661_v41 }
 0x799   :  { %1360 = vmatpush.msrb.mxu2 %v3664_v39  ;;  %1380 = vmatpush.msrb.mxu3 %v3667_v3 }
 0x79b   :  { %1361 = vmatpush.msrb.mxu2 %v3670_v60  ;;  %1381 = vmatpush.msrb.mxu3 %v3673_v56 }
 0x7db   :  { %v1193_v30 = vpop.permute.xlu0 %1192 }
 0x7dc   :  { %v1198_v59 = vmul.f32 %v1193_v30, %v1126_v14  ;;  %v1195_v34 = vpop.permute.xlu1 %1194  ;;  %v3716_v30 = vld [vmem:[#allocation4 + $0x138] sm:$0xff]  ;;  %v3722_v14 = vld [vmem:[#allocation4 + $0x128] sm:$0xff] }
 0x7dd   :  { %v1199_v15 = vmul.f32 %v1195_v34, %v1156_v49 }
 0x7de   :  { %v1202_v23 = vrot.slane %v1198_v59, 3  ;;  %v3728_v59 = vld [vmem:[#allocation4 + $0x118] sm:$0xff] }
 0x7df   :  { %v1203_v7 = vrot.slane %v1199_v15, 2 }
 0x7e1   :  { %v1204_v27 = vsel %vm219_vm0, %v1203_v7, %v1202_v23 }
 0x7e2   :  { %2635 = vmatmul.msk.f32.vlgmr.msra.gmra.mxu2 %vm221_vm1, %v1204_v27  ;;  %2636 = vmatmul.msk.f32.vlgmr.msra.gmra.mxu3 %vm221_vm1, %v1204_v27 }
 0x7e3   :  { %1632 = vmatpush.msra.mxu2 %v3681_v26  ;;  %1652 = vmatpush.msra.mxu3 %v3684_v24 }
 0x7e5   :  { %1633 = vmatpush.msra.mxu2 %v3687_v29  ;;  %1653 = vmatpush.msra.mxu3 %v3690_v45 }
 0x7e7   :  { %1634 = vmatpush.msra.mxu2 %v3693_v53  ;;  %1654 = vmatpush.msra.mxu3 %v3696_v37 }
 0x7e9   :  { %1635 = vmatpush.msra.mxu2 %v3699_v40  ;;  %1655 = vmatpush.msra.mxu3 %v3702_v28 }
 0x7ea   :  { %2641 = vmatmul.msk.f32.vlgmr.msrb.gmra.mxu2 %vm221_vm1, %v1204_v27  ;;  %2642 = vmatmul.msk.f32.vlgmr.msrb.gmra.mxu3 %vm221_vm1, %v1204_v27 }
 0x7eb   :  { %1636 = vmatpush.msra.mxu2 %v3707_v57  ;;  %1656 = vmatpush.msra.mxu3 %v3710_v31 }
 0x7ed   :  { %1637 = vmatpush.msra.mxu2 %v3713_v32  ;;  %1657 = vmatpush.msra.mxu3 %v3716_v30 }
 0x7ef   :  { %1638 = vmatpush.msra.mxu2 %v3719_v35  ;;  %1658 = vmatpush.msra.mxu3 %v3722_v14 }
 0x7f1   :  { %1639 = vmatpush.msra.mxu2 %v3725_v20  ;;  %1659 = vmatpush.msra.mxu3 %v3728_v59 }
 0x7f3   :  { %1851 = vmatpush.msrb.mxu2 %v3557_v8  ;;  %1871 = vmatpush.msrb.mxu3 %v3560_v43 }
 0x7f5   :  { %1852 = vmatpush.msrb.mxu2 %v3563_v11  ;;  %1872 = vmatpush.msrb.mxu3 %v3566_v44 }
 0x7f7   :  { %1853 = vmatpush.msrb.mxu2 %v3569_v52  ;;  %1873 = vmatpush.msrb.mxu3 %v3572_v46 }
 0x7f9   :  { %1854 = vmatpush.msrb.mxu2 %v3575_v48  ;;  %1874 = vmatpush.msrb.mxu3 %v3578_v51 }
 0x7fb   :  { %1855 = vmatpush.msrb.mxu2 %v3581_v2  ;;  %1875 = vmatpush.msrb.mxu3 %v3584_v6 }
 0x7fd   :  { %1856 = vmatpush.msrb.mxu2 %v3587_v10  ;;  %1876 = vmatpush.msrb.mxu3 %v3590_v4 }
 0x7ff   :  { %1857 = vmatpush.msrb.mxu2 %v3593_v1  ;;  %1877 = vmatpush.msrb.mxu3 %v3596_v17 }
 0x801   :  { %1858 = vmatpush.msrb.mxu2 %v3599_v5  ;;  %1878 = vmatpush.msrb.mxu3 %v3602_v33 }
 0x80f   :  { %v1025_v22 = vpop.f32.mrf.mxu3 }
 0x810   :  { %v1026_v49 = vadd.f32 %v1025_v22, %v3266_v38 }
 0x865   :  { %v1244_v34 = vpop.f32.mrf.mxu3 }
 0x866   :  { %v3748_v15 = vadd.f32 %v1244_v34, %v1026_v49  ;;  %v1005_v34 = vpop.f32.mrf.mxu2 }
 0x868   :  { %2825 = vtanh.f32 %v3748_v15 }
 0x86d   :  { %v1383_v23 = vpop.f32.mrf.mxu3 }
 0x86e   :  { %v2826_v7 = vpop.eup %2825  ;;  %v1389_v27 = vrot.slane %v1383_v23, 4  ;;  %v1391_v17 = vrot.slane %v1383_v23, 5  ;;  %v1224_v38 = vpop.f32.mrf.mxu2 }
 0x86f   :  { %1288 = vrot.lane.b32.xlu2 %v2826_v7, %s3117_s0  ;;  %v1006_v7 = vadd.f32 %v1005_v34, %v4079_v18 }
 0x870   :  { %v3753_v1 = vadd.f32 %v1389_v27, %v3146_v21  ;;  %v3757_v33 = vadd.f32 %v1391_v17, %v4078_v62 }
 0x871   :  { %v1225_v27 = vadd.f32 %v1224_v38, %v1006_v7 }
 0x872   :  { %2827 = vtanh.f32 %v3753_v1 }
 0x873   :  { %2829 = vtanh.f32 %v3757_v33  ;;  %v2637_v21 = vmul.f32 -1.442695, %v1225_v27 }
 0x875   :  { %2831 = vpow2.f32 %v2637_v21 }
 0x876   :  { %v1363_v62 = vpop.f32.mrf.mxu2 }
 0x877   :  { %v1388_v4 = vrot.slane %v1363_v62, 4  ;;  %v1390_v2 = vrot.slane %v1363_v62, 5 }
 0x878   :  { %v2828_v22 = vpop.eup %2827 }
 0x879   :  { %1488 = vrot.lane.b32.xlu0 %v2828_v22, %s3117_s0  ;;  %v2830_v49 = vpop.eup %2829  ;;  %v1396_v6 = vadd.f32 %v1388_v4, %v4080_v42  ;;  %v1398_v48 = vadd.f32 %v1390_v2, %v4081_v25 }
 0x87a   :  { %1490 = vrot.lane.b32.xlu1 %v2830_v49, %s3117_s0 }
 0x87b   :  { %v2832_v23 = vpop.eup %2831  ;;  %v2643_v51 = vmul.f32 -1.442695, %v1396_v6  ;;  %v2645_v7 = vmul.f32 -1.442695, %v1398_v48 }
 0x87c   :  { %v1253_v5 = vadd.f32 1.0, %v2832_v23 }
 0x87e   :  { %2833 = vrcp.f32 %v1253_v5  ;;  %v1266_v38 = vand.u32 2147483648, %v1253_v5  ;;  %vm1260_vm5 = vweird.f32 %v1253_v5  ;;  %v1264_v21 = vand.u32 2147483647, %v1253_v5 }
 0x87f   :  { %2835 = vpow2.f32 %v2643_v51 }
 0x880   :  { %v1267_v23 = vor.u32 1.1754944e-38, %v1266_v38  ;;  %vm1265_vm7 = vcmp.eq.f32.partialorder %v1264_v21, 8.507059e+37  ;;  %2837 = vpow2.f32 %v2645_v7 }
 0x884   :  { %v2834_v17 = vpop.eup %2833 }
 0x885   :  { %v1256_v10 = vmul.f32 %v2834_v17, %v1253_v5  ;;  %vm1261_vm4 = vweird.f32 %v2834_v17  ;;  %v2836_v18 = vpop.eup %2835 }
 0x886   :  { %vm1262_vm6 = vmor %vm1260_vm5, %vm1261_vm4  ;;  %v1412_v6 = vadd.f32 1.0, %v2836_v18  ;;  %v2838_v2 = vpop.eup %2837 }
 0x887   :  { %v1257_v22 = vsub.f32 1.0, %v1256_v10  ;;  %v1414_v51 = vadd.f32 1.0, %v2838_v2 }
 0x888   :  { %2839 = vrcp.f32 %v1412_v6  ;;  %v1427_v21 = vand.u32 2147483648, %v1412_v6  ;;  %vm1421_vm9 = vweird.f32 %v1412_v6  ;;  %v1425_v7 = vand.u32 2147483647, %v1412_v6 }
 0x889   :  { %v1258_v49 = vmul.f32 %v2834_v17, %v1257_v22  ;;  %2841 = vrcp.f32 %v1414_v51  ;;  %v1457_v42 = vand.u32 2147483648, %v1414_v51  ;;  %vm1451_vm13 = vweird.f32 %v1414_v51 }
 0x88a   :  { %vm1426_vm11 = vcmp.eq.f32.partialorder %v1425_v7, 8.507059e+37 }
 0x88b   :  { %v1259_v34 = vadd.f32 %v2834_v17, %v1258_v49 }
 0x88d   :  { %v1263_v27 = vsel %vm1262_vm6, %v2834_v17, %v1259_v34 }
 0x88e   :  { %v1268_v10 = vsel %vm1265_vm7, %v1267_v23, %v1263_v27  ;;  %v2840_v22 = vpop.eup %2839  ;;  %v1428_v23 = vor.u32 1.1754944e-38, %v1427_v21 }
 0x88f   :  { %v1417_v49 = vmul.f32 %v2840_v22, %v1412_v6  ;;  %v2842_v5 = vpop.eup %2841  ;;  %vm1422_vm8 = vweird.f32 %v2840_v22 }
 0x890   :  { %v1447_v25 = vmul.f32 %v2842_v5, %v1414_v51  ;;  %vm1423_vm10 = vmor %vm1421_vm9, %vm1422_vm8  ;;  %vm1452_vm12 = vweird.f32 %v2842_v5 }
 0x891   :  { %v1418_v48 = vsub.f32 1.0, %v1417_v49  ;;  %v1455_v49 = vand.u32 2147483647, %v1414_v51  ;;  %vm1453_vm14 = vmor %vm1451_vm13, %vm1452_vm12 }
 0x892   :  { %v1448_v34 = vsub.f32 1.0, %v1447_v25 }
 0x893   :  { %v1419_v17 = vmul.f32 %v2840_v22, %v1418_v48  ;;  %v1458_v48 = vor.u32 1.1754944e-38, %v1457_v42  ;;  %vm1456_vm15 = vcmp.eq.f32.partialorder %v1455_v49, 8.507059e+37  ;;  %v2638_v42 = vmul.f32 -1.442695, %v3748_v15 }
 0x894   :  { %v1449_v27 = vmul.f32 %v2842_v5, %v1448_v34 }
 0x895   :  { %v1420_v38 = vadd.f32 %v2840_v22, %v1419_v17 }
 0x897   :  { %v1424_v18 = vsel %vm1423_vm10, %v2840_v22, %v1420_v38  ;;  %v1286_v22 = vmul.f32 %v1268_v10, %v3627_v63  ;;  %v1481_v63 = vrot.slane %v3637_v50, 7 }
 0x898   :  { %v1429_v2 = vsel %vm1426_vm11, %v1428_v23, %v1424_v18 }
 0x8c9   :  { %v1289_v4 = vpop.permute.xlu2 %1288 }
 0x8ca   :  { %v1291_v62 = vmul.f32 %v1289_v4, %v1268_v10  ;;  %v1450_v4 = vadd.f32 %v2842_v5, %v1449_v27 }
 0x8cc   :  { %1293 = vrot.lane.b32.xlu2 %v1291_v62, %s3117_s0  ;;  %v1454_v25 = vsel %vm1453_vm14, %v2842_v5, %v1450_v4 }
 0x8cd   :  { %v1459_v17 = vsel %vm1456_vm15, %v1458_v48, %v1454_v25 }
 0x8ce   :  { %v1485_v10 = vmul.f32 %v1481_v63, %v1459_v17 }
 0x8eb   :  { %v1489_v62 = vpop.permute.xlu0 %1488 }
 0x8ec   :  { %v1494_v46 = vmul.f32 %v1489_v62, %v1429_v2  ;;  %v1491_v6 = vpop.permute.xlu1 %1490 }
 0x8ed   :  { %v1495_v34 = vmul.f32 %v1491_v6, %v1459_v17 }
 0x8ee   :  { %1498 = vrot.lane.b32.xlu0 %v1494_v46, %s3117_s0  ;;  %v1480_v46 = vrot.slane %v3633_v19, 7 }
 0x8ef   :  { %1500 = vrot.lane.b32.xlu1 %v1495_v34, %s3117_s0 }
 0x8f0   :  { %v1484_v51 = vmul.f32 %v1480_v46, %v1429_v2 }
 0x926   :  { %v1294_v38 = vpop.permute.xlu2 %1293 }
 0x927   :  { %v3769_v21 = vadd.f32 %v1294_v38, %v1286_v22 }
 0x929   :  { %2843 = vtanh.f32 %v3769_v21 }
 0x92a   :  { %2845 = vpow2.f32 %v2638_v42 }
 0x92f   :  { %v2844_v7 = vpop.eup %2843 }
 0x930   :  { %1299 = vrot.lane.b32.xlu2 %v2844_v7, %s3117_s0  ;;  %v2846_v18 = vpop.eup %2845 }
 0x931   :  { %v1254_v49 = vadd.f32 1.0, %v2846_v18 }
 0x933   :  { %v1281_v6 = vand.u32 2147483648, %v1254_v49  ;;  %vm1275_vm3 = vweird.f32 %v1254_v49  ;;  %v1279_v17 = vand.u32 2147483647, %v1254_v49 }
 0x935   :  { %v1282_v22 = vor.u32 1.1754944e-38, %v1281_v6  ;;  %vm1280_vm5 = vcmp.eq.f32.partialorder %v1279_v17, 8.507059e+37 }
 0x960   :  { %v1499_v5 = vpop.permute.xlu0 %1498 }
 0x961   :  { %v3775_v27 = vadd.f32 %v1499_v5, %v1484_v51  ;;  %v1501_v23 = vpop.permute.xlu1 %1500 }
 0x962   :  { %v3779_v4 = vadd.f32 %v1501_v23, %v1485_v10 }
 0x963   :  { %2847 = vtanh.f32 %v3775_v27 }
 0x964   :  { %2849 = vtanh.f32 %v3779_v4 }
 0x965   :  { %2851 = vrcp.f32 %v1254_v49 }
 0x969   :  { %v2848_v62 = vpop.eup %2847 }
 0x96a   :  { %1510 = vrot.lane.b32.xlu0 %v2848_v62, %s3117_s0  ;;  %v2850_v19 = vpop.eup %2849 }
 0x96b   :  { %1512 = vrot.lane.b32.xlu1 %v2850_v19, %s3117_s0  ;;  %v2852_v15 = vpop.eup %2851 }
 0x96c   :  { %v1271_v2 = vmul.f32 %v2852_v15, %v1254_v49  ;;  %vm1276_vm2 = vweird.f32 %v2852_v15 }
 0x96d   :  { %vm1277_vm4 = vmor %vm1275_vm3, %vm1276_vm2 }
 0x96e   :  { %v1272_v25 = vsub.f32 1.0, %v1271_v2 }
 0x970   :  { %v1273_v48 = vmul.f32 %v2852_v15, %v1272_v25 }
 0x972   :  { %v1274_v50 = vadd.f32 %v2852_v15, %v1273_v48 }
 0x974   :  { %v1278_v34 = vsel %vm1277_vm4, %v2852_v15, %v1274_v50 }
 0x975   :  { %v1283_v38 = vsel %vm1280_vm5, %v1282_v22, %v1278_v34 }
 0x98a   :  { %v1300_v7 = vpop.permute.xlu2 %1299 }
 0x98b   :  { %v1302_v46 = vmul.f32 %v1300_v7, %v1283_v38 }
 0x98d   :  { %2639 = vmatmul.msk.f32.vlgmr.msrb.gmra.mxu0 %vm221_vm1, %v1302_v46  ;;  %2640 = vmatmul.msk.f32.vlgmr.msrb.gmra.mxu1 %vm221_vm1, %v1302_v46 }
 0x98e   :  { %1672 = vmatpush.msrb.mxu0 %v3502_v54  ;;  %1692 = vmatpush.msrb.mxu1 %v3505_v55  ;;  %v2644_v54 = vmul.f32 -1.442695, %v3753_v1  ;;  %v2646_v55 = vmul.f32 -1.442695, %v3757_v33 }
 0x990   :  { %1673 = vmatpush.msrb.mxu0 %v3508_v58  ;;  %1693 = vmatpush.msrb.mxu1 %v3511_v61  ;;  %2853 = vpow2.f32 %v2644_v54 }
 0x991   :  { %2855 = vpow2.f32 %v2646_v55  ;;  %v4096_v55 = vld [vmem:[#allocation14_spill] sm:$0xff] }
 0x992   :  { %1674 = vmatpush.msrb.mxu0 %v3514_v0  ;;  %1694 = vmatpush.msrb.mxu1 %v3517_v12 }
 0x994   :  { %1675 = vmatpush.msrb.mxu0 %v3520_v13  ;;  %1695 = vmatpush.msrb.mxu1 %v3523_v16 }
 0x996   :  { %1676 = vmatpush.msrb.mxu0 %v3652_v36  ;;  %1696 = vmatpush.msrb.mxu1 %v3655_v9  ;;  %v2854_v58 = vpop.eup %2853 }
 0x997   :  { %v1413_v61 = vadd.f32 1.0, %v2854_v58  ;;  %v2856_v0 = vpop.eup %2855  ;;  %v4097_v58 = vld [vmem:[#allocation16_spill] sm:$0xff] }
 0x998   :  { %1677 = vmatpush.msrb.mxu0 %v3658_v47  ;;  %1697 = vmatpush.msrb.mxu1 %v3661_v41  ;;  %v1415_v12 = vadd.f32 1.0, %v2856_v0  ;;  %v4099_v0 = vld [vmem:[#allocation17_spill] sm:$0xff] }
 0x999   :  { %2857 = vrcp.f32 %v1413_v61  ;;  %v1442_v1 = vand.u32 2147483648, %v1413_v61  ;;  %vm1436_vm7 = vweird.f32 %v1413_v61  ;;  %v1440_v33 = vand.u32 2147483647, %v1413_v61 }
 0x99a   :  { %1678 = vmatpush.msrb.mxu0 %v3664_v39  ;;  %1698 = vmatpush.msrb.mxu1 %v3667_v3  ;;  %2859 = vrcp.f32 %v1415_v12  ;;  %v1472_v19 = vand.u32 2147483648, %v1415_v12  ;;  %vm1466_vm10 = vweird.f32 %v1415_v12  ;;  %v1470_v25 = vand.u32 2147483647, %v1415_v12 }
 0x99b   :  { %v1443_v15 = vor.u32 1.1754944e-38, %v1442_v1  ;;  %vm1441_vm11 = vcmp.eq.f32.partialorder %v1440_v33, 8.507059e+37  ;;  %v4108_v1 = vld [vmem:[#allocation11_spill] sm:$0xff] }
 0x99c   :  { %1679 = vmatpush.msrb.mxu0 %v3670_v60  ;;  %1699 = vmatpush.msrb.mxu1 %v3673_v56  ;;  %v1473_v17 = vor.u32 1.1754944e-38, %v1472_v19  ;;  %vm1471_vm13 = vcmp.eq.f32.partialorder %v1470_v25, 8.507059e+37 }
 0x99f   :  { %v2858_v13 = vpop.eup %2857 }
 0x9a0   :  { %v1432_v16 = vmul.f32 %v2858_v13, %v1413_v61  ;;  %v2860_v42 = vpop.eup %2859  ;;  %vm1437_vm6 = vweird.f32 %v2858_v13  ;;  %v4098_v61 = vld [vmem:[#allocation15_spill] sm:$0xff] }
 0x9a1   :  { %v1462_v51 = vmul.f32 %v2860_v42, %v1415_v12  ;;  %vm1438_vm8 = vmor %vm1436_vm7, %vm1437_vm6  ;;  %vm1467_vm9 = vweird.f32 %v2860_v42  ;;  %v4100_v12 = vld [vmem:[#allocation18_spill] sm:$0xff] }
 0x9a2   :  { %v1433_v5 = vsub.f32 1.0, %v1432_v16  ;;  %vm1468_vm12 = vmor %vm1466_vm10, %vm1467_vm9 }
 0x9a3   :  { %v1463_v63 = vsub.f32 1.0, %v1462_v51 }
 0x9a4   :  { %v1434_v10 = vmul.f32 %v2858_v13, %v1433_v5 }
 0x9a5   :  { %v1464_v18 = vmul.f32 %v2860_v42, %v1463_v63 }
 0x9a6   :  { %v1435_v23 = vadd.f32 %v2858_v13, %v1434_v10 }
 0x9a7   :  { %v1465_v62 = vadd.f32 %v2860_v42, %v1464_v18 }
 0x9a8   :  { %v1439_v49 = vsel %vm1438_vm8, %v2858_v13, %v1435_v23  ;;  %v4101_v13 = vld [vmem:[#allocation19_spill] sm:$0xff] }
 0x9a9   :  { %v1444_v48 = vsel %vm1441_vm11, %v1443_v15, %v1439_v49  ;;  %v1469_v50 = vsel %vm1468_vm12, %v2860_v42, %v1465_v62  ;;  %v4107_v42 = vld [vmem:[#allocation12_spill] sm:$0xff]  ;;  %v4109_v49 = vld [vmem:[#allocation9_spill] sm:$0xff] }
 0x9aa   :  { %v1474_v34 = vsel %vm1471_vm13, %v1473_v17, %v1469_v50  ;;  %v4110_v50 = vld [vmem:[#allocation13_spill] sm:$0xff] }
 0x9dc   :  { %v1511_v2 = vpop.permute.xlu0 %1510 }
 0x9dd   :  { %v1516_v6 = vmul.f32 %v1511_v2, %v1444_v48  ;;  %v1513_v22 = vpop.permute.xlu1 %1512 }
 0x9de   :  { %v1517_v38 = vmul.f32 %v1513_v22, %v1474_v34 }
 0x9df   :  { %v1520_v7 = vrot.slane %v1516_v6, 4 }
 0x9e0   :  { %v1521_v46 = vrot.slane %v1517_v38, 3 }
 0x9e2   :  { %v1522_v54 = vsel %vm219_vm0, %v1521_v46, %v1520_v7 }
 0x9e3   :  { %2647 = vmatmul.msk.f32.vlgmr.msra.gmra.mxu0 %vm221_vm1, %v1522_v54  ;;  %2648 = vmatmul.msk.f32.vlgmr.msra.gmra.mxu1 %vm221_vm1, %v1522_v54 }
 0x9e4   :  { %1950 = vmatpush.msra.mxu0 %v3681_v26  ;;  %1970 = vmatpush.msra.mxu1 %v3684_v24 }
 0x9e6   :  { %1951 = vmatpush.msra.mxu0 %v3687_v29  ;;  %1971 = vmatpush.msra.mxu1 %v3690_v45 }
 0x9e8   :  { %1952 = vmatpush.msra.mxu0 %v3693_v53  ;;  %1972 = vmatpush.msra.mxu1 %v3696_v37 }
 0x9ea   :  { %1953 = vmatpush.msra.mxu0 %v3699_v40  ;;  %1973 = vmatpush.msra.mxu1 %v3702_v28 }
 0x9eb   :  { %2653 = vmatmul.msk.f32.vlgmr.msrb.gmra.mxu0 %vm221_vm1, %v1522_v54  ;;  %2654 = vmatmul.msk.f32.vlgmr.msrb.gmra.mxu1 %vm221_vm1, %v1522_v54 }
 0x9ec   :  { %1954 = vmatpush.msra.mxu0 %v3707_v57  ;;  %1974 = vmatpush.msra.mxu1 %v3710_v31 }
 0x9ee   :  { %1955 = vmatpush.msra.mxu0 %v3713_v32  ;;  %1975 = vmatpush.msra.mxu1 %v3716_v30 }
 0x9f0   :  { %1956 = vmatpush.msra.mxu0 %v3719_v35  ;;  %1976 = vmatpush.msra.mxu1 %v3722_v14 }
 0x9f2   :  { %1957 = vmatpush.msra.mxu0 %v3725_v20  ;;  %1977 = vmatpush.msra.mxu1 %v3728_v59 }
 0x9f4   :  { %2169 = vmatpush.msrb.mxu0 %v3557_v8  ;;  %2189 = vmatpush.msrb.mxu1 %v3560_v43  ;;  %v4102_v8 = vld [vmem:[#allocation20_spill] sm:$0xff]  ;;  %v4103_v43 = vld [vmem:[#allocation21_spill] sm:$0xff] }
 0x9f6   :  { %2170 = vmatpush.msrb.mxu0 %v3563_v11  ;;  %2190 = vmatpush.msrb.mxu1 %v3566_v44  ;;  %v4104_v11 = vld [vmem:[#allocation22_spill] sm:$0xff]  ;;  %v4105_v44 = vld [vmem:[#allocation23_spill] sm:$0xff] }
 0x9f8   :  { %2171 = vmatpush.msrb.mxu0 %v3569_v52  ;;  %2191 = vmatpush.msrb.mxu1 %v4096_v55  ;;  %v4106_v52 = vld [vmem:[#allocation24_spill] sm:$0xff] }
 0x9fa   :  { %2172 = vmatpush.msrb.mxu0 %v4097_v58  ;;  %2192 = vmatpush.msrb.mxu1 %v4098_v61  ;;  %v4111_v58 = vld [vmem:[#allocation10_spill] sm:$0xff] }
 0x9fc   :  { %2173 = vmatpush.msrb.mxu0 %v4099_v0  ;;  %2193 = vmatpush.msrb.mxu1 %v4100_v12 }
 0x9fe   :  { %2174 = vmatpush.msrb.mxu0 %v4101_v13  ;;  %2194 = vmatpush.msrb.mxu1 %v4102_v8 }
 0xa00   :  { %2175 = vmatpush.msrb.mxu0 %v4103_v43  ;;  %2195 = vmatpush.msrb.mxu1 %v4104_v11  ;;  %v4112_v43 = vld [vmem:[#allocation8_spill] sm:$0xff] }
 0xa02   :  { %2176 = vmatpush.msrb.mxu0 %v4105_v44  ;;  %2196 = vmatpush.msrb.mxu1 %v4106_v52 }
 0xa0a   :  { %v1343_v16 = vpop.f32.mrf.mxu1  ;;  %v1323_v25 = vpop.f32.mrf.mxu0 }
 0xa0b   :  { %v1344_v51 = vadd.f32 %v1343_v16, %v4107_v42  ;;  %v1324_v6 = vadd.f32 %v1323_v25, %v4110_v50 }
 0xa60   :  { %v1562_v5 = vpop.f32.mrf.mxu1  ;;  %v1542_v48 = vpop.f32.mrf.mxu0 }
 0xa61   :  { %v3842_v63 = vadd.f32 %v1562_v5, %v1344_v51  ;;  %v1543_v17 = vadd.f32 %v1542_v48, %v1324_v6 }
 0xa63   :  { %2861 = vtanh.f32 %v3842_v63  ;;  %v2649_v34 = vmul.f32 -1.442695, %v1543_v17 }
 0xa68   :  { %v1701_v10 = vpop.f32.mrf.mxu1  ;;  %v1681_v46 = vpop.f32.mrf.mxu0 }
 0xa69   :  { %v2862_v18 = vpop.eup %2861  ;;  %v1707_v23 = vrot.slane %v1701_v10, 3  ;;  %v1709_v62 = vrot.slane %v1701_v10, 4  ;;  %v1706_v54 = vrot.slane %v1681_v46, 3  ;;  %v1708_v12 = vrot.slane %v1681_v46, 4 }
 0xa6a   :  { %1606 = vrot.lane.b32.xlu2 %v2862_v18, %s3117_s0 }
 0xa6b   :  { %v3847_v33 = vadd.f32 %v1707_v23, %v4108_v1  ;;  %v3851_v19 = vadd.f32 %v1709_v62, %v4109_v49  ;;  %v1714_v61 = vadd.f32 %v1706_v54, %v4111_v58  ;;  %v1716_v11 = vadd.f32 %v1708_v12, %v4112_v43 }
 0xa6d   :  { %2863 = vtanh.f32 %v3847_v33  ;;  %v2655_v13 = vmul.f32 -1.442695, %v1714_v61  ;;  %v2657_v51 = vmul.f32 -1.442695, %v1716_v11 }
 0xa6e   :  { %2865 = vtanh.f32 %v3851_v19 }
 0xa6f   :  { %2867 = vpow2.f32 %v2649_v34 }
 0xa73   :  { %v2864_v15 = vpop.eup %2863 }
 0xa74   :  { %1806 = vrot.lane.b32.xlu0 %v2864_v15, %s3117_s0  ;;  %v2866_v2 = vpop.eup %2865 }
 0xa75   :  { %1808 = vrot.lane.b32.xlu1 %v2866_v2, %s3117_s0  ;;  %v2868_v22 = vpop.eup %2867 }
 0xa76   :  { %v1571_v38 = vadd.f32 1.0, %v2868_v22 }
 0xa78   :  { %2869 = vrcp.f32 %v1571_v38  ;;  %v1584_v52 = vand.u32 2147483648, %v1571_v38  ;;  %vm1578_vm15 = vweird.f32 %v1571_v38  ;;  %v1582_v16 = vand.u32 2147483647, %v1571_v38 }
 0xa79   :  { %2871 = vpow2.f32 %v2655_v13 }
 0xa7a   :  { %v1585_v10 = vor.u32 1.1754944e-38, %v1584_v52  ;;  %vm1583_vm3 = vcmp.eq.f32.partialorder %v1582_v16, 8.507059e+37  ;;  %2873 = vpow2.f32 %v2657_v51 }
 0xa7e   :  { %v2870_v7 = vpop.eup %2869 }
 0xa7f   :  { %v1574_v55 = vmul.f32 %v2870_v7, %v1571_v38  ;;  %vm1579_vm14 = vweird.f32 %v2870_v7  ;;  %v2872_v18 = vpop.eup %2871 }
 0xa80   :  { %vm1580_vm2 = vmor %vm1578_vm15, %vm1579_vm14  ;;  %v1730_v2 = vadd.f32 1.0, %v2872_v18  ;;  %v2874_v25 = vpop.eup %2873 }
 0xa81   :  { %v1575_v0 = vsub.f32 1.0, %v1574_v55  ;;  %v1732_v48 = vadd.f32 1.0, %v2874_v25 }
 0xa82   :  { %2875 = vrcp.f32 %v1730_v2  ;;  %v1745_v55 = vand.u32 2147483648, %v1730_v2  ;;  %vm1739_vm5 = vweird.f32 %v1730_v2  ;;  %v1743_v61 = vand.u32 2147483647, %v1730_v2 }
 0xa83   :  { %v1576_v8 = vmul.f32 %v2870_v7, %v1575_v0  ;;  %2877 = vrcp.f32 %v1732_v48  ;;  %v1775_v52 = vand.u32 2147483648, %v1732_v48  ;;  %vm1769_vm9 = vweird.f32 %v1732_v48 }
 0xa84   :  { %v1746_v13 = vor.u32 1.1754944e-38, %v1745_v55  ;;  %vm1744_vm7 = vcmp.eq.f32.partialorder %v1743_v61, 8.507059e+37  ;;  %v1773_v51 = vand.u32 2147483647, %v1732_v48 }
 0xa85   :  { %v1577_v44 = vadd.f32 %v2870_v7, %v1576_v8 }
 0xa86   :  { %vm1774_vm11 = vcmp.eq.f32.partialorder %v1773_v51, 8.507059e+37 }
 0xa87   :  { %v1581_v5 = vsel %vm1580_vm2, %v2870_v7, %v1577_v44 }
 0xa88   :  { %v1586_v62 = vsel %vm1583_vm3, %v1585_v10, %v1581_v5  ;;  %v2876_v6 = vpop.eup %2875  ;;  %v1776_v10 = vor.u32 1.1754944e-38, %v1775_v52 }
 0xa89   :  { %v1735_v17 = vmul.f32 %v2876_v6, %v1730_v2  ;;  %v2878_v34 = vpop.eup %2877  ;;  %vm1740_vm4 = vweird.f32 %v2876_v6  ;;  %v1604_v2 = vmul.f32 %v1586_v62, %v3769_v21  ;;  %v1799_v21 = vrot.slane %v3779_v4, 7 }
 0xa8a   :  { %v1765_v38 = vmul.f32 %v2878_v34, %v1732_v48  ;;  %vm1741_vm6 = vmor %vm1739_vm5, %vm1740_vm4  ;;  %vm1770_vm8 = vweird.f32 %v2878_v34  ;;  %v1798_v48 = vrot.slane %v3775_v27, 7 }
 0xa8b   :  { %v1736_v22 = vsub.f32 1.0, %v1735_v17  ;;  %vm1771_vm10 = vmor %vm1769_vm9, %vm1770_vm8 }
 0xa8c   :  { %v1766_v46 = vsub.f32 1.0, %v1765_v38 }
 0xa8d   :  { %v1737_v7 = vmul.f32 %v2876_v6, %v1736_v22 }
 0xa8e   :  { %v1767_v0 = vmul.f32 %v2878_v34, %v1766_v46 }
 0xa8f   :  { %v1738_v54 = vadd.f32 %v2876_v6, %v1737_v7 }
 0xa90   :  { %v1768_v8 = vadd.f32 %v2878_v34, %v1767_v0 }
 0xa91   :  { %v1742_v12 = vsel %vm1741_vm6, %v2876_v6, %v1738_v54 }
 0xa92   :  { %v1747_v44 = vsel %vm1744_vm7, %v1746_v13, %v1742_v12  ;;  %v1772_v5 = vsel %vm1771_vm10, %v2878_v34, %v1768_v8  ;;  %v2650_v34 = vmul.f32 -1.442695, %v3842_v63 }
 0xa93   :  { %v1802_v22 = vmul.f32 %v1798_v48, %v1747_v44  ;;  %v3898_v48 = vld [vmem:[#allocation4 + $0x50] sm:$0xff] }
 0xac4   :  { %v1607_v23 = vpop.permute.xlu2 %1606 }
 0xac5   :  { %v1609_v15 = vmul.f32 %v1607_v23, %v1586_v62  ;;  %v1777_v23 = vsel %vm1774_vm11, %v1776_v10, %v1772_v5 }
 0xac6   :  { %v1803_v62 = vmul.f32 %v1799_v21, %v1777_v23 }
 0xac7   :  { %1611 = vrot.lane.b32.xlu2 %v1609_v15, %s3117_s0 }
 0xae6   :  { %v1807_v11 = vpop.permute.xlu0 %1806 }
 0xae7   :  { %v1812_v16 = vmul.f32 %v1807_v11, %v1747_v44  ;;  %v1809_v18 = vpop.permute.xlu1 %1808 }
 0xae8   :  { %v1813_v15 = vmul.f32 %v1809_v18, %v1777_v23  ;;  %v3880_v18 = vld [vmem:[#allocation4 + $0x80] sm:$0xff]  ;;  %v3883_v23 = vld [vmem:[#allocation4 + $0x88] sm:$0xff] }
 0xae9   :  { %1816 = vrot.lane.b32.xlu0 %v1812_v16, %s3117_s0 }
 0xaea   :  { %1818 = vrot.lane.b32.xlu1 %v1813_v15, %s3117_s0  ;;  %v3886_v15 = vld [vmem:[#allocation4 + $0x70] sm:$0xff] }
 0xb21   :  { %v1612_v25 = vpop.permute.xlu2 %1611 }
 0xb22   :  { %v3863_v6 = vadd.f32 %v1612_v25, %v1604_v2  ;;  %v3889_v2 = vld [vmem:[#allocation4 + $0x78] sm:$0xff]  ;;  %v3892_v25 = vld [vmem:[#allocation4 + $0x60] sm:$0xff] }
 0xb24   :  { %2879 = vtanh.f32 %v3863_v6 }
 0xb25   :  { %2881 = vpow2.f32 %v2650_v34  ;;  %v3901_v34 = vld [vmem:[#allocation4 + $0x58] sm:$0xff] }
 0xb2a   :  { %v2880_v17 = vpop.eup %2879 }
 0xb2b   :  { %1617 = vrot.lane.b32.xlu2 %v2880_v17, %s3117_s0  ;;  %v2882_v46 = vpop.eup %2881  ;;  %v3895_v17 = vld [vmem:[#allocation4 + $0x68] sm:$0xff] }
 0xb2c   :  { %v1572_v0 = vadd.f32 1.0, %v2882_v46 }
 0xb2e   :  { %v1599_v11 = vand.u32 2147483648, %v1572_v0  ;;  %vm1593_vm13 = vweird.f32 %v1572_v0  ;;  %v1597_v44 = vand.u32 2147483647, %v1572_v0 }
 0xb30   :  { %v1600_v16 = vor.u32 1.1754944e-38, %v1599_v11  ;;  %vm1598_vm15 = vcmp.eq.f32.partialorder %v1597_v44, 8.507059e+37 }
 0xb5b   :  { %v1817_v38 = vpop.permute.xlu0 %1816 }
 0xb5c   :  { %v3869_v7 = vadd.f32 %v1817_v38, %v1802_v22  ;;  %v1819_v54 = vpop.permute.xlu1 %1818  ;;  %v2656_v22 = vmul.f32 -1.442695, %v3847_v33  ;;  %v2658_v38 = vmul.f32 -1.442695, %v3851_v19 }
 0xb5d   :  { %v3873_v55 = vadd.f32 %v1819_v54, %v1803_v62 }
 0xb5e   :  { %2883 = vtanh.f32 %v3869_v7 }
 0xb5f   :  { %2885 = vtanh.f32 %v3873_v55 }
 0xb60   :  { %2887 = vrcp.f32 %v1572_v0 }
 0xb61   :  { %2889 = vpow2.f32 %v2656_v22 }
 0xb62   :  { %2891 = vpow2.f32 %v2658_v38 }
 0xb64   :  { %v2884_v61 = vpop.eup %2883 }
 0xb65   :  { %1828 = vrot.lane.b32.xlu0 %v2884_v61, %s3117_s0  ;;  %v2886_v27 = vpop.eup %2885 }
 0xb66   :  { %1830 = vrot.lane.b32.xlu1 %v2886_v27, %s3117_s0  ;;  %v2888_v63 = vpop.eup %2887 }
 0xb67   :  { %v1589_v12 = vmul.f32 %v2888_v63, %v1572_v0  ;;  %vm1594_vm12 = vweird.f32 %v2888_v63 }
 0xb68   :  { %vm1595_vm14 = vmor %vm1593_vm13, %vm1594_vm12 }
 0xb69   :  { %v1590_v13 = vsub.f32 1.0, %v1589_v12 }
 0xb6b   :  { %v1591_v8 = vmul.f32 %v2888_v63, %v1590_v13 }
 0xb6d   :  { %v1592_v4 = vadd.f32 %v2888_v63, %v1591_v8 }
 0xb6f   :  { %v1596_v52 = vsel %vm1595_vm14, %v2888_v63, %v1592_v4 }
 0xb70   :  { %v1601_v51 = vsel %vm1598_vm15, %v1600_v16, %v1596_v52 }
 0xb85   :  { %v1618_v5 = vpop.permute.xlu2 %1617 }
 0xb86   :  { %v1620_v10 = vmul.f32 %v1618_v5, %v1601_v51 }
 0xb88   :  { %2651 = vmatmul.msk.f32.vlgmr.msra.gmra.mxu2 %vm221_vm1, %v1620_v10  ;;  %2652 = vmatmul.msk.f32.vlgmr.msra.gmra.mxu3 %vm221_vm1, %v1620_v10 }
 0xb89   :  { %1990 = vmatpush.msra.mxu2 %v3880_v18  ;;  %2010 = vmatpush.msra.mxu3 %v3883_v23 }
 0xb8b   :  { %1991 = vmatpush.msra.mxu2 %v3886_v15  ;;  %2011 = vmatpush.msra.mxu3 %v3889_v2 }
 0xb8d   :  { %1992 = vmatpush.msra.mxu2 %v3892_v25  ;;  %2012 = vmatpush.msra.mxu3 %v3895_v17 }
 0xb8f   :  { %1993 = vmatpush.msra.mxu2 %v3898_v48  ;;  %2013 = vmatpush.msra.mxu3 %v3901_v34 }
 0xb91   :  { %1994 = vmatpush.msra.mxu2 %v3652_v36  ;;  %2014 = vmatpush.msra.mxu3 %v3655_v9  ;;  %v2890_v36 = vpop.eup %2889 }
 0xb92   :  { %v1731_v9 = vadd.f32 1.0, %v2890_v36  ;;  %v2892_v21 = vpop.eup %2891 }
 0xb93   :  { %1995 = vmatpush.msra.mxu2 %v3658_v47  ;;  %2015 = vmatpush.msra.mxu3 %v3661_v41  ;;  %v1733_v47 = vadd.f32 1.0, %v2892_v21 }
 0xb94   :  { %2893 = vrcp.f32 %v1731_v9  ;;  %v1760_v33 = vand.u32 2147483648, %v1731_v9  ;;  %vm1754_vm3 = vweird.f32 %v1731_v9  ;;  %v1758_v19 = vand.u32 2147483647, %v1731_v9 }
 0xb95   :  { %1996 = vmatpush.msra.mxu2 %v3664_v39  ;;  %2016 = vmatpush.msra.mxu3 %v3667_v3  ;;  %2895 = vrcp.f32 %v1733_v47  ;;  %v1790_v63 = vand.u32 2147483648, %v1733_v47  ;;  %vm1784_vm6 = vweird.f32 %v1733_v47  ;;  %v1788_v8 = vand.u32 2147483647, %v1733_v47 }
 0xb96   :  { %v1761_v12 = vor.u32 1.1754944e-38, %v1760_v33  ;;  %vm1759_vm7 = vcmp.eq.f32.partialorder %v1758_v19, 8.507059e+37 }
 0xb97   :  { %1997 = vmatpush.msra.mxu2 %v3670_v60  ;;  %2017 = vmatpush.msra.mxu3 %v3673_v56  ;;  %v1791_v52 = vor.u32 1.1754944e-38, %v1790_v63  ;;  %vm1789_vm9 = vcmp.eq.f32.partialorder %v1788_v8, 8.507059e+37 }
 0xb9a   :  { %v2894_v41 = vpop.eup %2893 }
 0xb9b   :  { %v1750_v39 = vmul.f32 %v2894_v41, %v1731_v9  ;;  %v2896_v62 = vpop.eup %2895  ;;  %vm1755_vm2 = vweird.f32 %v2894_v41 }
 0xb9c   :  { %v1780_v3 = vmul.f32 %v2896_v62, %v1733_v47  ;;  %vm1756_vm4 = vmor %vm1754_vm3, %vm1755_vm2  ;;  %vm1785_vm5 = vweird.f32 %v2896_v62 }
 0xb9d   :  { %v1751_v46 = vsub.f32 1.0, %v1750_v39  ;;  %vm1786_vm8 = vmor %vm1784_vm6, %vm1785_vm5 }
 0xb9e   :  { %v1781_v60 = vsub.f32 1.0, %v1780_v3 }
 0xb9f   :  { %v1752_v54 = vmul.f32 %v2894_v41, %v1751_v46 }
 0xba0   :  { %v1782_v56 = vmul.f32 %v2896_v62, %v1781_v60 }
 0xba1   :  { %v1753_v61 = vadd.f32 %v2894_v41, %v1752_v54 }
 0xba2   :  { %v1783_v0 = vadd.f32 %v2896_v62, %v1782_v56 }
 0xba3   :  { %v1757_v27 = vsel %vm1756_vm4, %v2894_v41, %v1753_v61 }
 0xba4   :  { %v1762_v4 = vsel %vm1759_vm7, %v1761_v12, %v1757_v27  ;;  %v1787_v11 = vsel %vm1786_vm8, %v2896_v62, %v1783_v0 }
 0xba5   :  { %v1792_v16 = vsel %vm1789_vm9, %v1791_v52, %v1787_v11 }
 0xbd7   :  { %v1829_v13 = vpop.permute.xlu0 %1828 }
 0xbd8   :  { %v1834_v44 = vmul.f32 %v1829_v13, %v1762_v4  ;;  %v1831_v51 = vpop.permute.xlu1 %1830 }
 0xbd9   :  { %v1835_v5 = vmul.f32 %v1831_v51, %v1792_v16 }
 0xbda   :  { %v1838_v10 = vrot.slane %v1834_v44, 5 }
 0xbdb   :  { %v1839_v22 = vrot.slane %v1835_v5, 4 }
 0xbdd   :  { %v1840_v38 = vsel %vm219_vm0, %v1839_v22, %v1838_v10 }
 0xbde   :  { %2659 = vmatmul.msk.f32.vlgmr.msrb.gmra.mxu2 %vm221_vm1, %v1840_v38  ;;  %2660 = vmatmul.msk.f32.vlgmr.msrb.gmra.mxu3 %vm221_vm1, %v1840_v38 }
 0xbdf   :  { %2268 = vmatpush.msrb.mxu2 %v3681_v26  ;;  %2288 = vmatpush.msrb.mxu3 %v3684_v24  ;;  %v3037_v26 = vld [vmem:[#allocation4 + $0x100] sm:$0xff]  ;;  %v3038_v24 = vld [vmem:[#allocation4 + $0x108] sm:$0xff] }
 0xbe1   :  { %2269 = vmatpush.msrb.mxu2 %v3687_v29  ;;  %2289 = vmatpush.msrb.mxu3 %v3690_v45  ;;  %v3039_v29 = vld [vmem:[#allocation4 + $0xf0] sm:$0xff]  ;;  %v3040_v45 = vld [vmem:[#allocation4 + $0xf8] sm:$0xff] }
 0xbe3   :  { %2270 = vmatpush.msrb.mxu2 %v3693_v53  ;;  %2290 = vmatpush.msrb.mxu3 %v3696_v37  ;;  %v3041_v53 = vld [vmem:[#allocation4 + $0xe0] sm:$0xff]  ;;  %v3042_v37 = vld [vmem:[#allocation4 + $0xe8] sm:$0xff] }
 0xbe5   :  { %2271 = vmatpush.msrb.mxu2 %v3699_v40  ;;  %2291 = vmatpush.msrb.mxu3 %v3702_v28  ;;  %v3043_v40 = vld [vmem:[#allocation4 + $0xd0] sm:$0xff]  ;;  %v3044_v28 = vld [vmem:[#allocation4 + $0xd8] sm:$0xff] }
 0xbe6   :  { %2665 = vmatmul.msk.f32.vlgmr.msra.gmra.mxu2 %vm221_vm1, %v1840_v38  ;;  %2666 = vmatmul.msk.f32.vlgmr.msra.gmra.mxu3 %vm221_vm1, %v1840_v38 }
 0xbe7   :  { %2272 = vmatpush.msrb.mxu2 %v3707_v57  ;;  %2292 = vmatpush.msrb.mxu3 %v3710_v31  ;;  %v3045_v57 = vld [vmem:[#allocation4 + $0xc0] sm:$0xff]  ;;  %v3046_v31 = vld [vmem:[#allocation4 + $0xc8] sm:$0xff] }
 0xbe9   :  { %2273 = vmatpush.msrb.mxu2 %v3713_v32  ;;  %2293 = vmatpush.msrb.mxu3 %v3716_v30  ;;  %v3047_v32 = vld [vmem:[#allocation4 + $0xb0] sm:$0xff]  ;;  %v3048_v30 = vld [vmem:[#allocation4 + $0xb8] sm:$0xff] }
 0xbeb   :  { %2274 = vmatpush.msrb.mxu2 %v3719_v35  ;;  %2294 = vmatpush.msrb.mxu3 %v3722_v14  ;;  %v3049_v35 = vld [vmem:[#allocation4 + $0xa0] sm:$0xff]  ;;  %v3050_v14 = vld [vmem:[#allocation4 + $0xa8] sm:$0xff] }
 0xbed   :  { %2275 = vmatpush.msrb.mxu2 %v3725_v20  ;;  %2295 = vmatpush.msrb.mxu3 %v3728_v59  ;;  %v3051_v20 = vld [vmem:[#allocation4 + $0x90] sm:$0xff]  ;;  %v3052_v59 = vld [vmem:[#allocation4 + $0x98] sm:$0xff] }
 0xbef   :  { %2487 = vmatpush.msra.mxu2 %v3037_v26  ;;  %2507 = vmatpush.msra.mxu3 %v3038_v24 }
 0xbf1   :  { %2488 = vmatpush.msra.mxu2 %v3039_v29  ;;  %2508 = vmatpush.msra.mxu3 %v3040_v45 }
 0xbf3   :  { %2489 = vmatpush.msra.mxu2 %v3041_v53  ;;  %2509 = vmatpush.msra.mxu3 %v3042_v37 }
 0xbf5   :  { %2490 = vmatpush.msra.mxu2 %v3043_v40  ;;  %2510 = vmatpush.msra.mxu3 %v3044_v28 }
 0xbf7   :  { %2491 = vmatpush.msra.mxu2 %v3045_v57  ;;  %2511 = vmatpush.msra.mxu3 %v3046_v31 }
 0xbf9   :  { %2492 = vmatpush.msra.mxu2 %v3047_v32  ;;  %2512 = vmatpush.msra.mxu3 %v3048_v30 }
 0xbfb   :  { %2493 = vmatpush.msra.mxu2 %v3049_v35  ;;  %2513 = vmatpush.msra.mxu3 %v3050_v14 }
 0xbfd   :  { %2494 = vmatpush.msra.mxu2 %v3051_v20  ;;  %2514 = vmatpush.msra.mxu3 %v3052_v59 }
 0xc0b   :  { %v1661_v36 = vpop.f32.mrf.mxu3  ;;  %v1641_v61 = vpop.f32.mrf.mxu2 }
 0xc0c   :  { %v1662_v9 = vadd.f32 %v1661_v36, %v4107_v42  ;;  %v1642_v19 = vadd.f32 %v1641_v61, %v4110_v50 }
 0xc61   :  { %v1880_v21 = vpop.f32.mrf.mxu3  ;;  %v1860_v33 = vpop.f32.mrf.mxu2 }
 0xc62   :  { %v3936_v47 = vadd.f32 %v1880_v21, %v1662_v9  ;;  %v1861_v0 = vadd.f32 %v1860_v33, %v1642_v19 }
 0xc64   :  { %2897 = vtanh.f32 %v3936_v47  ;;  %v2661_v27 = vmul.f32 -1.442695, %v1861_v0 }
 0xc69   :  { %v2019_v41 = vpop.f32.mrf.mxu3  ;;  %v1999_v8 = vpop.f32.mrf.mxu2 }
 0xc6a   :  { %v2898_v39 = vpop.eup %2897  ;;  %v2025_v62 = vrot.slane %v2019_v41, 2  ;;  %v2027_v46 = vrot.slane %v2019_v41, 3  ;;  %v2024_v4 = vrot.slane %v1999_v8, 2  ;;  %v2026_v16 = vrot.slane %v1999_v8, 3 }
 0xc6b   :  { %1924 = vrot.lane.b32.xlu2 %v2898_v39, %s3117_s0 }
 0xc6c   :  { %v3941_v3 = vadd.f32 %v2025_v62, %v4108_v1  ;;  %v3945_v60 = vadd.f32 %v2027_v46, %v4109_v49  ;;  %v2032_v44 = vadd.f32 %v2024_v4, %v4111_v58  ;;  %v2034_v10 = vadd.f32 %v2026_v16, %v4112_v43 }
 0xc6e   :  { %2899 = vtanh.f32 %v3941_v3  ;;  %v2667_v51 = vmul.f32 -1.442695, %v2032_v44  ;;  %v2669_v24 = vmul.f32 -1.442695, %v2034_v10 }
 0xc6f   :  { %2901 = vtanh.f32 %v3945_v60 }
 0xc70   :  { %2903 = vpow2.f32 %v2661_v27 }
 0xc74   :  { %v2900_v54 = vpop.eup %2899 }
 0xc75   :  { %2124 = vrot.lane.b32.xlu0 %v2900_v54, %s3117_s0  ;;  %v2902_v56 = vpop.eup %2901 }
 0xc76   :  { %2126 = vrot.lane.b32.xlu1 %v2902_v56, %s3117_s0  ;;  %v2904_v63 = vpop.eup %2903 }
 0xc77   :  { %v1889_v12 = vadd.f32 1.0, %v2904_v63 }
 0xc79   :  { %2905 = vrcp.f32 %v1889_v12  ;;  %v1902_v38 = vand.u32 2147483648, %v1889_v12  ;;  %vm1896_vm11 = vweird.f32 %v1889_v12  ;;  %v1900_v26 = vand.u32 2147483647, %v1889_v12 }
 0xc7a   :  { %2907 = vpow2.f32 %v2667_v51  ;;  %v2116_v51 = vrot.slane %v3869_v7, 7 }
 0xc7b   :  { %v1903_v45 = vor.u32 1.1754944e-38, %v1902_v38  ;;  %vm1901_vm13 = vcmp.eq.f32.partialorder %v1900_v26, 8.507059e+37  ;;  %2909 = vpow2.f32 %v2669_v24 }
 0xc7f   :  { %v2906_v13 = vpop.eup %2905 }
 0xc80   :  { %v1892_v11 = vmul.f32 %v2906_v13, %v1889_v12  ;;  %vm1897_vm10 = vweird.f32 %v2906_v13  ;;  %v2908_v53 = vpop.eup %2907 }
 0xc81   :  { %vm1898_vm12 = vmor %vm1896_vm11, %vm1897_vm10  ;;  %v2048_v57 = vadd.f32 1.0, %v2908_v53  ;;  %v2910_v31 = vpop.eup %2909 }
 0xc82   :  { %v1893_v52 = vsub.f32 1.0, %v1892_v11  ;;  %v2050_v32 = vadd.f32 1.0, %v2910_v31 }
 0xc83   :  { %2911 = vrcp.f32 %v2048_v57  ;;  %v2063_v41 = vand.u32 2147483648, %v2048_v57  ;;  %vm2057_vm15 = vweird.f32 %v2048_v57  ;;  %v2061_v39 = vand.u32 2147483647, %v2048_v57 }
 0xc84   :  { %v1894_v5 = vmul.f32 %v2906_v13, %v1893_v52  ;;  %2913 = vrcp.f32 %v2050_v32  ;;  %v2093_v19 = vand.u32 2147483648, %v2050_v32  ;;  %vm2087_vm5 = vweird.f32 %v2050_v32 }
 0xc85   :  { %v2064_v54 = vor.u32 1.1754944e-38, %v2063_v41  ;;  %vm2062_vm3 = vcmp.eq.f32.partialorder %v2061_v39, 8.507059e+37  ;;  %v2091_v27 = vand.u32 2147483647, %v2050_v32 }
 0xc86   :  { %v1895_v22 = vadd.f32 %v2906_v13, %v1894_v5  ;;  %v2094_v12 = vor.u32 1.1754944e-38, %v2093_v19  ;;  %v2662_v5 = vmul.f32 -1.442695, %v3936_v47 }
 0xc87   :  { %vm2092_vm7 = vcmp.eq.f32.partialorder %v2091_v27, 8.507059e+37 }
 0xc88   :  { %v1899_v29 = vsel %vm1898_vm12, %v2906_v13, %v1895_v22 }
 0xc89   :  { %v1904_v40 = vsel %vm1901_vm13, %v1903_v45, %v1899_v29  ;;  %v2912_v30 = vpop.eup %2911 }
 0xc8a   :  { %v2053_v35 = vmul.f32 %v2912_v30, %v2048_v57  ;;  %v2914_v14 = vpop.eup %2913  ;;  %vm2058_vm14 = vweird.f32 %v2912_v30  ;;  %v1922_v11 = vmul.f32 %v1904_v40, %v3863_v6  ;;  %v2117_v6 = vrot.slane %v3873_v55, 7 }
 0xc8b   :  { %v2083_v59 = vmul.f32 %v2914_v14, %v2050_v32  ;;  %vm2059_vm2 = vmor %vm2057_vm15, %vm2058_vm14  ;;  %vm2088_vm4 = vweird.f32 %v2914_v14 }
 0xc8c   :  { %v2054_v20 = vsub.f32 1.0, %v2053_v35  ;;  %vm2089_vm6 = vmor %vm2087_vm5, %vm2088_vm4 }
 0xc8d   :  { %v2084_v9 = vsub.f32 1.0, %v2083_v59 }
 0xc8e   :  { %v2055_v36 = vmul.f32 %v2912_v30, %v2054_v20 }
 0xc8f   :  { %v2085_v62 = vmul.f32 %v2914_v14, %v2084_v9  ;;  %v3054_v9 = vld [vmem:[#allocation4 + $0x48] sm:$0xff] }
 0xc90   :  { %v2056_v21 = vadd.f32 %v2912_v30, %v2055_v36  ;;  %v3053_v36 = vld [vmem:[#allocation4 + $0x40] sm:$0xff] }
 0xc91   :  { %v2086_v56 = vadd.f32 %v2914_v14, %v2085_v62 }
 0xc92   :  { %v2060_v46 = vsel %vm2059_vm2, %v2912_v30, %v2056_v21  ;;  %v3055_v21 = vld [vmem:[#allocation4 + $0x30] sm:$0xff] }
 0xc93   :  { %v2065_v33 = vsel %vm2062_vm3, %v2064_v54, %v2060_v46  ;;  %v2090_v63 = vsel %vm2089_vm6, %v2914_v14, %v2086_v56 }
 0xc94   :  { %v2095_v8 = vsel %vm2092_vm7, %v2094_v12, %v2090_v63  ;;  %v2120_v10 = vmul.f32 %v2116_v51, %v2065_v33 }
 0xc95   :  { %v2121_v26 = vmul.f32 %v2117_v6, %v2095_v8 }
 0xcc5   :  { %v1925_v37 = vpop.permute.xlu2 %1924 }
 0xcc6   :  { %v1927_v28 = vmul.f32 %v1925_v37, %v1904_v40 }
 0xcc8   :  { %1929 = vrot.lane.b32.xlu2 %v1927_v28, %s3117_s0 }
 0xce7   :  { %v2125_v61 = vpop.permute.xlu0 %2124 }
 0xce8   :  { %v2130_v0 = vmul.f32 %v2125_v61, %v2065_v33  ;;  %v2127_v13 = vpop.permute.xlu1 %2126 }
 0xce9   :  { %v2131_v4 = vmul.f32 %v2127_v13, %v2095_v8 }
 0xcea   :  { %2134 = vrot.lane.b32.xlu0 %v2130_v0, %s3117_s0 }
 0xceb   :  { %2136 = vrot.lane.b32.xlu1 %v2131_v4, %s3117_s0 }
 0xd22   :  { %v1930_v44 = vpop.permute.xlu2 %1929 }
 0xd23   :  { %v3957_v52 = vadd.f32 %v1930_v44, %v1922_v11 }
 0xd25   :  { %2915 = vtanh.f32 %v3957_v52 }
 0xd26   :  { %2917 = vpow2.f32 %v2662_v5 }
 0xd2b   :  { %v2916_v16 = vpop.eup %2915 }
 0xd2c   :  { %1935 = vrot.lane.b32.xlu2 %v2916_v16, %s3117_s0  ;;  %v2918_v24 = vpop.eup %2917 }
 0xd2d   :  { %v1890_v37 = vadd.f32 1.0, %v2918_v24 }
 0xd2f   :  { %v1917_v31 = vand.u32 2147483648, %v1890_v37  ;;  %vm1911_vm9 = vweird.f32 %v1890_v37  ;;  %v1915_v32 = vand.u32 2147483647, %v1890_v37 }
 0xd31   :  { %v1918_v35 = vor.u32 1.1754944e-38, %v1917_v31  ;;  %vm1916_vm11 = vcmp.eq.f32.partialorder %v1915_v32, 8.507059e+37 }
 0xd5c   :  { %v2135_v22 = vpop.permute.xlu0 %2134 }
 0xd5d   :  { %v3963_v38 = vadd.f32 %v2135_v22, %v2120_v10  ;;  %v2137_v29 = vpop.permute.xlu1 %2136 }
 0xd5e   :  { %v3967_v45 = vadd.f32 %v2137_v29, %v2121_v26 }
 0xd5f   :  { %2919 = vtanh.f32 %v3963_v38 }
 0xd60   :  { %2921 = vtanh.f32 %v3967_v45 }
 0xd61   :  { %2923 = vrcp.f32 %v1890_v37 }
 0xd65   :  { %v2920_v53 = vpop.eup %2919 }
 0xd66   :  { %2146 = vrot.lane.b32.xlu0 %v2920_v53, %s3117_s0  ;;  %v2922_v7 = vpop.eup %2921 }
 0xd67   :  { %2148 = vrot.lane.b32.xlu1 %v2922_v7, %s3117_s0  ;;  %v2924_v47 = vpop.eup %2923 }
 0xd68   :  { %v1907_v40 = vmul.f32 %v2924_v47, %v1890_v37  ;;  %vm1912_vm8 = vweird.f32 %v2924_v47 }
 0xd69   :  { %vm1913_vm10 = vmor %vm1911_vm9, %vm1912_vm8 }
 0xd6a   :  { %v1908_v28 = vsub.f32 1.0, %v1907_v40 }
 0xd6c   :  { %v1909_v57 = vmul.f32 %v2924_v47, %v1908_v28 }
 0xd6e   :  { %v1910_v55 = vadd.f32 %v2924_v47, %v1909_v57 }
 0xd70   :  { %v1914_v30 = vsel %vm1913_vm10, %v2924_v47, %v1910_v55 }
 0xd71   :  { %v1919_v14 = vsel %vm1916_vm11, %v1918_v35, %v1914_v30 }
 0xd86   :  { %v1936_v20 = vpop.permute.xlu2 %1935 }
 0xd87   :  { %v1938_v59 = vmul.f32 %v1936_v20, %v1919_v14 }
 0xd89   :  { %2663 = vmatmul.msk.f32.vlgmr.msra.gmra.mxu0 %vm221_vm1, %v1938_v59  ;;  %2664 = vmatmul.msk.f32.vlgmr.msra.gmra.mxu1 %vm221_vm1, %v1938_v59 }
 0xd8a   :  { %2308 = vmatpush.msra.mxu0 %v3880_v18  ;;  %2328 = vmatpush.msra.mxu1 %v3883_v23  ;;  %v3056_v18 = vld [vmem:[#allocation4 + $0x38] sm:$0xff]  ;;  %v3057_v23 = vld [vmem:[#allocation4 + $0x20] sm:$0xff] }
 0xd8c   :  { %2309 = vmatpush.msra.mxu0 %v3886_v15  ;;  %2329 = vmatpush.msra.mxu1 %v3889_v2  ;;  %v3058_v15 = vld [vmem:[#allocation4 + $0x28] sm:$0xff]  ;;  %v3059_v2 = vld [vmem:[#allocation4 + $0x10] sm:$0xff] }
 0xd8e   :  { %2310 = vmatpush.msra.mxu0 %v3892_v25  ;;  %2330 = vmatpush.msra.mxu1 %v3895_v17  ;;  %v3060_v25 = vld [vmem:[#allocation4 + $0x18] sm:$0xff]  ;;  %v2668_v17 = vmul.f32 -1.442695, %v3941_v3 }
 0xd90   :  { %2311 = vmatpush.msra.mxu0 %v3898_v48  ;;  %2331 = vmatpush.msra.mxu1 %v3901_v34  ;;  %2925 = vpow2.f32 %v2668_v17  ;;  %v2670_v48 = vmul.f32 -1.442695, %v3945_v60 }
 0xd92   :  { %2312 = vmatpush.msra.mxu0 %v3053_v36  ;;  %2332 = vmatpush.msra.mxu1 %v3054_v9  ;;  %2927 = vpow2.f32 %v2670_v48 }
 0xd94   :  { %2313 = vmatpush.msra.mxu0 %v3055_v21  ;;  %2333 = vmatpush.msra.mxu1 %v3056_v18 }
 0xd96   :  { %2314 = vmatpush.msra.mxu0 %v3057_v23  ;;  %2334 = vmatpush.msra.mxu1 %v3058_v15  ;;  %v2926_v34 = vpop.eup %2925 }
 0xd97   :  { %v2049_v41 = vadd.f32 1.0, %v2926_v34 }
 0xd98   :  { %2315 = vmatpush.msra.mxu0 %v3059_v2  ;;  %2335 = vmatpush.msra.mxu1 %v3060_v25  ;;  %v2928_v39 = vpop.eup %2927 }
 0xd99   :  { %v2051_v62 = vadd.f32 1.0, %v2928_v39  ;;  %2929 = vrcp.f32 %v2049_v41  ;;  %v2078_v3 = vand.u32 2147483648, %v2049_v41  ;;  %vm2072_vm13 = vweird.f32 %v2049_v41 }
 0xd9a   :  { %v2076_v60 = vand.u32 2147483647, %v2049_v41 }
 0xd9b   :  { %2931 = vrcp.f32 %v2051_v62  ;;  %v2108_v8 = vand.u32 2147483648, %v2051_v62  ;;  %v2079_v4 = vor.u32 1.1754944e-38, %v2078_v3  ;;  %vm2102_vm2 = vweird.f32 %v2051_v62 }
 0xd9c   :  { %v2106_v44 = vand.u32 2147483647, %v2051_v62  ;;  %vm2077_vm3 = vcmp.eq.f32.partialorder %v2076_v60, 8.507059e+37 }
 0xd9d   :  { %v2109_v10 = vor.u32 1.1754944e-38, %v2108_v8 }
 0xd9e   :  { %vm2107_vm5 = vcmp.eq.f32.partialorder %v2106_v44, 8.507059e+37 }
 0xd9f   :  { %v2930_v46 = vpop.eup %2929 }
 0xda0   :  { %v2068_v54 = vmul.f32 %v2930_v46, %v2049_v41  ;;  %vm2073_vm12 = vweird.f32 %v2930_v46 }
 0xda1   :  { %v2932_v56 = vpop.eup %2931  ;;  %vm2074_vm14 = vmor %vm2072_vm13, %vm2073_vm12 }
 0xda2   :  { %v2098_v61 = vmul.f32 %v2932_v56, %v2051_v62  ;;  %v2069_v33 = vsub.f32 1.0, %v2068_v54  ;;  %vm2103_vm15 = vweird.f32 %v2932_v56 }
 0xda3   :  { %vm2104_vm4 = vmor %vm2102_vm2, %vm2103_vm15 }
 0xda4   :  { %v2099_v19 = vsub.f32 1.0, %v2098_v61  ;;  %v2070_v0 = vmul.f32 %v2930_v46, %v2069_v33 }
 0xda6   :  { %v2100_v27 = vmul.f32 %v2932_v56, %v2099_v19  ;;  %v2071_v63 = vadd.f32 %v2930_v46, %v2070_v0 }
 0xda8   :  { %v2101_v12 = vadd.f32 %v2932_v56, %v2100_v27  ;;  %v2075_v13 = vsel %vm2074_vm14, %v2930_v46, %v2071_v63 }
 0xda9   :  { %v2080_v16 = vsel %vm2077_vm3, %v2079_v4, %v2075_v13 }
 0xdaa   :  { %v2105_v51 = vsel %vm2104_vm4, %v2932_v56, %v2101_v12 }
 0xdab   :  { %v2110_v22 = vsel %vm2107_vm5, %v2109_v10, %v2105_v51 }
 0xdd8   :  { %v2147_v11 = vpop.permute.xlu0 %2146 }
 0xdd9   :  { %v2152_v5 = vmul.f32 %v2147_v11, %v2080_v16  ;;  %v2149_v6 = vpop.permute.xlu1 %2148 }
 0xdda   :  { %v2153_v26 = vmul.f32 %v2149_v6, %v2110_v22 }
 0xddb   :  { %v2156_v24 = vrot.slane %v2152_v5, 6 }
 0xddc   :  { %v2157_v29 = vrot.slane %v2153_v26, 5 }
 0xdde   :  { %v2158_v53 = vsel %vm219_vm0, %v2157_v29, %v2156_v24 }
 0xddf   :  { %2671 = vmatmul.msk.f32.vlgmr.msrb.gmra.mxu0 %vm221_vm1, %v2158_v53  ;;  %2672 = vmatmul.msk.f32.vlgmr.msrb.gmra.mxu1 %vm221_vm1, %v2158_v53 }
 0xde7   :  { %2677 = vmatmul.msk.f32.vlgmr.msra.gmra.mxu0 %vm221_vm1, %v2158_v53  ;;  %2678 = vmatmul.msk.f32.vlgmr.msra.gmra.mxu1 %vm221_vm1, %v2158_v53 }
 0xe06   :  { %v1979_v37 = vpop.f32.mrf.mxu1  ;;  %v1959_v20 = vpop.f32.mrf.mxu0 }
 0xe07   :  { %v1980_v7 = vadd.f32 %v1979_v37, %v4107_v42  ;;  %v1960_v36 = vadd.f32 %v1959_v20, %v4110_v50 }
 0xe5c   :  { %v2198_v47 = vpop.f32.mrf.mxu1  ;;  %v2178_v59 = vpop.f32.mrf.mxu0 }
 0xe5d   :  { %v3990_v40 = vadd.f32 %v2198_v47, %v1980_v7 }
 0xe5f   :  { %2933 = vtanh.f32 %v3990_v40 }
 0xe64   :  { %v2337_v28 = vpop.f32.mrf.mxu1  ;;  %v2317_v23 = vpop.f32.mrf.mxu0 }
 0xe65   :  { %v2934_v57 = vpop.eup %2933  ;;  %v2343_v55 = vrot.slane %v2337_v28, 1  ;;  %v2345_v32 = vrot.slane %v2337_v28, 2  ;;  %v2342_v15 = vrot.slane %v2317_v23, 1  ;;  %v2344_v48 = vrot.slane %v2317_v23, 2 }
 0xe66   :  { %2242 = vrot.lane.b32.xlu2 %v2934_v57, %s3117_s0 }
 0xe67   :  { %v3995_v31 = vadd.f32 %v2343_v55, %v4108_v1  ;;  %v3999_v30 = vadd.f32 %v2345_v32, %v4109_v49  ;;  %v2179_v1 = vadd.f32 %v2178_v59, %v1960_v36  ;;  %v2350_v25 = vadd.f32 %v2342_v15, %v4111_v58 }
 0xe68   :  { %v2352_v39 = vadd.f32 %v2344_v48, %v4112_v43  ;;  %v2434_v36 = vrot.slane %v3963_v38, 7 }
 0xe69   :  { %2935 = vtanh.f32 %v3995_v31  ;;  %v2673_v9 = vmul.f32 -1.442695, %v2179_v1  ;;  %v2679_v34 = vmul.f32 -1.442695, %v2350_v25  ;;  %v2674_v1 = vmul.f32 -1.442695, %v3990_v40 }
 0xe6a   :  { %2937 = vtanh.f32 %v3999_v30  ;;  %v2681_v56 = vmul.f32 -1.442695, %v2352_v39 }
 0xe6b   :  { %2939 = vpow2.f32 %v2673_v9 }
 0xe6f   :  { %v2936_v35 = vpop.eup %2935 }
 0xe70   :  { %2442 = vrot.lane.b32.xlu0 %v2936_v35, %s3117_s0  ;;  %v2938_v14 = vpop.eup %2937 }
 0xe71   :  { %2444 = vrot.lane.b32.xlu1 %v2938_v14, %s3117_s0  ;;  %v2940_v21 = vpop.eup %2939 }
 0xe72   :  { %v2207_v18 = vadd.f32 1.0, %v2940_v21 }
 0xe74   :  { %2941 = vrcp.f32 %v2207_v18  ;;  %v2220_v46 = vand.u32 2147483648, %v2207_v18  ;;  %vm2214_vm7 = vweird.f32 %v2207_v18  ;;  %v2218_v54 = vand.u32 2147483647, %v2207_v18 }
 0xe75   :  { %2943 = vpow2.f32 %v2679_v34 }
 0xe76   :  { %v2221_v33 = vor.u32 1.1754944e-38, %v2220_v46  ;;  %vm2219_vm9 = vcmp.eq.f32.partialorder %v2218_v54, 8.507059e+37  ;;  %2945 = vpow2.f32 %v2681_v56 }
 0xe7a   :  { %v2942_v49 = vpop.eup %2941 }
 0xe7b   :  { %v2210_v2 = vmul.f32 %v2942_v49, %v2207_v18  ;;  %vm2215_vm6 = vweird.f32 %v2942_v49  ;;  %v2944_v19 = vpop.eup %2943 }
 0xe7c   :  { %vm2216_vm8 = vmor %vm2214_vm7, %vm2215_vm6  ;;  %v2366_v63 = vadd.f32 1.0, %v2944_v19  ;;  %v2946_v43 = vpop.eup %2945  ;;  %v2680_v19 = vmul.f32 -1.442695, %v3995_v31 }
 0xe7d   :  { %v2211_v17 = vsub.f32 1.0, %v2210_v2  ;;  %v2368_v3 = vadd.f32 1.0, %v2946_v43 }
 0xe7e   :  { %2947 = vrcp.f32 %v2366_v63  ;;  %v2381_v51 = vand.u32 2147483648, %v2366_v63  ;;  %vm2375_vm11 = vweird.f32 %v2366_v63  ;;  %v2379_v5 = vand.u32 2147483647, %v2366_v63 }
 0xe7f   :  { %v2212_v41 = vmul.f32 %v2942_v49, %v2211_v17  ;;  %2949 = vrcp.f32 %v2368_v3  ;;  %v2411_v53 = vand.u32 2147483648, %v2368_v3  ;;  %vm2405_vm15 = vweird.f32 %v2368_v3 }
 0xe80   :  { %v2382_v6 = vor.u32 1.1754944e-38, %v2381_v51  ;;  %vm2380_vm13 = vcmp.eq.f32.partialorder %v2379_v5, 8.507059e+37  ;;  %v2409_v7 = vand.u32 2147483647, %v2368_v3 }
 0xe81   :  { %v2213_v62 = vadd.f32 %v2942_v49, %v2212_v41  ;;  %v2412_v28 = vor.u32 1.1754944e-38, %v2411_v53 }
 0xe82   :  { %vm2410_vm3 = vcmp.eq.f32.partialorder %v2409_v7, 8.507059e+37 }
 0xe83   :  { %v2217_v61 = vsel %vm2216_vm8, %v2942_v49, %v2213_v62  ;;  %v2435_v49 = vrot.slane %v3967_v45, 7 }
 0xe84   :  { %v2222_v0 = vsel %vm2219_vm9, %v2221_v33, %v2217_v61  ;;  %v2948_v60 = vpop.eup %2947 }
 0xe85   :  { %v2371_v12 = vmul.f32 %v2948_v60, %v2366_v63  ;;  %v2950_v13 = vpop.eup %2949  ;;  %vm2376_vm10 = vweird.f32 %v2948_v60  ;;  %v2240_v35 = vmul.f32 %v2222_v0, %v3957_v52 }
 0xe86   :  { %v2401_v4 = vmul.f32 %v2950_v13, %v2368_v3  ;;  %vm2377_vm12 = vmor %vm2375_vm11, %vm2376_vm10  ;;  %vm2406_vm14 = vweird.f32 %v2950_v13 }
 0xe87   :  { %v2372_v8 = vsub.f32 1.0, %v2371_v12  ;;  %vm2407_vm2 = vmor %vm2405_vm15, %vm2406_vm14 }
 0xe88   :  { %v2402_v44 = vsub.f32 1.0, %v2401_v4 }
 0xe89   :  { %v2373_v11 = vmul.f32 %v2948_v60, %v2372_v8 }
 0xe8a   :  { %v2403_v10 = vmul.f32 %v2950_v13, %v2402_v44 }
 0xe8b   :  { %v2374_v16 = vadd.f32 %v2948_v60, %v2373_v11 }
 0xe8c   :  { %v2404_v26 = vadd.f32 %v2950_v13, %v2403_v10 }
 0xe8d   :  { %v2378_v22 = vsel %vm2377_vm12, %v2948_v60, %v2374_v16 }
 0xe8e   :  { %v2383_v29 = vsel %vm2380_vm13, %v2382_v6, %v2378_v22  ;;  %v2408_v47 = vsel %vm2407_vm2, %v2950_v13, %v2404_v26 }
 0xe8f   :  { %v2413_v55 = vsel %vm2410_vm3, %v2412_v28, %v2408_v47  ;;  %v2438_v9 = vmul.f32 %v2434_v36, %v2383_v29 }
 0xe90   :  { %v2439_v52 = vmul.f32 %v2435_v49, %v2413_v55 }
 0xec0   :  { %v2243_v58 = vpop.permute.xlu2 %2242 }
 0xec1   :  { %v2245_v27 = vmul.f32 %v2243_v58, %v2222_v0  ;;  %v2682_v58 = vmul.f32 -1.442695, %v3999_v30 }
 0xec3   :  { %2247 = vrot.lane.b32.xlu2 %v2245_v27, %s3117_s0 }
 0xee2   :  { %v2443_v24 = vpop.permute.xlu0 %2442 }
 0xee3   :  { %v2448_v37 = vmul.f32 %v2443_v24, %v2383_v29  ;;  %v2445_v57 = vpop.permute.xlu1 %2444 }
 0xee4   :  { %v2449_v32 = vmul.f32 %v2445_v57, %v2413_v55 }
 0xee5   :  { %2452 = vrot.lane.b32.xlu0 %v2448_v37, %s3117_s0 }
 0xee6   :  { %2454 = vrot.lane.b32.xlu1 %v2449_v32, %s3117_s0 }
 0xf1d   :  { %v2248_v14 = vpop.permute.xlu2 %2247 }
 0xf1e   :  { %v4011_v20 = vadd.f32 %v2248_v14, %v2240_v35 }
 0xf20   :  { %2951 = vtanh.f32 %v4011_v20 }
 0xf21   :  { %2953 = vpow2.f32 %v2674_v1 }
 0xf26   :  { %v2952_v59 = vpop.eup %2951 }
 0xf27   :  { %2253 = vrot.lane.b32.xlu2 %v2952_v59, %s3117_s0  ;;  %v2954_v23 = vpop.eup %2953 }
 0xf28   :  { %v2208_v17 = vadd.f32 1.0, %v2954_v23 }
 0xf2a   :  { %v2235_v45 = vand.u32 2147483648, %v2208_v17  ;;  %vm2229_vm5 = vweird.f32 %v2208_v17  ;;  %v2233_v62 = vand.u32 2147483647, %v2208_v17 }
 0xf2c   :  { %v2236_v54 = vor.u32 1.1754944e-38, %v2235_v45  ;;  %vm2234_vm7 = vcmp.eq.f32.partialorder %v2233_v62, 8.507059e+37 }
 0xf57   :  { %v2453_v21 = vpop.permute.xlu0 %2452 }
 0xf58   :  { %v2458_v18 = vadd.f32 %v2453_v21, %v2438_v9  ;;  %v2455_v15 = vpop.permute.xlu1 %2454 }
 0xf59   :  { %v2459_v2 = vadd.f32 %v2455_v15, %v2439_v52 }
 0xf5a   :  { %2955 = vtanh.f32 %v2458_v18 }
 0xf5b   :  { %2957 = vtanh.f32 %v2459_v2 }
 0xf5c   :  { %2959 = vrcp.f32 %v2208_v17 }
 0xf5d   :  { %2961 = vpow2.f32 %v2680_v19 }
 0xf5e   :  { %2963 = vpow2.f32 %v2682_v58 }
 0xf60   :  { %v2956_v25 = vpop.eup %2955 }
 0xf61   :  { %2464 = vrot.lane.b32.xlu0 %v2956_v25, %s3117_s0  ;;  %v2958_v38 = vpop.eup %2957 }
 0xf62   :  { %2466 = vrot.lane.b32.xlu1 %v2958_v38, %s3117_s0  ;;  %v2960_v40 = vpop.eup %2959 }
 0xf63   :  { %v2225_v48 = vmul.f32 %v2960_v40, %v2208_v17  ;;  %vm2230_vm4 = vweird.f32 %v2960_v40  ;;  %v2962_v0 = vpop.eup %2961 }
 0xf64   :  { %vm2231_vm6 = vmor %vm2229_vm5, %vm2230_vm4  ;;  %v2367_v27 = vadd.f32 1.0, %v2962_v0  ;;  %v2964_v63 = vpop.eup %2963 }
 0xf65   :  { %v2226_v34 = vsub.f32 1.0, %v2225_v48  ;;  %v2369_v43 = vadd.f32 1.0, %v2964_v63 }
 0xf66   :  { %2965 = vrcp.f32 %v2367_v27  ;;  %v2396_v31 = vand.u32 2147483648, %v2367_v27  ;;  %vm2390_vm9 = vweird.f32 %v2367_v27  ;;  %v2394_v30 = vand.u32 2147483647, %v2367_v27 }
 0xf67   :  { %v2227_v41 = vmul.f32 %v2960_v40, %v2226_v34  ;;  %2967 = vrcp.f32 %v2369_v43  ;;  %v2426_v10 = vand.u32 2147483648, %v2369_v43  ;;  %vm2420_vm12 = vweird.f32 %v2369_v43 }
 0xf68   :  { %v2397_v22 = vor.u32 1.1754944e-38, %v2396_v31  ;;  %v2424_v26 = vand.u32 2147483647, %v2369_v43  ;;  %vm2395_vm13 = vcmp.eq.f32.partialorder %v2394_v30, 8.507059e+37 }
 0xf69   :  { %v2228_v39 = vadd.f32 %v2960_v40, %v2227_v41  ;;  %v2427_v37 = vor.u32 1.1754944e-38, %v2426_v10  ;;  %v49_v30 = vld [vmem:[#allocation4 + $0x4] ss:$8 sm:$0x3] }
 0xf6a   :  { %vm2425_vm15 = vcmp.eq.f32.partialorder %v2424_v26, 8.507059e+37 }
 0xf6b   :  { %v2232_v46 = vsel %vm2231_vm6, %v2960_v40, %v2228_v39 }
 0xf6c   :  { %v2237_v56 = vsel %vm2234_vm7, %v2236_v54, %v2232_v46  ;;  %v2966_v3 = vpop.eup %2965 }
 0xf6d   :  { %v2386_v60 = vmul.f32 %v2966_v3, %v2367_v27  ;;  %v2968_v12 = vpop.eup %2967  ;;  %vm2391_vm8 = vweird.f32 %v2966_v3 }
 0xf6e   :  { %v2416_v13 = vmul.f32 %v2968_v12, %v2369_v43  ;;  %vm2392_vm10 = vmor %vm2390_vm9, %vm2391_vm8  ;;  %vm2421_vm11 = vweird.f32 %v2968_v12  ;;  %vm2579_vm8 = vcmask 517120   ;;  %vm2587_vm9 = vcmask 1024  }
 0xf6f   :  { %v2387_v8 = vsub.f32 1.0, %v2386_v60  ;;  %vm2422_vm14 = vmor %vm2420_vm12, %vm2421_vm11  ;;  %v47_v60 = vld [vmem:[#allocation4 + $0x3] ss:$8 sm:$0x3] }
 0xf70   :  { %v2417_v4 = vsub.f32 1.0, %v2416_v13 }
 0xf71   :  { %v2388_v11 = vmul.f32 %v2966_v3, %v2387_v8  ;;  %v2576_v8 = vperm.slane %v47_v60, 0 }
 0xf72   :  { %v2418_v44 = vmul.f32 %v2968_v12, %v2417_v4 }
 0xf73   :  { %v2389_v16 = vadd.f32 %v2966_v3, %v2388_v11 }
 0xf74   :  { %v2419_v51 = vadd.f32 %v2968_v12, %v2418_v44 }
 0xf75   :  { %v2393_v5 = vsel %vm2392_vm10, %v2966_v3, %v2389_v16 }
 0xf76   :  { %v2398_v24 = vsel %vm2395_vm13, %v2397_v22, %v2393_v5  ;;  %v2423_v29 = vsel %vm2422_vm14, %v2968_v12, %v2419_v51  ;;  %v2584_v51 = vperm.slane %v49_v30, 0 }
 0xf77   :  { %v2428_v7 = vsel %vm2425_vm15, %v2427_v37, %v2423_v29 }
 0xf81   :  { %v2254_v61 = vpop.permute.xlu2 %2253 }
 0xf82   :  { %v2256_v33 = vmul.f32 %v2254_v61, %v2237_v56 }
 0xf84   :  { %2675 = vmatmul.msk.f32.vlgmr.msrb.gmra.mxu2 %vm221_vm1, %v2256_v33  ;;  %2676 = vmatmul.msk.f32.vlgmr.msrb.gmra.mxu3 %vm221_vm1, %v2256_v33 }
 0xfd3   :  { %v2465_v6 = vpop.permute.xlu0 %2464 }
 0xfd4   :  { %v2470_v53 = vmul.f32 %v2465_v6, %v2398_v24  ;;  %v2467_v47 = vpop.permute.xlu1 %2466 }
 0xfd5   :  { %v2471_v28 = vmul.f32 %v2467_v47, %v2428_v7 }
 0xfd6   :  { %v2474_v57 = vrot.slane %v2470_v53, 7 }
 0xfd7   :  { %v2475_v55 = vrot.slane %v2471_v28, 6 }
 0xfd9   :  { %v2476_v32 = vsel %vm219_vm0, %v2475_v55, %v2474_v57 }
 0xfda   :  { %2683 = vmatmul.msk.f32.vlgmr.msra.gmra.mxu2 %vm221_vm1, %v2476_v32  ;;  %2684 = vmatmul.msk.f32.vlgmr.msra.gmra.mxu3 %vm221_vm1, %v2476_v32 }
0x1007   :  { %v2297_v35 = vpop.f32.mrf.mxu3  ;;  %v2277_v9 = vpop.f32.mrf.mxu2 }
0x1008   :  { %v2298_v14 = vadd.f32 %v2297_v35, %v4107_v42  ;;  %v2278_v18 = vadd.f32 %v2277_v9, %v4110_v50 }
0x105d   :  { %v2516_v59 = vpop.f32.mrf.mxu3  ;;  %v2496_v21 = vpop.f32.mrf.mxu2 }
0x105e   :  { %v2517_v36 = vadd.f32 %v2516_v59, %v2298_v14  ;;  %v2497_v49 = vadd.f32 %v2496_v21, %v2278_v18 }
0x1060   :  { %2969 = vtanh.f32 %v2517_v36  ;;  %v2685_v52 = vmul.f32 -1.442695, %v2497_v49  ;;  %v2686_v61 = vmul.f32 -1.442695, %v2517_v36 }
0x1062   :  { %2971 = vpow2.f32 %v2685_v52 }
0x1066   :  { %v2970_v1 = vpop.eup %2969 }
0x1067   :  { %2560 = vrot.lane.b32.xlu2 %v2970_v1, %s3117_s0 }
0x1068   :  { %v2972_v23 = vpop.eup %2971 }
0x1069   :  { %v2525_v15 = vadd.f32 1.0, %v2972_v23 }
0x106b   :  { %2973 = vrcp.f32 %v2525_v15  ;;  %v2538_v40 = vand.u32 2147483648, %v2525_v15  ;;  %vm2532_vm1 = vweird.f32 %v2525_v15  ;;  %v2536_v48 = vand.u32 2147483647, %v2525_v15 }
0x106d   :  { %v2539_v41 = vor.u32 1.1754944e-38, %v2538_v40  ;;  %vm2537_vm3 = vcmp.eq.f32.partialorder %v2536_v48, 8.507059e+37 }
0x1071   :  { %v2974_v2 = vpop.eup %2973 }
0x1072   :  { %v2528_v25 = vmul.f32 %v2974_v2, %v2525_v15  ;;  %vm2533_vm0 = vweird.f32 %v2974_v2 }
0x1073   :  { %vm2534_vm2 = vmor %vm2532_vm1, %vm2533_vm0 }
0x1074   :  { %v2529_v17 = vsub.f32 1.0, %v2528_v25 }
0x1076   :  { %v2530_v42 = vmul.f32 %v2974_v2, %v2529_v17 }
0x1078   :  { %v2531_v38 = vadd.f32 %v2974_v2, %v2530_v42 }
0x107a   :  { %v2535_v34 = vsel %vm2534_vm2, %v2974_v2, %v2531_v38 }
0x107b   :  { %v2540_v39 = vsel %vm2537_vm3, %v2539_v41, %v2535_v34 }
0x107c   :  { %v2558_v62 = vmul.f32 %v2540_v39, %v4011_v20 }
0x10c1   :  { %v2561_v50 = vpop.permute.xlu2 %2560 }
0x10c2   :  { %v2563_v45 = vmul.f32 %v2561_v50, %v2540_v39 }
0x10c4   :  { %2565 = vrot.lane.b32.xlu0 %v2563_v45, %s3117_s0 }
0x1136   :  { %v2566_v46 = vpop.permute.xlu0 %2565 }
0x1137   :  { %v2568_v54 = vadd.f32 %v2566_v46, %v2558_v62 }
0x1139   :  { %2975 = vtanh.f32 %v2568_v54 }
0x113a   :  { %2977 = vpow2.f32 %v2686_v61 }
0x113f   :  { %v2976_v56 = vpop.eup %2975 }
0x1140   :  { %2571 = vrot.lane.b32.xlu1 %v2976_v56, %s3117_s0  ;;  %v2978_v33 = vpop.eup %2977 }
0x1141   :  { %v2526_v19 = vadd.f32 1.0, %v2978_v33 }
0x1143   :  { %2979 = vrcp.f32 %v2526_v19  ;;  %v2553_v3 = vand.u32 2147483648, %v2526_v19  ;;  %vm2547_vm5 = vweird.f32 %v2526_v19  ;;  %v2551_v20 = vand.u32 2147483647, %v2526_v19 }
0x1145   :  { %v2554_v13 = vor.u32 1.1754944e-38, %v2553_v3  ;;  %vm2552_vm7 = vcmp.eq.f32.partialorder %v2551_v20, 8.507059e+37 }
0x1149   :  { %v2980_v58 = vpop.eup %2979 }
0x114a   :  { %v2543_v0 = vmul.f32 %v2980_v58, %v2526_v19  ;;  %vm2548_vm4 = vweird.f32 %v2980_v58 }
0x114b   :  { %vm2549_vm6 = vmor %vm2547_vm5, %vm2548_vm4 }
0x114c   :  { %v2544_v27 = vsub.f32 1.0, %v2543_v0 }
0x114e   :  { %v2545_v63 = vmul.f32 %v2980_v58, %v2544_v27 }
0x1150   :  { %v2546_v43 = vadd.f32 %v2980_v58, %v2545_v63 }
0x1152   :  { %v2550_v12 = vsel %vm2549_vm6, %v2980_v58, %v2546_v43 }
0x1153   :  { %v2555_v4 = vsel %vm2552_vm7, %v2554_v13, %v2550_v12 }
0x11b2   :  { %v2572_v11 = vpop.permute.xlu1 %2571 }
0x11b3   :  { %v2574_v44 = vmul.f32 %v2572_v11, %v2555_v4 }
0x11b5   :  { %v2578_v16 = vmul.f32 %v2576_v8, %v2574_v44 }
0x11b7   :  { %v2580_v31 = vsel %vm2579_vm8, %v2578_v16, 0.0 }
0x11b8   :  { %2581 = vadd.xlane.f32.xlu2 %v2580_v31 }
0x122b   :  { %v2582_v5 = vpop.xlane.xlu2 %2581 }
0x122c   :  { %v2586_v10 = vadd.f32 %v2584_v51, %v2582_v5 }
0x122e   :  { %2588 = vst.msk [vmem:[%s4038_s2] sm:$0x3] %vm2587_vm9, %v2586_v10 }
0x122f   :  { %2593 = vsyncpa [#allocation3], 1 }
0x1230   :  { %2594 = vsyncpa [#allocation5], 1 }

</bundles_post_ra>
